<compile_context>
chip_gen: v6e
topology: v6e:2x2x1
jax: 0.10.0
libtpu: 0.0.40
codegen_flags: <defaults>
</compile_context>

<pallas_src>
import jax
import jax.numpy as jnp
from jax.experimental import pallas as pl
from jax.experimental.pallas import tpu as pltpu

EPS = 1e-5


# ----------------------------------------------------------------------------
# In-kernel helpers (traced inside the Pallas kernel body)
# ----------------------------------------------------------------------------
def _time_shift(a, s, t_idx, limit):
    """out[r] = a[r + s] if the shifted row stays inside the same batch
    element's valid time range [0, limit), else 0.

    a:     (rows, C) f32 value, rows = Bt*T.
    s:     static int shift (in physical rows).
    t_idx: (rows, 1) int32, within-batch-element time index of every row.

    The shift is a static sublane slice + zero fill (kept in f32 so the
    sublane-unaligned concatenate stays on the 32-bit path); the jnp.where
    mask zeroes rows whose source would cross a batch-element boundary, which
    is exactly the temporal conv's zero padding.
    """
    rows, cols = a.shape
    if s == 0:
        return a
    if abs(s) >= limit or abs(s) >= rows:
        return jnp.zeros_like(a)
    zpad = jnp.zeros((abs(s), cols), a.dtype)
    if s > 0:
        raw = jnp.concatenate([a[s:, :], zpad], axis=0)
    else:
        raw = jnp.concatenate([zpad, a[:rows + s, :]], axis=0)
    keep = jnp.logical_and(t_idx + s >= 0, t_idx + s < limit)
    return jnp.where(keep, raw, jnp.zeros_like(raw))


def _temporal_conv(g, w_ref, bias, offsets, t_idx, limit):
    """sum_d shift(g, offsets[d]) @ w_ref[d] + bias   (f32 accumulation).

    g is f32 (rows, C_in); each shifted tap is cast to bf16 right before its
    MXU matmul.  Strided convs are handled by the caller via "physical row"
    offsets ((tap - pad) * cumulative_stride), so every matmul keeps the full
    rows = Bt*T M dimension -- no selection matmuls, gathers or strided slices.
    """
    acc = bias
    for d, s in enumerate(offsets):
        gd = _time_shift(g, s, t_idx, limit).astype(jnp.bfloat16)
        acc = acc + jnp.dot(gd, w_ref[d], preferred_element_type=jnp.float32)
    return acc


def _make_fused_kernel(layer_meta, stage_meta, *, T):
    """Build the fused forward kernel.  One grid step == one batch block."""

    def kernel(*refs):
        idx = 0
        x_ref = refs[idx]; idx += 1
        tix_ref = refs[idx]; idx += 1
        t_idx = tix_ref[...]                   # (rows, 1) int32: row -> time index
        h = x_ref[...]                         # (rows, C_in*V) bf16, rows = Bt*T

        # --- AudioPoseEncoderGraph: stacked GraphConvNormRelu ----------------
        for lm in layer_meta:
            wcat_ref, bcat_ref, wt_ref, t2_ref = refs[idx:idx + 4]; idx += 4
            fov = lm["fov"]
            # One matmul computes the graph-conv pre-activation AND the 1x1
            # shortcut branch (column-concatenated weights); conv bias + BN1
            # scale/shift are folded into wcat / bcat.
            y = jnp.dot(h, wcat_ref[...],
                        preferred_element_type=jnp.float32) + bcat_ref[...]
            g = jnp.maximum(y[:, :fov], 0.0)            # relu(BN1(gconv)), f32
            res = y[:, fov:]                            # shortcut branch, f32
            # temporal (k,1) conv + folded BN2 + relu, then residual add
            tc = _temporal_conv(g, wt_ref, t2_ref[...], lm["offsets"], t_idx, T)
            h = (jnp.maximum(tc, 0.0) + res).astype(jnp.bfloat16)

        # --- spatial pool: Conv2d (1, V) collapses joints ---------------------
        wsp_ref, tsp_ref = refs[idx:idx + 2]; idx += 2
        z = jnp.maximum(jnp.dot(h, wsp_ref[...],
                                preferred_element_type=jnp.float32)
                        + tsp_ref[...], 0.0)            # (rows, C) f32

        # --- temporal pool: strided (ks,1) convs until T == 1 -----------------
        # Logical time t of a stage with cumulative input stride `step` lives at
        # physical row t*step; other rows hold dead values that simply keep the
        # MXU M dimension full.  Only row 0 of each batch element is the result.
        for sm in stage_meta:
            w_ref, t_ref = refs[idx:idx + 2]; idx += 2
            zc = _temporal_conv(z, w_ref, t_ref[...],
                                sm["offsets"], t_idx, sm["limit"])
            z = jnp.maximum(zc, 0.0)

        out_ref = refs[idx]
        out_ref[...] = z.astype(out_ref.dtype)          # lane-dense (rows, emb_pad)

    return kernel


# ----------------------------------------------------------------------------
# Parameter init (deterministic, mirrors the PyTorch module's shapes)
# ----------------------------------------------------------------------------
def init_raw_params(key, cfg):
    V, P, T = cfg["V"], cfg["P"], cfg["T"]
    layer_configs = cfg["layer_configs"]
    emb = cfg["embedding_size"]
    keys = iter(jax.random.split(key, 256))

    def nrm(shape, scale=0.2):
        return scale * jax.random.normal(next(keys), shape, jnp.float32)

    def bn_params(c):  # (gamma, beta, running_mean, running_var) - eval mode
        return (1.0 + 0.1 * jax.random.normal(next(keys), (c,), jnp.float32),
                0.1 * jax.random.normal(next(keys), (c,), jnp.float32),
                0.1 * jax.random.normal(next(keys), (c,), jnp.float32),
                0.5 + jax.random.uniform(next(keys), (c,), jnp.float32))

    # adjacency buffer A: (P, V, V), with self-loops
    A = (jax.random.uniform(next(keys), (P, V, V)) < 0.5).astype(jnp.float32)
    A = jnp.clip(A + jnp.eye(V, dtype=jnp.float32)[None], 0.0, 1.0)

    graph_layers = []
    for (c_in, c_out, k) in layer_configs:
        graph_layers.append(dict(
            c_in=c_in, c_out=c_out, k=k,
            weights=0.5 + jax.random.uniform(next(keys), (P, V, V), jnp.float32),
            Wconv=nrm((P, c_out, c_in)),      # per-part 1x1 Conv2d weight (squeezed)
            bconv=nrm((P, c_out), 0.05),
            bn1=bn_params(c_out),             # BatchNorm2d(c_out)  (local_bn=False)
            Wtc=nrm((c_out, c_out, k)),       # temporal Conv2d (k,1) weight (squeezed)
            btc=nrm((c_out,), 0.05),
            bn2=bn_params(c_out),
            Wsc=nrm((c_out, c_in)),           # shortcut 1x1 Conv2d (C_in != C_out)
            bsc=nrm((c_out,), 0.05),
        ))

    cur_C = layer_configs[-1][1]
    spatial_pool = dict(W=nrm((cur_C, cur_C, V)),   # Conv2d(cur_C,cur_C,(1,V)) squeezed
                        b=nrm((cur_C,), 0.05),
                        bn=bn_params(cur_C))

    temporal_pool = []
    cur_H = T
    while cur_C < emb or cur_H > 1:
        ks, st = 3, 1
        if cur_H > 1:
            if cur_H > 4:
                ks, st = 4, 2
            else:
                ks, st = cur_H, cur_H
        pad = (ks - st) // 2
        o_c = min(emb, cur_C * 2)
        temporal_pool.append(dict(ks=ks, st=st, pad=pad, c_in=cur_C, c_out=o_c,
                                  W=nrm((o_c, cur_C, ks)),   # Conv2d (ks,1) squeezed
                                  b=nrm((o_c,), 0.05),
                                  bn=bn_params(o_c)))
        cur_C = o_c
        if cur_H > 1:
            cur_H = cur_H // 2 if cur_H > 4 else 1
    return dict(A=A, graph_layers=graph_layers,
                spatial_pool=spatial_pool, temporal_pool=temporal_pool)


def _bn_fold(bn):
    g, b, m, v = bn
    s = g / jnp.sqrt(v + EPS)
    return s, b - m * s


def fold_kernel_params(raw, cfg):
    """Fold PyTorch-shaped params into per-kernel matmul weights.

    Conv bias and BatchNorm(eval) scale/shift are folded into the weights
    (W' = W * s per output column, t' = b*s + shift), so the kernel only does
    matmul + add-shift + relu.  Weights are stored bf16, shifts f32.  The final
    stage's output channels are zero-padded to a multiple of 128 so the kernel's
    HBM store is lane-dense.
    """
    V = cfg["V"]
    eye = jnp.eye(V, dtype=jnp.float32)
    A = raw["A"]

    glayers = []
    for gl in raw["graph_layers"]:
        c_in, c_out, k = gl["c_in"], gl["c_out"], gl["k"]
        fov = c_out * V
        Aw = A * gl["weights"]
        # graph conv: M[(c,u),(o,v)] = sum_p Wconv_p[o,c] * Aw_p[u,v]
        Wg = jnp.einsum("poc,puv->cuov", gl["Wconv"], Aw).reshape(c_in * V, fov)
        s1c, t1c = _bn_fold(gl["bn1"])
        Wg = Wg * jnp.repeat(s1c, V)[None, :]                 # fold BN1 scale
        t1 = jnp.repeat(gl["bconv"].sum(0) * s1c + t1c, V)    # fold bias + BN1 shift
        # residual 1x1 shortcut conv: Wsc kron I_V
        Wr = jnp.einsum("oc,vw->cvow", gl["Wsc"], eye).reshape(c_in * V, fov)
        br = jnp.repeat(gl["bsc"], V)
        wcat = jnp.concatenate([Wg, Wr], axis=1).astype(jnp.bfloat16)
        bcat = jnp.concatenate([t1, br])[None, :].astype(jnp.float32)
        # temporal (k,1) conv, per tap: (Wtc[:,:,d] * s2) kron I_V; BN2 folded
        s2c, t2c = _bn_fold(gl["bn2"])
        Wt = jnp.einsum("ocd,vw->dcvow", gl["Wtc"] * s2c[:, None, None], eye)
        Wt = Wt.reshape(k, fov, fov).astype(jnp.bfloat16)
        t2 = jnp.repeat(gl["btc"] * s2c + t2c, V)[None, :].astype(jnp.float32)
        glayers.append(dict(k=k, fov=fov, wcat=wcat, bcat=bcat, wt=Wt, t2=t2))

    sp = raw["spatial_pool"]
    ssp, tsp = _bn_fold(sp["bn"])
    Wsp = jnp.transpose(sp["W"], (1, 2, 0)).reshape(-1, sp["W"].shape[0])
    spool = dict(W=(Wsp * ssp[None, :]).astype(jnp.bfloat16),
                 t=(sp["b"] * ssp + tsp)[None, :].astype(jnp.float32))

    tpool = []
    n_stage = len(raw["temporal_pool"])
    for si, tp in enumerate(raw["temporal_pool"]):
        s, t = _bn_fold(tp["bn"])
        W = jnp.transpose(tp["W"], (2, 1, 0)) * s[None, None, :]   # (ks, c_in, c_out)
        b = tp["b"] * s + t
        if si == n_stage - 1:
            # pad final channels to a 128 multiple -> unmasked lane-dense store
            c_pad = (-W.shape[-1]) % 128
            if c_pad:
                W = jnp.pad(W, ((0, 0), (0, 0), (0, c_pad)))
                b = jnp.pad(b, (0, c_pad))
        tpool.append(dict(ks=tp["ks"], st=tp["st"], pad=tp["pad"],
                          W=W.astype(jnp.bfloat16),
                          t=b[None, :].astype(jnp.float32)))
    return dict(graph_layers=glayers, spatial_pool=spool, temporal_pool=tpool)


# ----------------------------------------------------------------------------
# Forward pass: one fused pallas_call, gridded over batch blocks
# ----------------------------------------------------------------------------
def _pick_block_b(B, T):
    """Largest batch block so rows = Bt*T ~ fills the MXU M dimension while
    keeping >= 2 grid steps (so v7x can shard them across its 2 TensorCores)."""
    target = max(1, 256 // max(T, 1))
    best = 1 if B >= 2 else B
    for bt in range(1, min(B, target) + 1):
        if B % bt == 0 and B // bt >= 2:
            best = bt
    return best


def seq_encoder_graph(x, kp, cfg, *, block_b=None):
    """x: (B, V*C_in, T) -> (B, embedding_size)."""
    B, C, T = x.shape
    V = cfg["V"]
    c_in0 = cfg["layer_configs"][0][0]
    emb = cfg["embedding_size"]
    assert C == V * c_in0

    bt = block_b or _pick_block_b(B, T)
    assert B % bt == 0, "batch must be divisible by the batch block"
    rows = bt * T

    # (B, V*C_in, T) -> rows = B*T of (C_in*V) columns, channel-major joint-minor
    h = (x.reshape(B, V, c_in0, T).transpose(0, 3, 2, 1)
          .reshape(B * T, c_in0 * V).astype(jnp.bfloat16))
    # within-batch-element time index of each row (for padding / boundary masks)
    t_idx = jnp.tile(jnp.arange(T, dtype=jnp.int32), bt).reshape(rows, 1)

    layers = kp["graph_layers"]
    sp = kp["spatial_pool"]
    stages = kp["temporal_pool"]
    emb_pad = stages[-1]["W"].shape[-1]

    layer_meta = [dict(fov=l["fov"],
                       offsets=tuple(d - (l["k"] - 1) // 2 for d in range(l["k"])))
                  for l in layers]
    # Pooling stages run on "physical" rows: logical time t of a stage with
    # cumulative input stride `step` lives at row t*step, so a strided tap is a
    # plain row shift of (tap - pad) * step.  `limit` is the valid physical
    # extent of the stage's input (zero padding beyond it).
    stage_meta = []
    step, t_log = 1, T
    for s in stages:
        ks, st, pad = s["ks"], s["st"], s["pad"]
        stage_meta.append(dict(offsets=tuple((d - pad) * step for d in range(ks)),
                               limit=t_log * step))
        t_log = (t_log + 2 * pad - ks) // st + 1
        step *= st
    assert t_log == 1, "temporal pool must collapse time to a single frame"

    kernel = _make_fused_kernel(layer_meta, stage_meta, T=T)

    def _full(a):  # full-array block, replicated across the batch grid
        nd = a.ndim
        return pl.BlockSpec(a.shape, lambda b, _nd=nd: (0,) * _nd)

    operands = [h, t_idx]
    in_specs = [pl.BlockSpec((rows, c_in0 * V), lambda b: (b, 0)),
                _full(t_idx)]
    for l in layers:
        for name in ("wcat", "bcat", "wt", "t2"):
            operands.append(l[name])
            in_specs.append(_full(l[name]))
    for a in (sp["W"], sp["t"]):
        operands.append(a)
        in_specs.append(_full(a))
    for s in stages:
        for name in ("W", "t"):
            operands.append(s[name])
            in_specs.append(_full(s[name]))

    out = pl.pallas_call(
        kernel,
        out_shape=jax.ShapeDtypeStruct((B * T, emb_pad), jnp.float32),
        grid=(B // bt,),
        in_specs=in_specs,
        out_specs=pl.BlockSpec((rows, emb_pad), lambda b: (b, 0)),
        compiler_params=pltpu.CompilerParams(
            dimension_semantics=("parallel",)),
    )(*operands)
    # The embedding sits at time-row 0 of every batch element; channel columns
    # beyond `emb` are the zero padding added for the lane-dense store.
    return out.reshape(B, T, emb_pad)[:, 0, :emb]


# ----------------------------------------------------------------------------
# Pure-JAX reference (NCHW, mirrors the PyTorch forward exactly, f32)
# ----------------------------------------------------------------------------
def _bn_eval_nchw(x, bn):
    g, b, m, v = bn
    shp = (1, -1) + (1,) * (x.ndim - 2)
    return (x - m.reshape(shp)) / jnp.sqrt(v.reshape(shp) + EPS) * g.reshape(shp) + b.reshape(shp)


def ref_forward(x, raw, cfg):
    B, _, T = x.shape
    V = cfg["V"]
    c_in0 = cfg["layer_configs"][0][0]
    A = raw["A"]
    h = x.reshape(B, V, c_in0, T).transpose(0, 2, 3, 1)            # (B, Cin, T, V)
    for gl in raw["graph_layers"]:
        Aw = A * gl["weights"]
        z = 0.0
        for i in range(A.shape[0]):
            y = jnp.einsum("bctu,uv->bctv", h, Aw[i])
            z = z + jnp.einsum("oc,bctv->botv", gl["Wconv"][i], y) \
                  + gl["bconv"][i][None, :, None, None]
        z = jnp.maximum(_bn_eval_nchw(z, gl["bn1"]), 0.0)
        k = gl["k"]
        p = (k - 1) // 2
        zp = jnp.pad(z, ((0, 0), (0, 0), (p, p), (0, 0)))
        tc = sum(jnp.einsum("oc,bctv->botv", gl["Wtc"][:, :, d], zp[:, :, d:d + T, :])
                 for d in range(k)) + gl["btc"][None, :, None, None]
        tc = jnp.maximum(_bn_eval_nchw(tc, gl["bn2"]), 0.0)
        res = jnp.einsum("oc,bctv->botv", gl["Wsc"], h) + gl["bsc"][None, :, None, None]
        h = tc + res
    sp = raw["spatial_pool"]
    z = jnp.einsum("ocv,bctv->bot", sp["W"], h)[..., None] + sp["b"][None, :, None, None]
    z = jnp.maximum(_bn_eval_nchw(z, sp["bn"]), 0.0)
    for tp in raw["temporal_pool"]:
        ks, st, p = tp["ks"], tp["st"], tp["pad"]
        t_in = z.shape[2]
        t_out = (t_in + 2 * p - ks) // st + 1
        zp = jnp.pad(z, ((0, 0), (0, 0), (p, p), (0, 0)))
        out = sum(jnp.einsum("oc,bctv->botv", tp["W"][:, :, d],
                             zp[:, :, d:d + st * t_out:st, :]) for d in range(ks)) \
              + tp["b"][None, :, None, None]
        z = jnp.maximum(_bn_eval_nchw(out, tp["bn"]), 0.0)
    return z.reshape(B, -1)


# ----------------------------------------------------------------------------
if __name__ == "__main__":
    cfg = dict(V=8, P=2, T=8, embedding_size=32,
               layer_configs=[(2, 8, 3), (8, 16, 3)])   # (C_in, C_out, k) per graph layer
    key = jax.random.PRNGKey(0)
    k_param, k_x = jax.random.split(key)

    raw = init_raw_params(k_param, cfg)
    kp = fold_kernel_params(raw, cfg)

    B = 32                                              # 2 grid steps of 16 -> M=128 rows
    C = cfg["V"] * cfg["layer_configs"][0][0]           # C = num_joints * C_in = 16
    x = jax.random.normal(k_x, (B, C, cfg["T"]), jnp.float32)

    out = jax.block_until_ready(seq_encoder_graph(x, kp, cfg))
    ref = jax.block_until_ready(ref_forward(x, raw, cfg))

    assert out.shape == (B, cfg["embedding_size"]), out.shape
    err = float(jnp.max(jnp.abs(out - ref)))
    scale = float(jnp.max(jnp.abs(ref)))
    # bf16 weights/activations with f32 accumulation: allow bf16-level error
    # relative to the f32 reference's magnitude.
    if err > 5e-2 * max(scale, 1.0):
        raise AssertionError(
            f"kernel/reference mismatch: max abs err {err}, ref scale {scale}")
    print("KERNEL_OK")
</pallas_src>

<mosaic_0001>
module attributes {stable_mosaic.version = 11 : i64} {
  func.func @kernel(%arg0: i32, %arg1: memref<128x16xbf16, #tpu.memory_space<vmem>>, %arg2: memref<128x1xi32, #tpu.memory_space<vmem>>, %arg3: memref<16x128xbf16, #tpu.memory_space<vmem>>, %arg4: memref<1x128xf32, #tpu.memory_space<vmem>>, %arg5: memref<3x64x64xbf16, #tpu.memory_space<vmem>>, %arg6: memref<1x64xf32, #tpu.memory_space<vmem>>, %arg7: memref<64x256xbf16, #tpu.memory_space<vmem>>, %arg8: memref<1x256xf32, #tpu.memory_space<vmem>>, %arg9: memref<3x128x128xbf16, #tpu.memory_space<vmem>>, %arg10: memref<1x128xf32, #tpu.memory_space<vmem>>, %arg11: memref<128x16xbf16, #tpu.memory_space<vmem>>, %arg12: memref<1x16xf32, #tpu.memory_space<vmem>>, %arg13: memref<4x16x32xbf16, #tpu.memory_space<vmem>>, %arg14: memref<1x32xf32, #tpu.memory_space<vmem>>, %arg15: memref<4x32x128xbf16, #tpu.memory_space<vmem>>, %arg16: memref<1x128xf32, #tpu.memory_space<vmem>>, %arg17: memref<128x128xf32, #tpu.memory_space<vmem>>) attributes {dimension_semantics = [#tpu.dimension_semantics<parallel>], iteration_bounds = array<i64: 2>, scalar_prefetch = 0 : i64, scratch_operands = 0 : i64, tpu.core_type = #tpu.core_type<tc>, window_params = [{transform_indices = @transform_0, window_bounds = array<i64: 128, 16>}, {pipeline_mode = #tpu.pipeline_mode<synchronous>, transform_indices = @transform_1, window_bounds = array<i64: 128, 1>}, {pipeline_mode = #tpu.pipeline_mode<synchronous>, transform_indices = @transform_2, window_bounds = array<i64: 16, 128>}, {pipeline_mode = #tpu.pipeline_mode<synchronous>, transform_indices = @transform_3, window_bounds = array<i64: 1, 128>}, {pipeline_mode = #tpu.pipeline_mode<synchronous>, transform_indices = @transform_4, window_bounds = array<i64: 3, 64, 64>}, {pipeline_mode = #tpu.pipeline_mode<synchronous>, transform_indices = @transform_5, window_bounds = array<i64: 1, 64>}, {pipeline_mode = #tpu.pipeline_mode<synchronous>, transform_indices = @transform_6, window_bounds = array<i64: 64, 256>}, {pipeline_mode = #tpu.pipeline_mode<synchronous>, transform_indices = @transform_7, window_bounds = array<i64: 1, 256>}, {pipeline_mode = #tpu.pipeline_mode<synchronous>, transform_indices = @transform_8, window_bounds = array<i64: 3, 128, 128>}, {pipeline_mode = #tpu.pipeline_mode<synchronous>, transform_indices = @transform_9, window_bounds = array<i64: 1, 128>}, {pipeline_mode = #tpu.pipeline_mode<synchronous>, transform_indices = @transform_10, window_bounds = array<i64: 128, 16>}, {pipeline_mode = #tpu.pipeline_mode<synchronous>, transform_indices = @transform_11, window_bounds = array<i64: 1, 16>}, {pipeline_mode = #tpu.pipeline_mode<synchronous>, transform_indices = @transform_12, window_bounds = array<i64: 4, 16, 32>}, {pipeline_mode = #tpu.pipeline_mode<synchronous>, transform_indices = @transform_13, window_bounds = array<i64: 1, 32>}, {pipeline_mode = #tpu.pipeline_mode<synchronous>, transform_indices = @transform_14, window_bounds = array<i64: 4, 32, 128>}, {pipeline_mode = #tpu.pipeline_mode<synchronous>, transform_indices = @transform_15, window_bounds = array<i64: 1, 128>}, {transform_indices = @transform_16, window_bounds = array<i64: 128, 128>}]} {
    %c0 = arith.constant 0 : index
    %c0_0 = arith.constant 0 : index
    %0 = vector.load %arg2[%c0, %c0_0] : memref<128x1xi32, #tpu.memory_space<vmem>>, vector<128x1xi32>
    %c0_1 = arith.constant 0 : index
    %c0_2 = arith.constant 0 : index
    %1 = vector.load %arg1[%c0_1, %c0_2] : memref<128x16xbf16, #tpu.memory_space<vmem>>, vector<128x16xbf16>
    %c0_3 = arith.constant 0 : index
    %c0_4 = arith.constant 0 : index
    %2 = vector.load %arg3[%c0_3, %c0_4] : memref<16x128xbf16, #tpu.memory_space<vmem>>, vector<16x128xbf16>
    %cst = arith.constant dense<0.000000e+00> : vector<128x128xf32>
    %3 = tpu.matmul %1, %2, %cst {dimension_numbers = #tpu.dot_dimension_numbers<[1], [0], [0], [1], [0, 0, 1, 1], [], []>} : vector<128x16xbf16>, vector<16x128xbf16>, vector<128x128xf32> -> vector<128x128xf32>
    %c0_5 = arith.constant 0 : index
    %c0_6 = arith.constant 0 : index
    %4 = vector.load %arg4[%c0_5, %c0_6] : memref<1x128xf32, #tpu.memory_space<vmem>>, vector<1x128xf32>
    %5 = vector.broadcast %4 : vector<1x128xf32> to vector<128x128xf32>
    %6 = arith.addf %3, %5 : vector<128x128xf32>
    %7 = vector.extract_strided_slice %6 {offsets = [0, 0], sizes = [128, 64], strides = [1, 1]} : vector<128x128xf32> to vector<128x64xf32>
    %cst_7 = arith.constant 0.000000e+00 : f32
    %8 = vector.broadcast %cst_7 : f32 to vector<128x64xf32>
    %9 = arith.maximumf %7, %8 : vector<128x64xf32>
    %10 = vector.extract_strided_slice %6 {offsets = [0, 64], sizes = [128, 64], strides = [1, 1]} : vector<128x128xf32> to vector<128x64xf32>
    %c0_8 = arith.constant 0 : index
    %c0_9 = arith.constant 0 : index
    %11 = vector.load %arg6[%c0_8, %c0_9] : memref<1x64xf32, #tpu.memory_space<vmem>>, vector<1x64xf32>
    %cst_10 = arith.constant 0.000000e+00 : f32
    %12 = vector.broadcast %cst_10 : f32 to vector<1x64xf32>
    %13 = vector.extract_strided_slice %9 {offsets = [0, 0], sizes = [127, 64], strides = [1, 1]} : vector<128x64xf32> to vector<127x64xf32>
    %14 = tpu.concatenate %12, %13 in 0 : vector<1x64xf32>, vector<127x64xf32> -> vector<128x64xf32>
    %c-1_i32 = arith.constant -1 : i32
    %15 = vector.broadcast %c-1_i32 : i32 to vector<128x1xi32>
    %16 = arith.addi %0, %15 : vector<128x1xi32>
    %c0_i32 = arith.constant 0 : i32
    %17 = vector.broadcast %c0_i32 : i32 to vector<128x1xi32>
    %18 = arith.cmpi sge, %16, %17 : vector<128x1xi32>
    %c-1_i32_11 = arith.constant -1 : i32
    %19 = vector.broadcast %c-1_i32_11 : i32 to vector<128x1xi32>
    %20 = arith.addi %0, %19 : vector<128x1xi32>
    %c8_i32 = arith.constant 8 : i32
    %21 = vector.broadcast %c8_i32 : i32 to vector<128x1xi32>
    %22 = arith.cmpi slt, %20, %21 : vector<128x1xi32>
    %23 = arith.andi %18, %22 : vector<128x1xi1>
    %cst_12 = arith.constant 0.000000e+00 : f32
    %24 = vector.broadcast %cst_12 : f32 to vector<128x64xf32>
    %25 = vector.shape_cast %23 : vector<128x1xi1> to vector<128x1xi1>
    %26 = vector.broadcast %25 : vector<128x1xi1> to vector<128x64xi1>
    %27 = arith.select %26, %14, %24 : vector<128x64xi1>, vector<128x64xf32>
    %28 = arith.truncf %27 : vector<128x64xf32> to vector<128x64xbf16>
    %c0_13 = arith.constant 0 : index
    %c0_14 = arith.constant 0 : index
    %c0_15 = arith.constant 0 : index
    %29 = vector.load %arg5[%c0_13, %c0_14, %c0_15] : memref<3x64x64xbf16, #tpu.memory_space<vmem>>, vector<1x64x64xbf16>
    %30 = vector.shape_cast %29 : vector<1x64x64xbf16> to vector<64x64xbf16>
    %cst_16 = arith.constant dense<0.000000e+00> : vector<128x64xf32>
    %31 = tpu.matmul %28, %30, %cst_16 {dimension_numbers = #tpu.dot_dimension_numbers<[1], [0], [0], [1], [0, 0, 1, 1], [], []>} : vector<128x64xbf16>, vector<64x64xbf16>, vector<128x64xf32> -> vector<128x64xf32>
    %32 = vector.broadcast %11 : vector<1x64xf32> to vector<128x64xf32>
    %33 = arith.addf %32, %31 : vector<128x64xf32>
    %34 = arith.truncf %9 : vector<128x64xf32> to vector<128x64xbf16>
    %c1 = arith.constant 1 : index
    %c0_17 = arith.constant 0 : index
    %c0_18 = arith.constant 0 : index
    %35 = vector.load %arg5[%c1, %c0_17, %c0_18] : memref<3x64x64xbf16, #tpu.memory_space<vmem>>, vector<1x64x64xbf16>
    %36 = vector.shape_cast %35 : vector<1x64x64xbf16> to vector<64x64xbf16>
    %cst_19 = arith.constant dense<0.000000e+00> : vector<128x64xf32>
    %37 = tpu.matmul %34, %36, %cst_19 {dimension_numbers = #tpu.dot_dimension_numbers<[1], [0], [0], [1], [0, 0, 1, 1], [], []>} : vector<128x64xbf16>, vector<64x64xbf16>, vector<128x64xf32> -> vector<128x64xf32>
    %38 = arith.addf %33, %37 : vector<128x64xf32>
    %cst_20 = arith.constant 0.000000e+00 : f32
    %39 = vector.broadcast %cst_20 : f32 to vector<1x64xf32>
    %40 = vector.extract_strided_slice %9 {offsets = [1, 0], sizes = [127, 64], strides = [1, 1]} : vector<128x64xf32> to vector<127x64xf32>
    %41 = tpu.concatenate %40, %39 in 0 : vector<127x64xf32>, vector<1x64xf32> -> vector<128x64xf32>
    %c1_i32 = arith.constant 1 : i32
    %42 = vector.broadcast %c1_i32 : i32 to vector<128x1xi32>
    %43 = arith.addi %0, %42 : vector<128x1xi32>
    %c0_i32_21 = arith.constant 0 : i32
    %44 = vector.broadcast %c0_i32_21 : i32 to vector<128x1xi32>
    %45 = arith.cmpi sge, %43, %44 : vector<128x1xi32>
    %c1_i32_22 = arith.constant 1 : i32
    %46 = vector.broadcast %c1_i32_22 : i32 to vector<128x1xi32>
    %47 = arith.addi %0, %46 : vector<128x1xi32>
    %c8_i32_23 = arith.constant 8 : i32
    %48 = vector.broadcast %c8_i32_23 : i32 to vector<128x1xi32>
    %49 = arith.cmpi slt, %47, %48 : vector<128x1xi32>
    %50 = arith.andi %45, %49 : vector<128x1xi1>
    %cst_24 = arith.constant 0.000000e+00 : f32
    %51 = vector.broadcast %cst_24 : f32 to vector<128x64xf32>
    %52 = vector.shape_cast %50 : vector<128x1xi1> to vector<128x1xi1>
    %53 = vector.broadcast %52 : vector<128x1xi1> to vector<128x64xi1>
    %54 = arith.select %53, %41, %51 : vector<128x64xi1>, vector<128x64xf32>
    %55 = arith.truncf %54 : vector<128x64xf32> to vector<128x64xbf16>
    %c2 = arith.constant 2 : index
    %c0_25 = arith.constant 0 : index
    %c0_26 = arith.constant 0 : index
    %56 = vector.load %arg5[%c2, %c0_25, %c0_26] : memref<3x64x64xbf16, #tpu.memory_space<vmem>>, vector<1x64x64xbf16>
    %57 = vector.shape_cast %56 : vector<1x64x64xbf16> to vector<64x64xbf16>
    %cst_27 = arith.constant dense<0.000000e+00> : vector<128x64xf32>
    %58 = tpu.matmul %55, %57, %cst_27 {dimension_numbers = #tpu.dot_dimension_numbers<[1], [0], [0], [1], [0, 0, 1, 1], [], []>} : vector<128x64xbf16>, vector<64x64xbf16>, vector<128x64xf32> -> vector<128x64xf32>
    %59 = arith.addf %38, %58 : vector<128x64xf32>
    %cst_28 = arith.constant 0.000000e+00 : f32
    %60 = vector.broadcast %cst_28 : f32 to vector<128x64xf32>
    %61 = arith.maximumf %59, %60 : vector<128x64xf32>
    %62 = arith.addf %61, %10 : vector<128x64xf32>
    %63 = arith.truncf %62 : vector<128x64xf32> to vector<128x64xbf16>
    %c0_29 = arith.constant 0 : index
    %c0_30 = arith.constant 0 : index
    %64 = vector.load %arg7[%c0_29, %c0_30] : memref<64x256xbf16, #tpu.memory_space<vmem>>, vector<64x256xbf16>
    %cst_31 = arith.constant dense<0.000000e+00> : vector<128x256xf32>
    %65 = tpu.matmul %63, %64, %cst_31 {dimension_numbers = #tpu.dot_dimension_numbers<[1], [0], [0], [1], [0, 0, 1, 1], [], []>} : vector<128x64xbf16>, vector<64x256xbf16>, vector<128x256xf32> -> vector<128x256xf32>
    %c0_32 = arith.constant 0 : index
    %c0_33 = arith.constant 0 : index
    %66 = vector.load %arg8[%c0_32, %c0_33] : memref<1x256xf32, #tpu.memory_space<vmem>>, vector<1x256xf32>
    %67 = vector.broadcast %66 : vector<1x256xf32> to vector<128x256xf32>
    %68 = arith.addf %65, %67 : vector<128x256xf32>
    %69 = vector.extract_strided_slice %68 {offsets = [0, 0], sizes = [128, 128], strides = [1, 1]} : vector<128x256xf32> to vector<128x128xf32>
    %cst_34 = arith.constant 0.000000e+00 : f32
    %70 = vector.broadcast %cst_34 : f32 to vector<128x128xf32>
    %71 = arith.maximumf %69, %70 : vector<128x128xf32>
    %72 = vector.extract_strided_slice %68 {offsets = [0, 128], sizes = [128, 128], strides = [1, 1]} : vector<128x256xf32> to vector<128x128xf32>
    %c0_35 = arith.constant 0 : index
    %c0_36 = arith.constant 0 : index
    %73 = vector.load %arg10[%c0_35, %c0_36] : memref<1x128xf32, #tpu.memory_space<vmem>>, vector<1x128xf32>
    %cst_37 = arith.constant 0.000000e+00 : f32
    %74 = vector.broadcast %cst_37 : f32 to vector<1x128xf32>
    %75 = vector.extract_strided_slice %71 {offsets = [0, 0], sizes = [127, 128], strides = [1, 1]} : vector<128x128xf32> to vector<127x128xf32>
    %76 = tpu.concatenate %74, %75 in 0 : vector<1x128xf32>, vector<127x128xf32> -> vector<128x128xf32>
    %c-1_i32_38 = arith.constant -1 : i32
    %77 = vector.broadcast %c-1_i32_38 : i32 to vector<128x1xi32>
    %78 = arith.addi %0, %77 : vector<128x1xi32>
    %c0_i32_39 = arith.constant 0 : i32
    %79 = vector.broadcast %c0_i32_39 : i32 to vector<128x1xi32>
    %80 = arith.cmpi sge, %78, %79 : vector<128x1xi32>
    %c-1_i32_40 = arith.constant -1 : i32
    %81 = vector.broadcast %c-1_i32_40 : i32 to vector<128x1xi32>
    %82 = arith.addi %0, %81 : vector<128x1xi32>
    %c8_i32_41 = arith.constant 8 : i32
    %83 = vector.broadcast %c8_i32_41 : i32 to vector<128x1xi32>
    %84 = arith.cmpi slt, %82, %83 : vector<128x1xi32>
    %85 = arith.andi %80, %84 : vector<128x1xi1>
    %cst_42 = arith.constant 0.000000e+00 : f32
    %86 = vector.broadcast %cst_42 : f32 to vector<128x128xf32>
    %87 = vector.shape_cast %85 : vector<128x1xi1> to vector<128x1xi1>
    %88 = vector.broadcast %87 : vector<128x1xi1> to vector<128x128xi1>
    %89 = arith.select %88, %76, %86 : vector<128x128xi1>, vector<128x128xf32>
    %90 = arith.truncf %89 : vector<128x128xf32> to vector<128x128xbf16>
    %c0_43 = arith.constant 0 : index
    %c0_44 = arith.constant 0 : index
    %c0_45 = arith.constant 0 : index
    %91 = vector.load %arg9[%c0_43, %c0_44, %c0_45] : memref<3x128x128xbf16, #tpu.memory_space<vmem>>, vector<1x128x128xbf16>
    %92 = vector.shape_cast %91 : vector<1x128x128xbf16> to vector<128x128xbf16>
    %cst_46 = arith.constant dense<0.000000e+00> : vector<128x128xf32>
    %93 = tpu.matmul %90, %92, %cst_46 {dimension_numbers = #tpu.dot_dimension_numbers<[1], [0], [0], [1], [0, 0, 1, 1], [], []>} : vector<128x128xbf16>, vector<128x128xbf16>, vector<128x128xf32> -> vector<128x128xf32>
    %94 = vector.broadcast %73 : vector<1x128xf32> to vector<128x128xf32>
    %95 = arith.addf %94, %93 : vector<128x128xf32>
    %96 = arith.truncf %71 : vector<128x128xf32> to vector<128x128xbf16>
    %c1_47 = arith.constant 1 : index
    %c0_48 = arith.constant 0 : index
    %c0_49 = arith.constant 0 : index
    %97 = vector.load %arg9[%c1_47, %c0_48, %c0_49] : memref<3x128x128xbf16, #tpu.memory_space<vmem>>, vector<1x128x128xbf16>
    %98 = vector.shape_cast %97 : vector<1x128x128xbf16> to vector<128x128xbf16>
    %cst_50 = arith.constant dense<0.000000e+00> : vector<128x128xf32>
    %99 = tpu.matmul %96, %98, %cst_50 {dimension_numbers = #tpu.dot_dimension_numbers<[1], [0], [0], [1], [0, 0, 1, 1], [], []>} : vector<128x128xbf16>, vector<128x128xbf16>, vector<128x128xf32> -> vector<128x128xf32>
    %100 = arith.addf %95, %99 : vector<128x128xf32>
    %cst_51 = arith.constant 0.000000e+00 : f32
    %101 = vector.broadcast %cst_51 : f32 to vector<1x128xf32>
    %102 = vector.extract_strided_slice %71 {offsets = [1, 0], sizes = [127, 128], strides = [1, 1]} : vector<128x128xf32> to vector<127x128xf32>
    %103 = tpu.concatenate %102, %101 in 0 : vector<127x128xf32>, vector<1x128xf32> -> vector<128x128xf32>
    %c1_i32_52 = arith.constant 1 : i32
    %104 = vector.broadcast %c1_i32_52 : i32 to vector<128x1xi32>
    %105 = arith.addi %0, %104 : vector<128x1xi32>
    %c0_i32_53 = arith.constant 0 : i32
    %106 = vector.broadcast %c0_i32_53 : i32 to vector<128x1xi32>
    %107 = arith.cmpi sge, %105, %106 : vector<128x1xi32>
    %c1_i32_54 = arith.constant 1 : i32
    %108 = vector.broadcast %c1_i32_54 : i32 to vector<128x1xi32>
    %109 = arith.addi %0, %108 : vector<128x1xi32>
    %c8_i32_55 = arith.constant 8 : i32
    %110 = vector.broadcast %c8_i32_55 : i32 to vector<128x1xi32>
    %111 = arith.cmpi slt, %109, %110 : vector<128x1xi32>
    %112 = arith.andi %107, %111 : vector<128x1xi1>
    %cst_56 = arith.constant 0.000000e+00 : f32
    %113 = vector.broadcast %cst_56 : f32 to vector<128x128xf32>
    %114 = vector.shape_cast %112 : vector<128x1xi1> to vector<128x1xi1>
    %115 = vector.broadcast %114 : vector<128x1xi1> to vector<128x128xi1>
    %116 = arith.select %115, %103, %113 : vector<128x128xi1>, vector<128x128xf32>
    %117 = arith.truncf %116 : vector<128x128xf32> to vector<128x128xbf16>
    %c2_57 = arith.constant 2 : index
    %c0_58 = arith.constant 0 : index
    %c0_59 = arith.constant 0 : index
    %118 = vector.load %arg9[%c2_57, %c0_58, %c0_59] : memref<3x128x128xbf16, #tpu.memory_space<vmem>>, vector<1x128x128xbf16>
    %119 = vector.shape_cast %118 : vector<1x128x128xbf16> to vector<128x128xbf16>
    %cst_60 = arith.constant dense<0.000000e+00> : vector<128x128xf32>
    %120 = tpu.matmul %117, %119, %cst_60 {dimension_numbers = #tpu.dot_dimension_numbers<[1], [0], [0], [1], [0, 0, 1, 1], [], []>} : vector<128x128xbf16>, vector<128x128xbf16>, vector<128x128xf32> -> vector<128x128xf32>
    %121 = arith.addf %100, %120 : vector<128x128xf32>
    %cst_61 = arith.constant 0.000000e+00 : f32
    %122 = vector.broadcast %cst_61 : f32 to vector<128x128xf32>
    %123 = arith.maximumf %121, %122 : vector<128x128xf32>
    %124 = arith.addf %123, %72 : vector<128x128xf32>
    %125 = arith.truncf %124 : vector<128x128xf32> to vector<128x128xbf16>
    %c0_62 = arith.constant 0 : index
    %c0_63 = arith.constant 0 : index
    %126 = vector.load %arg11[%c0_62, %c0_63] : memref<128x16xbf16, #tpu.memory_space<vmem>>, vector<128x16xbf16>
    %cst_64 = arith.constant dense<0.000000e+00> : vector<128x16xf32>
    %127 = tpu.matmul %125, %126, %cst_64 {dimension_numbers = #tpu.dot_dimension_numbers<[1], [0], [0], [1], [0, 0, 1, 1], [], []>} : vector<128x128xbf16>, vector<128x16xbf16>, vector<128x16xf32> -> vector<128x16xf32>
    %c0_65 = arith.constant 0 : index
    %c0_66 = arith.constant 0 : index
    %128 = vector.load %arg12[%c0_65, %c0_66] : memref<1x16xf32, #tpu.memory_space<vmem>>, vector<1x16xf32>
    %129 = vector.broadcast %128 : vector<1x16xf32> to vector<128x16xf32>
    %130 = arith.addf %127, %129 : vector<128x16xf32>
    %cst_67 = arith.constant 0.000000e+00 : f32
    %131 = vector.broadcast %cst_67 : f32 to vector<128x16xf32>
    %132 = arith.maximumf %130, %131 : vector<128x16xf32>
    %c0_68 = arith.constant 0 : index
    %c0_69 = arith.constant 0 : index
    %133 = vector.load %arg14[%c0_68, %c0_69] : memref<1x32xf32, #tpu.memory_space<vmem>>, vector<1x32xf32>
    %cst_70 = arith.constant 0.000000e+00 : f32
    %134 = vector.broadcast %cst_70 : f32 to vector<1x16xf32>
    %135 = vector.extract_strided_slice %132 {offsets = [0, 0], sizes = [127, 16], strides = [1, 1]} : vector<128x16xf32> to vector<127x16xf32>
    %136 = tpu.concatenate %134, %135 in 0 : vector<1x16xf32>, vector<127x16xf32> -> vector<128x16xf32>
    %c-1_i32_71 = arith.constant -1 : i32
    %137 = vector.broadcast %c-1_i32_71 : i32 to vector<128x1xi32>
    %138 = arith.addi %0, %137 : vector<128x1xi32>
    %c0_i32_72 = arith.constant 0 : i32
    %139 = vector.broadcast %c0_i32_72 : i32 to vector<128x1xi32>
    %140 = arith.cmpi sge, %138, %139 : vector<128x1xi32>
    %c-1_i32_73 = arith.constant -1 : i32
    %141 = vector.broadcast %c-1_i32_73 : i32 to vector<128x1xi32>
    %142 = arith.addi %0, %141 : vector<128x1xi32>
    %c8_i32_74 = arith.constant 8 : i32
    %143 = vector.broadcast %c8_i32_74 : i32 to vector<128x1xi32>
    %144 = arith.cmpi slt, %142, %143 : vector<128x1xi32>
    %145 = arith.andi %140, %144 : vector<128x1xi1>
    %cst_75 = arith.constant 0.000000e+00 : f32
    %146 = vector.broadcast %cst_75 : f32 to vector<128x16xf32>
    %147 = vector.shape_cast %145 : vector<128x1xi1> to vector<128x1xi1>
    %148 = vector.broadcast %147 : vector<128x1xi1> to vector<128x16xi1>
    %149 = arith.select %148, %136, %146 : vector<128x16xi1>, vector<128x16xf32>
    %150 = arith.truncf %149 : vector<128x16xf32> to vector<128x16xbf16>
    %c0_76 = arith.constant 0 : index
    %c0_77 = arith.constant 0 : index
    %c0_78 = arith.constant 0 : index
    %151 = vector.load %arg13[%c0_76, %c0_77, %c0_78] : memref<4x16x32xbf16, #tpu.memory_space<vmem>>, vector<1x16x32xbf16>
    %152 = vector.shape_cast %151 : vector<1x16x32xbf16> to vector<16x32xbf16>
    %cst_79 = arith.constant dense<0.000000e+00> : vector<128x32xf32>
    %153 = tpu.matmul %150, %152, %cst_79 {dimension_numbers = #tpu.dot_dimension_numbers<[1], [0], [0], [1], [0, 0, 1, 1], [], []>} : vector<128x16xbf16>, vector<16x32xbf16>, vector<128x32xf32> -> vector<128x32xf32>
    %154 = vector.broadcast %133 : vector<1x32xf32> to vector<128x32xf32>
    %155 = arith.addf %154, %153 : vector<128x32xf32>
    %156 = arith.truncf %132 : vector<128x16xf32> to vector<128x16xbf16>
    %c1_80 = arith.constant 1 : index
    %c0_81 = arith.constant 0 : index
    %c0_82 = arith.constant 0 : index
    %157 = vector.load %arg13[%c1_80, %c0_81, %c0_82] : memref<4x16x32xbf16, #tpu.memory_space<vmem>>, vector<1x16x32xbf16>
    %158 = vector.shape_cast %157 : vector<1x16x32xbf16> to vector<16x32xbf16>
    %cst_83 = arith.constant dense<0.000000e+00> : vector<128x32xf32>
    %159 = tpu.matmul %156, %158, %cst_83 {dimension_numbers = #tpu.dot_dimension_numbers<[1], [0], [0], [1], [0, 0, 1, 1], [], []>} : vector<128x16xbf16>, vector<16x32xbf16>, vector<128x32xf32> -> vector<128x32xf32>
    %160 = arith.addf %155, %159 : vector<128x32xf32>
    %cst_84 = arith.constant 0.000000e+00 : f32
    %161 = vector.broadcast %cst_84 : f32 to vector<1x16xf32>
    %162 = vector.extract_strided_slice %132 {offsets = [1, 0], sizes = [127, 16], strides = [1, 1]} : vector<128x16xf32> to vector<127x16xf32>
    %163 = tpu.concatenate %162, %161 in 0 : vector<127x16xf32>, vector<1x16xf32> -> vector<128x16xf32>
    %c1_i32_85 = arith.constant 1 : i32
    %164 = vector.broadcast %c1_i32_85 : i32 to vector<128x1xi32>
    %165 = arith.addi %0, %164 : vector<128x1xi32>
    %c0_i32_86 = arith.constant 0 : i32
    %166 = vector.broadcast %c0_i32_86 : i32 to vector<128x1xi32>
    %167 = arith.cmpi sge, %165, %166 : vector<128x1xi32>
    %c1_i32_87 = arith.constant 1 : i32
    %168 = vector.broadcast %c1_i32_87 : i32 to vector<128x1xi32>
    %169 = arith.addi %0, %168 : vector<128x1xi32>
    %c8_i32_88 = arith.constant 8 : i32
    %170 = vector.broadcast %c8_i32_88 : i32 to vector<128x1xi32>
    %171 = arith.cmpi slt, %169, %170 : vector<128x1xi32>
    %172 = arith.andi %167, %171 : vector<128x1xi1>
    %cst_89 = arith.constant 0.000000e+00 : f32
    %173 = vector.broadcast %cst_89 : f32 to vector<128x16xf32>
    %174 = vector.shape_cast %172 : vector<128x1xi1> to vector<128x1xi1>
    %175 = vector.broadcast %174 : vector<128x1xi1> to vector<128x16xi1>
    %176 = arith.select %175, %163, %173 : vector<128x16xi1>, vector<128x16xf32>
    %177 = arith.truncf %176 : vector<128x16xf32> to vector<128x16xbf16>
    %c2_90 = arith.constant 2 : index
    %c0_91 = arith.constant 0 : index
    %c0_92 = arith.constant 0 : index
    %178 = vector.load %arg13[%c2_90, %c0_91, %c0_92] : memref<4x16x32xbf16, #tpu.memory_space<vmem>>, vector<1x16x32xbf16>
    %179 = vector.shape_cast %178 : vector<1x16x32xbf16> to vector<16x32xbf16>
    %cst_93 = arith.constant dense<0.000000e+00> : vector<128x32xf32>
    %180 = tpu.matmul %177, %179, %cst_93 {dimension_numbers = #tpu.dot_dimension_numbers<[1], [0], [0], [1], [0, 0, 1, 1], [], []>} : vector<128x16xbf16>, vector<16x32xbf16>, vector<128x32xf32> -> vector<128x32xf32>
    %181 = arith.addf %160, %180 : vector<128x32xf32>
    %cst_94 = arith.constant 0.000000e+00 : f32
    %182 = vector.broadcast %cst_94 : f32 to vector<2x16xf32>
    %183 = vector.extract_strided_slice %132 {offsets = [2, 0], sizes = [126, 16], strides = [1, 1]} : vector<128x16xf32> to vector<126x16xf32>
    %184 = tpu.concatenate %183, %182 in 0 : vector<126x16xf32>, vector<2x16xf32> -> vector<128x16xf32>
    %c2_i32 = arith.constant 2 : i32
    %185 = vector.broadcast %c2_i32 : i32 to vector<128x1xi32>
    %186 = arith.addi %0, %185 : vector<128x1xi32>
    %c0_i32_95 = arith.constant 0 : i32
    %187 = vector.broadcast %c0_i32_95 : i32 to vector<128x1xi32>
    %188 = arith.cmpi sge, %186, %187 : vector<128x1xi32>
    %c2_i32_96 = arith.constant 2 : i32
    %189 = vector.broadcast %c2_i32_96 : i32 to vector<128x1xi32>
    %190 = arith.addi %0, %189 : vector<128x1xi32>
    %c8_i32_97 = arith.constant 8 : i32
    %191 = vector.broadcast %c8_i32_97 : i32 to vector<128x1xi32>
    %192 = arith.cmpi slt, %190, %191 : vector<128x1xi32>
    %193 = arith.andi %188, %192 : vector<128x1xi1>
    %cst_98 = arith.constant 0.000000e+00 : f32
    %194 = vector.broadcast %cst_98 : f32 to vector<128x16xf32>
    %195 = vector.shape_cast %193 : vector<128x1xi1> to vector<128x1xi1>
    %196 = vector.broadcast %195 : vector<128x1xi1> to vector<128x16xi1>
    %197 = arith.select %196, %184, %194 : vector<128x16xi1>, vector<128x16xf32>
    %198 = arith.truncf %197 : vector<128x16xf32> to vector<128x16xbf16>
    %c3 = arith.constant 3 : index
    %c0_99 = arith.constant 0 : index
    %c0_100 = arith.constant 0 : index
    %199 = vector.load %arg13[%c3, %c0_99, %c0_100] : memref<4x16x32xbf16, #tpu.memory_space<vmem>>, vector<1x16x32xbf16>
    %200 = vector.shape_cast %199 : vector<1x16x32xbf16> to vector<16x32xbf16>
    %cst_101 = arith.constant dense<0.000000e+00> : vector<128x32xf32>
    %201 = tpu.matmul %198, %200, %cst_101 {dimension_numbers = #tpu.dot_dimension_numbers<[1], [0], [0], [1], [0, 0, 1, 1], [], []>} : vector<128x16xbf16>, vector<16x32xbf16>, vector<128x32xf32> -> vector<128x32xf32>
    %202 = arith.addf %181, %201 : vector<128x32xf32>
    %cst_102 = arith.constant 0.000000e+00 : f32
    %203 = vector.broadcast %cst_102 : f32 to vector<128x32xf32>
    %204 = arith.maximumf %202, %203 : vector<128x32xf32>
    %c0_103 = arith.constant 0 : index
    %c0_104 = arith.constant 0 : index
    %205 = vector.load %arg16[%c0_103, %c0_104] : memref<1x128xf32, #tpu.memory_space<vmem>>, vector<1x128xf32>
    %206 = arith.truncf %204 : vector<128x32xf32> to vector<128x32xbf16>
    %c0_105 = arith.constant 0 : index
    %c0_106 = arith.constant 0 : index
    %c0_107 = arith.constant 0 : index
    %207 = vector.load %arg15[%c0_105, %c0_106, %c0_107] : memref<4x32x128xbf16, #tpu.memory_space<vmem>>, vector<1x32x128xbf16>
    %208 = vector.shape_cast %207 : vector<1x32x128xbf16> to vector<32x128xbf16>
    %cst_108 = arith.constant dense<0.000000e+00> : vector<128x128xf32>
    %209 = tpu.matmul %206, %208, %cst_108 {dimension_numbers = #tpu.dot_dimension_numbers<[1], [0], [0], [1], [0, 0, 1, 1], [], []>} : vector<128x32xbf16>, vector<32x128xbf16>, vector<128x128xf32> -> vector<128x128xf32>
    %210 = vector.broadcast %205 : vector<1x128xf32> to vector<128x128xf32>
    %211 = arith.addf %210, %209 : vector<128x128xf32>
    %cst_109 = arith.constant 0.000000e+00 : f32
    %212 = vector.broadcast %cst_109 : f32 to vector<2x32xf32>
    %213 = vector.extract_strided_slice %204 {offsets = [2, 0], sizes = [126, 32], strides = [1, 1]} : vector<128x32xf32> to vector<126x32xf32>
    %214 = tpu.concatenate %213, %212 in 0 : vector<126x32xf32>, vector<2x32xf32> -> vector<128x32xf32>
    %c2_i32_110 = arith.constant 2 : i32
    %215 = vector.broadcast %c2_i32_110 : i32 to vector<128x1xi32>
    %216 = arith.addi %0, %215 : vector<128x1xi32>
    %c0_i32_111 = arith.constant 0 : i32
    %217 = vector.broadcast %c0_i32_111 : i32 to vector<128x1xi32>
    %218 = arith.cmpi sge, %216, %217 : vector<128x1xi32>
    %c2_i32_112 = arith.constant 2 : i32
    %219 = vector.broadcast %c2_i32_112 : i32 to vector<128x1xi32>
    %220 = arith.addi %0, %219 : vector<128x1xi32>
    %c8_i32_113 = arith.constant 8 : i32
    %221 = vector.broadcast %c8_i32_113 : i32 to vector<128x1xi32>
    %222 = arith.cmpi slt, %220, %221 : vector<128x1xi32>
    %223 = arith.andi %218, %222 : vector<128x1xi1>
    %cst_114 = arith.constant 0.000000e+00 : f32
    %224 = vector.broadcast %cst_114 : f32 to vector<128x32xf32>
    %225 = vector.shape_cast %223 : vector<128x1xi1> to vector<128x1xi1>
    %226 = vector.broadcast %225 : vector<128x1xi1> to vector<128x32xi1>
    %227 = arith.select %226, %214, %224 : vector<128x32xi1>, vector<128x32xf32>
    %228 = arith.truncf %227 : vector<128x32xf32> to vector<128x32xbf16>
    %c1_115 = arith.constant 1 : index
    %c0_116 = arith.constant 0 : index
    %c0_117 = arith.constant 0 : index
    %229 = vector.load %arg15[%c1_115, %c0_116, %c0_117] : memref<4x32x128xbf16, #tpu.memory_space<vmem>>, vector<1x32x128xbf16>
    %230 = vector.shape_cast %229 : vector<1x32x128xbf16> to vector<32x128xbf16>
    %cst_118 = arith.constant dense<0.000000e+00> : vector<128x128xf32>
    %231 = tpu.matmul %228, %230, %cst_118 {dimension_numbers = #tpu.dot_dimension_numbers<[1], [0], [0], [1], [0, 0, 1, 1], [], []>} : vector<128x32xbf16>, vector<32x128xbf16>, vector<128x128xf32> -> vector<128x128xf32>
    %232 = arith.addf %211, %231 : vector<128x128xf32>
    %cst_119 = arith.constant 0.000000e+00 : f32
    %233 = vector.broadcast %cst_119 : f32 to vector<4x32xf32>
    %234 = vector.extract_strided_slice %204 {offsets = [4, 0], sizes = [124, 32], strides = [1, 1]} : vector<128x32xf32> to vector<124x32xf32>
    %235 = tpu.concatenate %234, %233 in 0 : vector<124x32xf32>, vector<4x32xf32> -> vector<128x32xf32>
    %c4_i32 = arith.constant 4 : i32
    %236 = vector.broadcast %c4_i32 : i32 to vector<128x1xi32>
    %237 = arith.addi %0, %236 : vector<128x1xi32>
    %c0_i32_120 = arith.constant 0 : i32
    %238 = vector.broadcast %c0_i32_120 : i32 to vector<128x1xi32>
    %239 = arith.cmpi sge, %237, %238 : vector<128x1xi32>
    %c4_i32_121 = arith.constant 4 : i32
    %240 = vector.broadcast %c4_i32_121 : i32 to vector<128x1xi32>
    %241 = arith.addi %0, %240 : vector<128x1xi32>
    %c8_i32_122 = arith.constant 8 : i32
    %242 = vector.broadcast %c8_i32_122 : i32 to vector<128x1xi32>
    %243 = arith.cmpi slt, %241, %242 : vector<128x1xi32>
    %244 = arith.andi %239, %243 : vector<128x1xi1>
    %cst_123 = arith.constant 0.000000e+00 : f32
    %245 = vector.broadcast %cst_123 : f32 to vector<128x32xf32>
    %246 = vector.shape_cast %244 : vector<128x1xi1> to vector<128x1xi1>
    %247 = vector.broadcast %246 : vector<128x1xi1> to vector<128x32xi1>
    %248 = arith.select %247, %235, %245 : vector<128x32xi1>, vector<128x32xf32>
    %249 = arith.truncf %248 : vector<128x32xf32> to vector<128x32xbf16>
    %c2_124 = arith.constant 2 : index
    %c0_125 = arith.constant 0 : index
    %c0_126 = arith.constant 0 : index
    %250 = vector.load %arg15[%c2_124, %c0_125, %c0_126] : memref<4x32x128xbf16, #tpu.memory_space<vmem>>, vector<1x32x128xbf16>
    %251 = vector.shape_cast %250 : vector<1x32x128xbf16> to vector<32x128xbf16>
    %cst_127 = arith.constant dense<0.000000e+00> : vector<128x128xf32>
    %252 = tpu.matmul %249, %251, %cst_127 {dimension_numbers = #tpu.dot_dimension_numbers<[1], [0], [0], [1], [0, 0, 1, 1], [], []>} : vector<128x32xbf16>, vector<32x128xbf16>, vector<128x128xf32> -> vector<128x128xf32>
    %253 = arith.addf %232, %252 : vector<128x128xf32>
    %cst_128 = arith.constant 0.000000e+00 : f32
    %254 = vector.broadcast %cst_128 : f32 to vector<6x32xf32>
    %255 = vector.extract_strided_slice %204 {offsets = [6, 0], sizes = [122, 32], strides = [1, 1]} : vector<128x32xf32> to vector<122x32xf32>
    %256 = tpu.concatenate %255, %254 in 0 : vector<122x32xf32>, vector<6x32xf32> -> vector<128x32xf32>
    %c6_i32 = arith.constant 6 : i32
    %257 = vector.broadcast %c6_i32 : i32 to vector<128x1xi32>
    %258 = arith.addi %0, %257 : vector<128x1xi32>
    %c0_i32_129 = arith.constant 0 : i32
    %259 = vector.broadcast %c0_i32_129 : i32 to vector<128x1xi32>
    %260 = arith.cmpi sge, %258, %259 : vector<128x1xi32>
    %c6_i32_130 = arith.constant 6 : i32
    %261 = vector.broadcast %c6_i32_130 : i32 to vector<128x1xi32>
    %262 = arith.addi %0, %261 : vector<128x1xi32>
    %c8_i32_131 = arith.constant 8 : i32
    %263 = vector.broadcast %c8_i32_131 : i32 to vector<128x1xi32>
    %264 = arith.cmpi slt, %262, %263 : vector<128x1xi32>
    %265 = arith.andi %260, %264 : vector<128x1xi1>
    %cst_132 = arith.constant 0.000000e+00 : f32
    %266 = vector.broadcast %cst_132 : f32 to vector<128x32xf32>
    %267 = vector.shape_cast %265 : vector<128x1xi1> to vector<128x1xi1>
    %268 = vector.broadcast %267 : vector<128x1xi1> to vector<128x32xi1>
    %269 = arith.select %268, %256, %266 : vector<128x32xi1>, vector<128x32xf32>
    %270 = arith.truncf %269 : vector<128x32xf32> to vector<128x32xbf16>
    %c3_133 = arith.constant 3 : index
    %c0_134 = arith.constant 0 : index
    %c0_135 = arith.constant 0 : index
    %271 = vector.load %arg15[%c3_133, %c0_134, %c0_135] : memref<4x32x128xbf16, #tpu.memory_space<vmem>>, vector<1x32x128xbf16>
    %272 = vector.shape_cast %271 : vector<1x32x128xbf16> to vector<32x128xbf16>
    %cst_136 = arith.constant dense<0.000000e+00> : vector<128x128xf32>
    %273 = tpu.matmul %270, %272, %cst_136 {dimension_numbers = #tpu.dot_dimension_numbers<[1], [0], [0], [1], [0, 0, 1, 1], [], []>} : vector<128x32xbf16>, vector<32x128xbf16>, vector<128x128xf32> -> vector<128x128xf32>
    %274 = arith.addf %253, %273 : vector<128x128xf32>
    %cst_137 = arith.constant 0.000000e+00 : f32
    %275 = vector.broadcast %cst_137 : f32 to vector<128x128xf32>
    %276 = arith.maximumf %274, %275 : vector<128x128xf32>
    %c0_138 = arith.constant 0 : index
    %c0_139 = arith.constant 0 : index
    %277 = vector.load %arg17[%c0_138, %c0_139] : memref<128x128xf32, #tpu.memory_space<vmem>>, vector<128x128xf32>
    tpu.vector_store %arg17[%c0_138, %c0_139], %276 {strides = array<i32>} : memref<128x128xf32, #tpu.memory_space<vmem>>, vector<128x128xf32>,
    return
  }
  func.func @transform_0(%arg0: i32) -> (i32, i32) {
    %c0_i32 = arith.constant 0 : i32
    %c0_i32_0 = arith.constant 0 : i32
    return %arg0, %c0_i32 : i32, i32
  }
  func.func @transform_1(%arg0: i32) -> (i32, i32) {
    %c0_i32 = arith.constant 0 : i32
    %c0_i32_0 = arith.constant 0 : i32
    %c0_i32_1 = arith.constant 0 : i32
    return %c0_i32, %c0_i32_0 : i32, i32
  }
  func.func @transform_2(%arg0: i32) -> (i32, i32) {
    %c0_i32 = arith.constant 0 : i32
    %c0_i32_0 = arith.constant 0 : i32
    %c0_i32_1 = arith.constant 0 : i32
    return %c0_i32, %c0_i32_0 : i32, i32
  }
  func.func @transform_3(%arg0: i32) -> (i32, i32) {
    %c0_i32 = arith.constant 0 : i32
    %c0_i32_0 = arith.constant 0 : i32
    %c0_i32_1 = arith.constant 0 : i32
    return %c0_i32, %c0_i32_0 : i32, i32
  }
  func.func @transform_4(%arg0: i32) -> (i32, i32, i32) {
    %c0_i32 = arith.constant 0 : i32
    %c0_i32_0 = arith.constant 0 : i32
    %c0_i32_1 = arith.constant 0 : i32
    %c0_i32_2 = arith.constant 0 : i32
    return %c0_i32, %c0_i32_0, %c0_i32_1 : i32, i32, i32
  }
  func.func @transform_5(%arg0: i32) -> (i32, i32) {
    %c0_i32 = arith.constant 0 : i32
    %c0_i32_0 = arith.constant 0 : i32
    %c0_i32_1 = arith.constant 0 : i32
    return %c0_i32, %c0_i32_0 : i32, i32
  }
  func.func @transform_6(%arg0: i32) -> (i32, i32) {
    %c0_i32 = arith.constant 0 : i32
    %c0_i32_0 = arith.constant 0 : i32
    %c0_i32_1 = arith.constant 0 : i32
    return %c0_i32, %c0_i32_0 : i32, i32
  }
  func.func @transform_7(%arg0: i32) -> (i32, i32) {
    %c0_i32 = arith.constant 0 : i32
    %c0_i32_0 = arith.constant 0 : i32
    %c0_i32_1 = arith.constant 0 : i32
    return %c0_i32, %c0_i32_0 : i32, i32
  }
  func.func @transform_8(%arg0: i32) -> (i32, i32, i32) {
    %c0_i32 = arith.constant 0 : i32
    %c0_i32_0 = arith.constant 0 : i32
    %c0_i32_1 = arith.constant 0 : i32
    %c0_i32_2 = arith.constant 0 : i32
    return %c0_i32, %c0_i32_0, %c0_i32_1 : i32, i32, i32
  }
  func.func @transform_9(%arg0: i32) -> (i32, i32) {
    %c0_i32 = arith.constant 0 : i32
    %c0_i32_0 = arith.constant 0 : i32
    %c0_i32_1 = arith.constant 0 : i32
    return %c0_i32, %c0_i32_0 : i32, i32
  }
  func.func @transform_10(%arg0: i32) -> (i32, i32) {
    %c0_i32 = arith.constant 0 : i32
    %c0_i32_0 = arith.constant 0 : i32
    %c0_i32_1 = arith.constant 0 : i32
    return %c0_i32, %c0_i32_0 : i32, i32
  }
  func.func @transform_11(%arg0: i32) -> (i32, i32) {
    %c0_i32 = arith.constant 0 : i32
    %c0_i32_0 = arith.constant 0 : i32
    %c0_i32_1 = arith.constant 0 : i32
    return %c0_i32, %c0_i32_0 : i32, i32
  }
  func.func @transform_12(%arg0: i32) -> (i32, i32, i32) {
    %c0_i32 = arith.constant 0 : i32
    %c0_i32_0 = arith.constant 0 : i32
    %c0_i32_1 = arith.constant 0 : i32
    %c0_i32_2 = arith.constant 0 : i32
    return %c0_i32, %c0_i32_0, %c0_i32_1 : i32, i32, i32
  }
  func.func @transform_13(%arg0: i32) -> (i32, i32) {
    %c0_i32 = arith.constant 0 : i32
    %c0_i32_0 = arith.constant 0 : i32
    %c0_i32_1 = arith.constant 0 : i32
    return %c0_i32, %c0_i32_0 : i32, i32
  }
  func.func @transform_14(%arg0: i32) -> (i32, i32, i32) {
    %c0_i32 = arith.constant 0 : i32
    %c0_i32_0 = arith.constant 0 : i32
    %c0_i32_1 = arith.constant 0 : i32
    %c0_i32_2 = arith.constant 0 : i32
    return %c0_i32, %c0_i32_0, %c0_i32_1 : i32, i32, i32
  }
  func.func @transform_15(%arg0: i32) -> (i32, i32) {
    %c0_i32 = arith.constant 0 : i32
    %c0_i32_0 = arith.constant 0 : i32
    %c0_i32_1 = arith.constant 0 : i32
    return %c0_i32, %c0_i32_0 : i32, i32
  }
  func.func @transform_16(%arg0: i32) -> (i32, i32) {
    %c0_i32 = arith.constant 0 : i32
    %c0_i32_0 = arith.constant 0 : i32
    return %arg0, %c0_i32 : i32, i32
  }
}

</mosaic_0001>

<bundles_post_ra>
// kernel: tpu_custom_call.1
= control target key start
LH: loop header
LB: loop body
LE: loop exit
PB: predicated region body
PF: predicated region fallthrough
CT: control target
= control target key end

     0   :  { %s9382_s0 = inlined_call_operand.vmem [shape: bf16[256,16], index: 0, kind: input, shape index: {}]   ;;  %s9383_s1 = inlined_call_operand.vmem [shape: s32[128,1], index: 1, kind: input, shape index: {}]   ;;  %s9384_s2 = inlined_call_operand.hbm [shape: bf16[16,128], index: 2, kind: input, shape index: {}]   ;;  %s9385_s3 = inlined_call_operand.hbm [shape: f32[1,128], index: 3, kind: input, shape index: {}]   ;;  %s9386_s4 = inlined_call_operand.vmem [shape: bf16[3,64,64], index: 4, kind: input, shape index: {}]   ;;  %s9387_s5 = inlined_call_operand.hbm [shape: f32[1,64], index: 5, kind: input, shape index: {}]   ;;  %s9388_s6 = inlined_call_operand.vmem [shape: bf16[64,256], index: 6, kind: input, shape index: {}]   ;;  %s9389_s7 = inlined_call_operand.hbm [shape: f32[1,256], index: 7, kind: input, shape index: {}]   ;;  %s9390_s8 = inlined_call_operand.vmem [shape: bf16[3,128,128], index: 8, kind: input, shape index: {}]   ;;  %s9391_s9 = inlined_call_operand.hbm [shape: f32[1,128], index: 9, kind: input, shape index: {}]   ;;  %s9392_s10 = inlined_call_operand.vmem [shape: bf16[128,16], index: 10, kind: input, shape index: {}]   ;;  %s9393_s11 = inlined_call_operand.vmem [shape: f32[1,16], index: 11, kind: input, shape index: {}]   ;;  %s9394_s12 = inlined_call_operand.hbm [shape: bf16[4,16,32], index: 12, kind: input, shape index: {}]   ;;  %s9395_s13 = inlined_call_operand.vmem [shape: f32[1,32], index: 13, kind: input, shape index: {}]   ;;  %s9396_s14 = inlined_call_operand.hbm [shape: bf16[4,32,128], index: 14, kind: input, shape index: {}]   ;;  %s9397_s15 = inlined_call_operand.vmem [shape: f32[1,128], index: 15, kind: input, shape index: {}]   ;;  %s9398_s16 = inlined_call_operand.hbm [shape: f32[256,128], index: 16, kind: output, shape index: {}]  }
   0x1   :  { %9510 = sst [smem:[#allocation52_spill]] %s9382_s0 }
   0x2   :  { %9511 = sst [smem:[#allocation53_spill]] %s9385_s3 }
   0x3   :  { %9512 = sst [smem:[#allocation54_spill]] %s9389_s7 }
   0x4   :  { %21 = vsyncpa [#allocation3], 0 }
   0x5   :  { %22 = vsyncpa [#allocation6], 0 }
   0x6   :  { %23 = vsyncpa [#allocation9], 0 }
   0x7   :  { %24 = vsyncpa [#allocation12], 0 }
   0x8   :  { %25 = vsyncpa [#allocation4], 0 }
   0x9   :  { %27 = vsyncpa [#allocation4 + $0x1], 0  ;;  %s6819_s21 = smov 0   ;;  %s6821_s22 = smov 0  }
   0xa   :  { %s6823_s23 = smov 0   ;;  %s6825_s24 = smov 0  }
   0xb LB: > { %9513 = sst [smem:[#allocation20_spill]] %s6706_s21  ;;  %s6840_s25 = sadd.s32 4294967295, %s6718_s24   ;;  %s6718_s24 = sphi %s6825_s24, %s9884_s24   ;;  %s6714_s23 = sphi %s6823_s23, %s9886_s23   ;;  %s6710_s22 = sphi %s6821_s22, %s9888_s22   ;;  %s6706_s21 = sphi %s6819_s21, %s9887_s21  }
   0xc   : > { %9514 = sst [smem:[#allocation21_spill]] %s6714_s23  ;;  %s5388_s26 = sadd.s32 4294967294, %s6718_s24  }
   0xd   : > { %s6844_s27 = sadd.s32 1, %s6718_s24   ;;  %s381_s28 = sadd.s32 1, %s6714_s23 }
   0xe   : > { %9515 = sst [smem:[#allocation22_spill]] %s6844_s27  ;;  %s378_s29 = ssub.s32 %s6718_s24, %s6844_s27 }
   0xf   : > { %p391_p0 = scmp.ne.s32.totalorder %s6714_s23, %s6710_s22  ;;  %p379_p1 = scmp.eq.s32.totalorder %s378_s29, 0 }
  0x10   : > { %p392_p2 = scmp.eq.s32.totalorder %s6840_s25, 1  ;;  %p397_p3 = scmp.ne.s32.totalorder %s6710_s22, %s6706_s21 }
  0x11   : > { %p398_p4 = scmp.eq.s32.totalorder %s5388_s26, 1  ;;  %p5389_p7 = scmp.ge.s32.totalorder %s6718_s24, 1 }
  0x12   : > { %s6855_s30 = scalar_select %p379_p1, %s6714_s23, %s381_s28  }
  0x13   : > { %p6857_p5 = por %p392_p2, %p391_p0  ;;  %p6861_p6 = por %p398_p4, %p397_p3 }
  0x14   : > { %9516 = sst [smem:[#allocation23_spill]] %s6855_s30  ;;  %p405_p8 = scmp.lt.s32.totalorder %s6718_s24, 3 }
  0x15   : > { %s9517_s0 = scalar_select %p6857_p5, 1, 0 }
  0x16   : > { %s9518_s17 = scalar_select %p6861_p6, 1, 0 }
  0x17   : > { %p9404_p9 = scmp.eq.s32.totalorder %s6840_s25, 0  ;;  %p6868_p10 = pnand %p5389_p7, %p405_p8 }
  0x18   : > { %9519 = sst [smem:[#allocation24_spill]] %s9518_s17  ;;  %s6720_s19 = smov [#allocation5]  }
  0x19   : > { %s9520_s18 = scalar_select %p6868_p10, 1, 0 }
  0x1a   : > { %s434_s20 = sshll.u32 %s6720_s19, 4  ;;  %p6279_p11 = pneg %p6868_p10  ;;  %s435_s20 = int_to_ptr.vmem [resolvable:$true] %s434_s20 }
  0x1b   : > { %s6721_s26 = smov [#allocation8]   ;;  %s6722_s30 = smov [#allocation11]  }
  0x1c   : > { %s462_s28 = sshll.u32 %s6721_s26, 4  ;;  %p6876_p12 = pnand %p9404_p9, %p6279_p11  ;;  %s463_s28 = int_to_ptr.vmem [resolvable:$true] %s462_s28 }
  0x1d   : > { %s492_s23 = sshll.u32 %s6722_s30, 4  ;;  %s6471_s19 = scalar_lea.vmem %s435_s20, 16  ;;  %s493_s23 = int_to_ptr.vmem [resolvable:$true] %s492_s23 }
  0x1e   : > { %p6882_p13 = pneg %p6876_p12  ;;  %p6472_p0 = scmp.ne.s32.totalorder %s435_s20, %s6471_s19 }
  0x1f   : > { %s6478_s26 = scalar_lea.vmem %s435_s20, 32  ;;  %p6479_p3 = scmp.lt.s32.totalorder %s435_s20, %s435_s20 }
  0x20   : > { %p6474_p1 = pnand %p6472_p0, %p6882_p13  ;;  %p6480_p4 = scmp.lt.s32.totalorder %s6478_s26, %s6471_s19 }
  0x22   : > { %p6475_p2 = pneg %p6474_p1  ;;  %p6481_p7 = por %p6480_p4, %p6479_p3 }
  0x24   : > { %p6482_p8 = pnand %p6481_p7, %p6475_p2 }
  0x26   : > { %6485 = shalt.err (!%p6482_p8)
}
  0x27   : > { %s9523_s3 = sld [smem:[#allocation53_spill]]  ;;  %s6497_s21 = scalar_lea.vmem %s463_s28, 32 }
  0x28   : > { %p6498_p11 = scmp.ne.s32.totalorder %s463_s28, %s6497_s21  ;;  %p6505_p0 = scmp.lt.s32.totalorder %s463_s28, %s463_s28 }
  0x29   : > { %p6506_p1 = scmp.lt.s32.totalorder %s6497_s21, %s6497_s21 }
  0x2a   : > { %p6500_p9 = pnand %p6498_p11, %p6882_p13 }
  0x2b   : > { %p6507_p5 = por %p6506_p1, %p6505_p0 }
  0x2c   : > { %p6501_p6 = pneg %p6500_p9 }
  0x2d   : > { %6285 = dma.hbm_to_vmem [thread:$0]  (!%p6876_p12), %s9523_s3, 16, %s435_s20, [#allocation6]  }
  0x2e   : > { %p6508_p10 = pnand %p6507_p5, %p6501_p6 }
  0x30   : > { %6511 = shalt.err (!%p6508_p10)
}
  0x31   : > { %s9524_s7 = sld [smem:[#allocation54_spill]]  ;;  %s6523_s17 = scalar_lea.vmem %s493_s23, 512 }
  0x32   : > { %p6524_p2 = scmp.ne.s32.totalorder %s493_s23, %s6523_s17  ;;  %p6531_p7 = scmp.lt.s32.totalorder %s493_s23, %s493_s23 }
  0x33   : > { %p6532_p9 = scmp.lt.s32.totalorder %s6523_s17, %s6523_s17 }
  0x34   : > { %p6526_p3 = pnand %p6524_p2, %p6882_p13 }
  0x35   : > { %p6533_p8 = por %p6532_p9, %p6531_p7 }
  0x36   : > { %p6527_p4 = pneg %p6526_p3 }
  0x37   : > { %6291 = dma.hbm_to_vmem [thread:$0]  (!%p6876_p12), %s9524_s7, 32, %s463_s28, [#allocation9]  }
  0x38   : > { %p6534_p11 = pnand %p6533_p8, %p6527_p4 }
  0x3a   : > { %6537 = shalt.err (!%p6534_p11)
}
  0x3b   : > { %s9407_s21 = smov 64   ;;  %s9408_s20 = smov 4  }
  0x3c   : > { %6297 = dma.hbm_to_vmem [thread:$0]  (!%p6876_p12), %s9394_s12, 512, %s493_s23, [#allocation12], %s9407_s21, %s9407_s21, %s9408_s20  }
  0x3d   : > { %s6725_s19 = smov [#allocation2]   ;;  %s6726_s3 = smov [#allocation7]  }
  0x3e   : > { %s420_s26 = sshll.u32 %s6725_s19, 4  ;;  %s448_s17 = sshll.u32 %s6726_s3, 4  ;;  %s421_s26 = int_to_ptr.vmem [resolvable:$true] %s420_s26  ;;  %s449_s17 = int_to_ptr.vmem [resolvable:$true] %s448_s17 }
  0x3f   : > { %s6549_s7 = scalar_lea.vmem %s421_s26, 128  ;;  %p6557_p0 = scmp.lt.s32.totalorder %s421_s26, %s421_s26 }
  0x40   : > { %p6550_p5 = scmp.ne.s32.totalorder %s421_s26, %s6549_s7  ;;  %p6558_p1 = scmp.lt.s32.totalorder %s6549_s7, %s6549_s7 }
  0x42   : > { %p6552_p6 = pnand %p6550_p5, %p6882_p13  ;;  %p6559_p2 = por %p6558_p1, %p6557_p0 }
  0x44   : > { %p6553_p10 = pneg %p6552_p6 }
  0x46   : > { %p6560_p3 = pnand %p6559_p2, %p6553_p10 }
  0x48   : > { %6563 = shalt.err (!%p6560_p3)
}
  0x49   : > { %6282 = dma.hbm_to_vmem [thread:$0]  (!%p6876_p12), %s9384_s2, 128, %s421_s26, [#allocation3], %s9407_s21, %s9407_s21, %s9408_s20  }
  0x4a   : > { %s6575_s3 = scalar_lea.vmem %s449_s17, 16  ;;  %s6582_s7 = scalar_lea.vmem %s449_s17, 32 }
  0x4b   : > { %p6576_p4 = scmp.ne.s32.totalorder %s449_s17, %s6575_s3  ;;  %p6583_p8 = scmp.lt.s32.totalorder %s449_s17, %s449_s17 }
  0x4c   : > { %p6584_p11 = scmp.lt.s32.totalorder %s6582_s7, %s6575_s3 }
  0x4d   : > { %p6578_p7 = pnand %p6576_p4, %p6882_p13 }
  0x4e   : > { %p6585_p5 = por %p6584_p11, %p6583_p8 }
  0x4f   : > { %p6579_p9 = pneg %p6578_p7 }
  0x51   : > { %p6586_p6 = pnand %p6585_p5, %p6579_p9 }
  0x53   : > { %6589 = shalt.err (!%p6586_p6)
}
  0x54   : > { %6288 = dma.hbm_to_vmem [thread:$0]  (!%p6876_p12), %s9387_s5, 16, %s449_s17, [#allocation6]  }
  0x55   : > { %s6727_s26 = smov [#allocation10]   ;;  %s6728_s28 = smov [#allocation13]  }
  0x56   : > { %s476_s23 = sshll.u32 %s6727_s26, 4  ;;  %s508_s21 = sshll.u32 %s6728_s28, 4  ;;  %s477_s23 = int_to_ptr.vmem [resolvable:$true] %s476_s23  ;;  %s509_s21 = int_to_ptr.vmem [resolvable:$true] %s508_s21 }
  0x57   : > { %s6601_s20 = scalar_lea.vmem %s477_s23, 16  ;;  %s6608_s3 = scalar_lea.vmem %s477_s23, 32 }
  0x58   : > { %p6602_p10 = scmp.ne.s32.totalorder %s477_s23, %s6601_s20  ;;  %p6609_p2 = scmp.lt.s32.totalorder %s477_s23, %s477_s23 }
  0x59   : > { %p6610_p3 = scmp.lt.s32.totalorder %s6608_s3, %s6601_s20 }
  0x5a   : > { %p6604_p0 = pnand %p6602_p10, %p6882_p13 }
  0x5b   : > { %p6611_p4 = por %p6610_p3, %p6609_p2 }
  0x5c   : > { %p6605_p1 = pneg %p6604_p0 }
  0x5e   : > { %p6612_p7 = pnand %p6611_p4, %p6605_p1 }
  0x60   : > { %6615 = shalt.err (!%p6612_p7)
}
  0x61   : > { %6294 = dma.hbm_to_vmem [thread:$0]  (!%p6876_p12), %s9391_s9, 16, %s477_s23, [#allocation9]  }
  0x62   : > { %s6627_s30 = scalar_lea.vmem %s509_s21, 1024  ;;  %p6635_p5 = scmp.lt.s32.totalorder %s509_s21, %s509_s21 }
  0x63   : > { %p6628_p9 = scmp.ne.s32.totalorder %s509_s21, %s6627_s30  ;;  %p6636_p6 = scmp.lt.s32.totalorder %s6627_s30, %s6627_s30 }
  0x65   : > { %p6630_p8 = pnand %p6628_p9, %p6882_p13  ;;  %p6637_p10 = por %p6636_p6, %p6635_p5 }
  0x67   : > { %p6631_p11 = pneg %p6630_p8 }
  0x69   : > { %p6638_p0 = pnand %p6637_p10, %p6631_p11 }
  0x6b   : > { %6641 = shalt.err (!%p6638_p0)
}
  0x6c   : > { %s9525_s20 = smov 4   ;;  %s9526_s19 = smov 64  }
  0x6d   : > { %6300 = dma.hbm_to_vmem [thread:$0]  (!%p6876_p12), %s9396_s14, 1024, %s509_s21, [#allocation12], %s9526_s19, %s9526_s19, %s9525_s20  }
  0x6e   : > { %p9527_p1 = scmp.ne.s32.totalorder %s9520_s18, 0 }
  0x70   : > { %536 = sbr.rel (%p9527_p1) target bundleno = 1816 (0x718), region = 84 }
  0x75   : > { %p9528_p13 = scmp.eq.s32.totalorder %s6840_s25, 0 }
  0x77   : > { %6685 = dma.done.wait (%p9528_p13), [#allocation3], 128   ;;  %p9529_p2 = pmov %p9528_p13 }
  0x79   : > { %6687 = vsyncadd (%p9529_p2), [#allocation3], 4294967168  ;;  %p9530_p3 = pmov %p9529_p2 }
  0x7a   : > { %p9531_p4 = pmov %p9529_p2 }
  0x7b   : > { %6689 = dma.done.wait (%p9530_p3), [#allocation6], 32  }
  0x7c   : > { %6691 = vsyncadd (%p9531_p4), [#allocation6], 4294967264  ;;  %p9532_p7 = pmov %p9529_p2 }
  0x7d   : > { %p9533_p12 = pmov %p9529_p2 }
  0x7e   : > { %6693 = dma.done.wait (%p9532_p7), [#allocation9], 48  }
  0x7f   : > { %6695 = vsyncadd (%p9533_p12), [#allocation9], 4294967248  ;;  %p9534_p9 = pmov %p9529_p2 }
  0x80   : > { %p9535_p8 = pmov %p9529_p2 }
  0x81   : > { %6697 = dma.done.wait (%p9534_p9), [#allocation12], 1536  }
  0x82   : > { %6699 = vsyncadd (%p9535_p8), [#allocation12], 4294965760  ;;  %s5407_s27 = sshll.u32 %s6840_s25, 4  ;;  %v9444_v0 = vmov 0   ;;  %s9536_s23 = sld [smem:[#allocation52_spill]]  ;;  %v6367_v1 = vld [vmem:[#allocation2] sm:$0xff]  }
  0x83   : > { %p611_p11 = scmp.lt.s32.totalorder %s5407_s27, 31  ;;  %6366 = vset.pattern.permute.xlu1 %v9444_v0  ;;  %6365 = vset.pattern.permute.xlu0 %v9444_v0  ;;  %vm9409_vm0 = vcmask 130048   ;;  %v6979_v5 = vld [vmem:[%s9383_s1 + $0x10] sm:$0xff]  ;;  %v6984_v6 = vld [vmem:[%s9383_s1] sm:$0xff]  ;;  %v6989_v7 = vld [vmem:[%s9383_s1 + $0x18] sm:$0xff]  ;;  %v9551_v62 = vmov 0 }
  0x84   : > { %5879 = vmatprep.subr.bf16.mxu0 %v6367_v1  ;;  %v911_v8 = vadd.s32 4294967295, %v6979_v5  ;;  %v909_v9 = vadd.s32 4294967295, %v6984_v6  ;;  %v912_v10 = vadd.s32 4294967295, %v6989_v7  ;;  %v6997_v11 = vld [vmem:[%s9383_s1 + $0x8] sm:$0xff]  ;;  %v7012_v18 = vld [vmem:[%s9383_s1 + $0x20] sm:$0xff]  ;;  %v7017_v19 = vld [vmem:[%s9383_s1 + $0x38] sm:$0xff] }
  0x85   : > { %s9890_s27 = smov (!%p611_p11, %s5407_s27), 31  ;;  %5880 = vmatpush3.bf16.msra.mxu0 %v6367_v1  ;;  %v910_v13 = vadd.s32 4294967295, %v6997_v11  ;;  %v7005_v15 = vld [vmem:[%s9383_s1 + $0x28] sm:$0xff]  ;;  %v913_v21 = vadd.s32 4294967295, %v7012_v18  ;;  %v916_v22 = vadd.s32 4294967295, %v7017_v19  ;;  %v7025_v23 = vld [vmem:[%s9383_s1 + $0x30] sm:$0xff] }
  0x86   : > { %s5408_s18 = sshll.u32 %s9890_s27, 2  ;;  %vm927_vm1 = vcmp.ge.s32.totalorder %v911_v8, 0  ;;  %vm943_vm2 = vcmp.lt.s32.totalorder %v911_v8, 8  ;;  %vm925_vm3 = vcmp.ge.s32.totalorder %v909_v9, 0  ;;  %vm941_vm4 = vcmp.lt.s32.totalorder %v909_v9, 8  ;;  %v7030_v24 = vld [vmem:[%s9383_s1 + $0x48] sm:$0xff] }
  0x87   : > { %vm959_vm5 = vmand %vm927_vm1, %vm943_vm2  ;;  %vm928_vm6 = vcmp.ge.s32.totalorder %v912_v10, 0  ;;  %vm944_vm7 = vcmp.lt.s32.totalorder %v912_v10, 8  ;;  %vm926_vm8 = vcmp.ge.s32.totalorder %v910_v13, 0  ;;  %vm942_vm9 = vcmp.lt.s32.totalorder %v910_v13, 8  ;;  %v7040_v27 = vld [vmem:[%s9383_s1 + $0x40] sm:$0xff]  ;;  %v7045_v28 = vld [vmem:[%s9383_s1 + $0x58] sm:$0xff] }
  0x88   : > { %s6968_s3 = scalar_lea.vmem %s9536_s23, %s5408_s18  ;;  %v975_v16 = vsel %vm959_vm5, 1, %v9444_v0  ;;  %vm957_vm10 = vmand %vm925_vm3, %vm941_vm4  ;;  %v914_v17 = vadd.s32 4294967295, %v7005_v15  ;;  %v915_v26 = vadd.s32 4294967295, %v7025_v23  ;;  %vm929_vm1 = vcmp.ge.s32.totalorder %v913_v21, 0  ;;  %v7052_v30 = vld [vmem:[%s9383_s1 + $0x50] sm:$0xff]  ;;  %v7057_v31 = vld [vmem:[%s9383_s1 + $0x68] sm:$0xff] }
  0x89   : > { %v6368_v2 = vld [vmem:[%s6968_s3] sm:$0xff]   ;;  %v6369_v3 = vld [vmem:[%s6968_s3 + $0x8] sm:$0xff]   ;;  %v6370_v4 = vld [vmem:[%s6968_s3 + $0x10] sm:$0xff]   ;;  %996 = vperm.xlu1 %6366, %v975_v16   ;;  %v973_v20 = vsel %vm957_vm10, 1, %v9444_v0  ;;  %vm945_vm2 = vcmp.lt.s32.totalorder %v913_v21, 8  ;;  %vm932_vm4 = vcmp.ge.s32.totalorder %v916_v22, 0 }
  0x8a   : > { %5881 = vmatprep.mubr.msk.bf16.mxu0 %vm9409_vm0, %v6368_v2  ;;  %v6371_v12 = vld [vmem:[%s6968_s3 + $0x18] sm:$0xff]   ;;  %v6372_v14 = vld [vmem:[%s6968_s3 + $0x20] sm:$0xff]   ;;  %vm960_vm11 = vmand %vm928_vm6, %vm944_vm7  ;;  %990 = vperm.xlu0 %6365, %v973_v20   ;;  %vm930_vm13 = vcmp.ge.s32.totalorder %v914_v17, 0  ;;  %vm946_vm14 = vcmp.lt.s32.totalorder %v914_v17, 8  ;;  %vm948_vm5 = vcmp.lt.s32.totalorder %v916_v22, 8  ;;  %vm931_vm6 = vcmp.ge.s32.totalorder %v915_v26, 0 }
  0x8b   : > { %5882 = vmatmul.mubr.msk.bf16.vlgmr.msra.gmra.mxu0 %vm9409_vm0, %v6369_v3  ;;  %v976_v25 = vsel %vm960_vm11, 1, %v9444_v0  ;;  %vm958_vm12 = vmand %vm926_vm8, %vm942_vm9  ;;  %v6373_v32 = vld [vmem:[%s6968_s3 + $0x28] sm:$0xff]   ;;  %v7064_v34 = vld [vmem:[%s9383_s1 + $0x60] sm:$0xff]  ;;  %vm947_vm7 = vcmp.lt.s32.totalorder %v915_v26, 8  ;;  %v918_v36 = vadd.s32 4294967295, %v7030_v24  ;;  %v917_v37 = vadd.s32 4294967295, %v7040_v27 }
  0x8c   : > { %5885 = vmatprep.mubr.msk.bf16.mxu0 %vm9409_vm0, %v6370_v4  ;;  %v974_v29 = vsel %vm958_vm12, 1, %v9444_v0  ;;  %vm962_vm15 = vmand %vm930_vm13, %vm946_vm14  ;;  %v6374_v35 = vld [vmem:[%s6968_s3 + $0x30] sm:$0xff]   ;;  %v920_v38 = vadd.s32 4294967295, %v7045_v28  ;;  %v919_v40 = vadd.s32 4294967295, %v7052_v30  ;;  %v922_v41 = vadd.s32 4294967295, %v7057_v31  ;;  %v7076_v42 = vld [vmem:[%s9383_s1 + $0x78] sm:$0xff] }
  0x8d   : > { %v978_v33 = vsel %vm962_vm15, 1, %v9444_v0  ;;  %vm961_vm3 = vmand %vm929_vm1, %vm945_vm2  ;;  %999 = vperm.xlu1 %6366, %v976_v25   ;;  %vm934_vm9 = vcmp.ge.s32.totalorder %v918_v36, 0  ;;  %vm950_vm10 = vcmp.lt.s32.totalorder %v918_v36, 8  ;;  %vm933_vm11 = vcmp.ge.s32.totalorder %v917_v37, 0  ;;  %v7092_v46 = vld [vmem:[%s9383_s1 + $0x70] sm:$0xff]  ;;  %v6375_v58 = vld [vmem:[%s6968_s3 + $0x38] sm:$0xff]  }
  0x8e   : > { %993 = vperm.xlu0 %6365, %v974_v29   ;;  %v977_v39 = vsel %vm961_vm3, 1, %v9444_v0  ;;  %vm7079_vm8 = vmand %vm932_vm4, %vm948_vm5  ;;  %v921_v44 = vadd.s32 4294967295, %v7064_v34  ;;  %vm949_vm13 = vcmp.lt.s32.totalorder %v917_v37, 8  ;;  %vm936_vm14 = vcmp.ge.s32.totalorder %v920_v38, 0  ;;  %v6377_v56 = vld [vmem:[%s9386_s4 + $0x18] sm:$0xff]   ;;  %v6381_v60 = vld [vmem:[%s9386_s4 + $0x8] sm:$0xff]  }
  0x8f   : > { %vm7085_vm12 = vmand %vm931_vm6, %vm947_vm7  ;;  %vm952_vm15 = vcmp.lt.s32.totalorder %v920_v38, 8  ;;  %vm935_vm2 = vcmp.ge.s32.totalorder %v919_v40, 0  ;;  %vm951_vm3 = vcmp.lt.s32.totalorder %v919_v40, 8  ;;  %v1481_v48 = vadd.s32 1, %v6997_v11  ;;  %5897 = vmatprep.subr.bf16.mxu1 %v6377_v56  ;;  %s6730_s7 = smov 64   ;;  %s607_s3 = sand.u32 1, %s6710_s22  }
  0x90   : > { %vm7094_vm1 = vmand %vm934_vm9, %vm950_vm10  ;;  %v1480_v49 = vadd.s32 1, %v6984_v6  ;;  %v980_v50 = vsel %vm7079_vm8, 1, %v9444_v0  ;;  %vm938_vm5 = vcmp.ge.s32.totalorder %v922_v41, 0  ;;  %vm954_vm6 = vcmp.lt.s32.totalorder %v922_v41, 8  ;;  %5898 = vmatpush3.bf16.msra.mxu1 %v6377_v56  ;;  %s5406_s18 = sshll.u32 %s607_s3, 7  ;;  %s5693_s21 = sshll.u32 %s6840_s25, 11 }
  0x91   : > { %1005 = vperm.xlu1 %6366, %v978_v33   ;;  %vm7105_vm4 = vmand %vm933_vm11, %vm949_vm13  ;;  %v924_v52 = vadd.s32 4294967295, %v7076_v42  ;;  %v979_v53 = vsel %vm7085_vm12, 1, %v9444_v0  ;;  %vm937_vm8 = vcmp.ge.s32.totalorder %v921_v44, 0  ;;  %vm953_vm9 = vcmp.lt.s32.totalorder %v921_v44, 8  ;;  %s9285_s29 = scalar_lea.vmem [#allocation14], %s5406_s18  ;;  %s9334_s30 = scalar_lea.hbm %s9398_s16, %s5693_s21 }
  0x92   : > { %1002 = vperm.xlu0 %6365, %v977_v39   ;;  %vm7116_vm7 = vmand %vm936_vm14, %vm952_vm15  ;;  %v923_v55 = vadd.s32 4294967295, %v7092_v46  ;;  %v1483_v57 = vadd.s32 1, %v6989_v7  ;;  %v982_v59 = vsel %vm7094_vm1, 1, %v9444_v0  ;;  %v981_v61 = vsel %vm7105_vm4, 1, %v9444_v0  ;;  %s5257_s23 = sshll.u32 %s9285_s29, 4  ;;  %s9342_s25 = scalar_lea.sflag [#allocation4], %s607_s3  ;;  %s9336_s23 = int_to_ptr.vmem [resolvable:$true] %s5257_s23 }
  0x93   : > { %5886 = vmatmul.mubr.msk.bf16.gmra.mxu0 %vm9409_vm0, %v6371_v12  ;;  %vm7123_vm10 = vmand %vm935_vm2, %vm951_vm3  ;;  %vm940_vm11 = vcmp.ge.s32.totalorder %v924_v52, 0  ;;  %vm956_vm13 = vcmp.lt.s32.totalorder %v924_v52, 8  ;;  %vm1497_vm3 = vcmp.ge.s32.totalorder %v1481_v48, 0  ;;  %vm1513_vm1 = vcmp.lt.s32.totalorder %v1481_v48, 8  ;;  %s6642_s20 = scalar_lea.vmem %s9336_s23, 2048  ;;  %p9880_p6 = scmp.ne.s32.totalorder %s9517_s0, 0 }
  0x94   : > { %5889 = vmatprep.mubr.msk.bf16.mxu0 %vm9409_vm0, %v6372_v14  ;;  %vm7134_vm12 = vmand %vm938_vm5, %vm954_vm6  ;;  %vm939_vm14 = vcmp.ge.s32.totalorder %v923_v55, 0  ;;  %vm955_vm15 = vcmp.lt.s32.totalorder %v923_v55, 8  ;;  %v1482_v63 = vadd.s32 1, %v6979_v5  ;;  %v1485_v2 = vadd.s32 1, %v7005_v15  ;;  %p6643_p5 = scmp.ne.s32.totalorder %s9336_s23, %s6642_s20  ;;  %s6731_s19 = smov [#allocation14]  }
  0x95   : > { %1011 = vperm.xlu1 %6366, %v980_v50   ;;  %vm7142_vm2 = vmand %vm937_vm8, %vm953_vm9  ;;  %v1484_v3 = vadd.s32 1, %v7012_v18  ;;  %v9555_v4 = vmov 0  ;;  %vm1499_vm8 = vcmp.ge.s32.totalorder %v1483_v57, 0  ;;  %vm1515_vm9 = vcmp.lt.s32.totalorder %v1483_v57, 8  ;;  %v6378_v57 = vld [vmem:[%s9386_s4 + $0x30] sm:$0xff]   ;;  %s6646_s26 = sshll.u32 %s6731_s19, 4  ;;  %s6647_s26 = int_to_ptr.vmem [resolvable:$false] %s6646_s26 }
  0x96   : > { %1008 = vperm.xlu0 %6365, %v979_v53   ;;  %v9552_v62 = vsel %vm7142_vm2, 4294967295, %v9551_v62  ;;  %vm7148_vm5 = vmand %vm940_vm11, %vm956_vm13  ;;  %v1487_v8 = vadd.s32 1, %v7017_v19  ;;  %v9557_v9 = vmov 0  ;;  %vm1498_vm11 = vcmp.ge.s32.totalorder %v1482_v63, 0  ;;  %p6644_p10 = pnand %p6643_p5, %p9880_p6  ;;  %s6648_s28 = scalar_lea.vmem %s6647_s26, 4096 }
  0x97   : > { %vm7154_vm4 = vmand %vm939_vm14, %vm955_vm15  ;;  %vm1514_vm13 = vcmp.lt.s32.totalorder %v1482_v63, 8  ;;  %v1486_v10 = vadd.s32 1, %v7025_v23  ;;  %vm9559_vm6 = vcmask 130048   ;;  %v984_v12 = vsel %vm7116_vm7, 1, %v9444_v0  ;;  %v7303_v63 = vld [vmem:[%s9386_s4 + $0x58] sm:$0xff]   ;;  %p6649_p1 = scmp.lt.s32.totalorder %s9336_s23, %s6647_s26  ;;  %p6650_p13 = scmp.lt.s32.totalorder %s6648_s28, %s6642_s20 }
  0x98   : > { %v9556_v4 = vsel %vm7154_vm4, 4294967295, %v9555_v4  ;;  %vm7159_vm2 = vmand %vm1497_vm3, %vm1513_vm1  ;;  %vm9560_vm14 = vcmp.ge.s32.totalorder %v1480_v49, 0  ;;  %v9561_v13 = vmov 0  ;;  %vm1501_vm3 = vcmp.ge.s32.totalorder %v1485_v2, 0  ;;  %p6645_p0 = pneg %p6644_p10 }
  0x99   : > { %1017 = vperm.xlu1 %6366, %v982_v59   ;;  %v9558_v9 = vsel %vm7159_vm2, 4294967295, %v9557_v9  ;;  %vm1517_vm1 = vcmp.lt.s32.totalorder %v1485_v2, 8  ;;  %v983_v14 = vsel %vm7123_vm10, 1, %v9444_v0  ;;  %vm7178_vm2 = vmand %vm1499_vm8, %vm1515_vm9  ;;  %v9563_v16 = vmov 0  ;;  %v6380_v59 = vld [vmem:[%s9386_s4 + $0x28] sm:$0xff]   ;;  %p6651_p2 = por %p6650_p13, %p6649_p1 }
  0x9a   : > { %1014 = vperm.xlu0 %6365, %v981_v61   ;;  %v9564_v16 = vsel %vm7178_vm2, 4294967295, %v9563_v16  ;;  %vm1516_vm4 = vcmp.lt.s32.totalorder %v1484_v3, 8  ;;  %v1489_v17 = vadd.s32 1, %v7030_v24  ;;  %vm7183_vm7 = vmand %vm1498_vm11, %vm1514_vm13  ;;  %v9565_v19 = vmov 0  ;;  %v6382_v61 = vld [vmem:[%s9386_s4 + $0x20] sm:$0xff]  }
  0x9b   : > { %5890 = vmatmul.mubr.msk.bf16.gmra.mxu0 %vm9409_vm0, %v6373_v32  ;;  %v9566_v19 = vsel %vm7183_vm7, 4294967295, %v9565_v19  ;;  %v1488_v20 = vadd.s32 1, %v7040_v27  ;;  %v1491_v21 = vadd.s32 1, %v7045_v28  ;;  %vm7189_vm10 = vmand %vm1501_vm3, %vm1517_vm1  ;;  %v9567_v22 = vmov 0  ;;  %p6652_p3 = pnand %p6651_p2, %p6645_p0 }
  0x9c   : > { %5893 = vmatprep.mubr.msk.bf16.mxu0 %vm9409_vm0, %v6374_v35  ;;  %vm1512_vm0 = vcmp.lt.s32.totalorder %v1480_v49, 8  ;;  %v9568_v22 = vsel %vm7189_vm10, 4294967295, %v9567_v22  ;;  %vm1502_vm8 = vcmp.ge.s32.totalorder %v1486_v10, 0  ;;  %vm1518_vm9 = vcmp.lt.s32.totalorder %v1486_v10, 8 }
  0x9d   : > { %vm7170_vm15 = vmand %vm9560_vm14, %vm1512_vm0  ;;  %vm1519_vm14 = vcmp.lt.s32.totalorder %v1487_v8, 8  ;;  %1023 = vperm.xlu1 %6366, %v984_v12   ;;  %v1490_v25 = vadd.s32 1, %v7052_v30  ;;  %v986_v24 = vsel %vm7134_vm12, 1, %v9444_v0  ;;  %v9569_v26 = vmov 0 }
  0x9e   : > { %v9562_v13 = vsel %vm7170_vm15, 4294967295, %v9561_v13  ;;  %1020 = vperm.xlu0 %6365, %v983_v14   ;;  %vm1505_vm13 = vcmp.ge.s32.totalorder %v1489_v17, 0  ;;  %vm1521_vm0 = vcmp.lt.s32.totalorder %v1489_v17, 8  ;;  %v1493_v27 = vadd.s32 1, %v7057_v31 }
  0x9f   : > { %vm9571_vm3 = vnez %v9552_v62  ;;  %vm9572_vm1 = vcmp.ge.s32.totalorder %v1487_v8, 0  ;;  %vm1504_vm12 = vcmp.ge.s32.totalorder %v1488_v20, 0  ;;  %vm1520_vm7 = vcmp.lt.s32.totalorder %v1488_v20, 8  ;;  %vm7216_vm2 = vmand %vm1505_vm13, %vm1521_vm0  ;;  %v6383_v62 = vld [vmem:[%s9386_s4] sm:$0xff]  }
  0xa0   : > { %v985_v28 = vsel %vm9571_vm3, 1, %v9444_v0  ;;  %vm7208_vm10 = vmand %vm9572_vm1, %vm1519_vm14  ;;  %v9577_v31 = vmov 0  ;;  %vm1506_vm3 = vcmp.ge.s32.totalorder %v1490_v25, 0  ;;  %vm1522_vm15 = vcmp.lt.s32.totalorder %v1490_v25, 8 }
  0xa1   : > { %1029 = vperm.xlu1 %6366, %v986_v24   ;;  %v9578_v31 = vsel %vm7216_vm2, 4294967295, %v9577_v31  ;;  %v988_v32 = vsel %vm7148_vm5, 1, %v9444_v0  ;;  %vm7223_vm14 = vmand %vm1504_vm12, %vm1520_vm7  ;;  %vm9581_vm1 = vnez %v9556_v4  ;;  %vm9582_vm0 = vnez %v9558_v9 }
  0xa2   : > { %1026 = vperm.xlu0 %6365, %v985_v28   ;;  %v987_v35 = vsel %vm9581_vm1, 1, %v9444_v0  ;;  %v1545_v36 = vsel %vm9582_vm0, 1, %v9444_v0  ;;  %vm9583_vm13 = vnez %v9562_v13  ;;  %v1492_v39 = vadd.s32 1, %v7064_v34  ;;  %vm1538_vm12 = vmand %vm1506_vm3, %vm1522_vm15 }
  0xa3   : > { %5894 = vmatmul.mubr.msk.bf16.gmra.mxu0 %vm9559_vm6, %v6375_v58  ;;  %vm1500_vm6 = vcmp.ge.s32.totalorder %v1484_v3, 0  ;;  %v1544_v37 = vsel %vm9583_vm13, 1, %v9444_v0  ;;  %vm9586_vm5 = vnez %v9564_v16  ;;  %vm9587_vm7 = vnez %v9566_v19  ;;  %v6379_v58 = vld [vmem:[%s9386_s4 + $0x10] sm:$0xff]   ;;  %v7326_v19 = vld [vmem:[#allocation5] ss:$0 sm:$0xff] }
  0xa4   : > { %vm7198_vm11 = vmand %vm1500_vm6, %vm1516_vm4  ;;  %vm1507_vm6 = vcmp.ge.s32.totalorder %v1491_v21, 0  ;;  %v1547_v40 = vsel %vm9586_vm5, 1, %v9444_v0  ;;  %v1546_v41 = vsel %vm9587_vm7, 1, %v9444_v0  ;;  %vm9588_vm1 = vnez %v9568_v22  ;;  %5899 = vmatprep.subr.bf16.mxu1 %v6379_v58 }
  0xa5   : > { %v9570_v26 = vsel %vm7198_vm11, 4294967295, %v9569_v26  ;;  %vm7212_vm4 = vmand %vm1502_vm8, %vm1518_vm9  ;;  %vm1523_vm11 = vcmp.lt.s32.totalorder %v1491_v21, 8  ;;  %vm1509_vm8 = vcmp.ge.s32.totalorder %v1493_v27, 0  ;;  %vm1525_vm9 = vcmp.lt.s32.totalorder %v1493_v27, 8  ;;  %1035 = vperm.xlu1 %6366, %v988_v32   ;;  %5900 = vmatpush3.bf16.msra.mxu1 %v6379_v58 }
  0xa6   : > { %vm7236_vm2 = vmand %vm1507_vm6, %vm1523_vm11  ;;  %v1549_v43 = vsel %vm9588_vm1, 1, %v9444_v0  ;;  %vm9589_vm11 = vnez %v9570_v26  ;;  %v1551_v34 = vsel %vm7208_vm10, 1, %v9444_v0  ;;  %v1550_v45 = vsel %vm7212_vm4, 1, %v9444_v0  ;;  %1032 = vperm.xlu0 %6365, %v987_v35   ;;  %5901 = vmatprep.subr.bf16.mxu1 %v6381_v60 }
  0xa7   : > { %v1548_v44 = vsel %vm9589_vm11, 1, %v9444_v0  ;;  %vm1541_vm6 = vmand %vm1509_vm8, %vm1525_vm9  ;;  %vm9590_vm15 = vnez %v9578_v31  ;;  %v1552_v48 = vsel %vm7223_vm14, 1, %v9444_v0  ;;  %v1495_v49 = vadd.s32 1, %v7076_v42 }
  0xa8   : > { %v1553_v47 = vsel %vm9590_vm15, 1, %v9444_v0  ;;  %v1494_v50 = vadd.s32 1, %v7092_v46  ;;  %v1555_v51 = vsel %vm7236_vm2, 1, %v9444_v0  ;;  %vm1508_vm10 = vcmp.ge.s32.totalorder %v1492_v39, 0  ;;  %v6376_v46 = vld [vmem:[%s9386_s4 + $0x38] sm:$0xff]  }
  0xa9   : > { %vm1524_vm4 = vcmp.lt.s32.totalorder %v1492_v39, 8  ;;  %v1554_v52 = vsel %vm1538_vm12, 1, %v9444_v0  ;;  %v1557_v53 = vsel %vm1541_vm6, 1, %v9444_v0  ;;  %1564 = vperm.xlu1 %6366, %v1545_v36   ;;  %vm1511_vm8 = vcmp.ge.s32.totalorder %v1495_v49, 0  ;;  %5921 = vmatprep.subr.bf16.mxu0 %v6376_v46 }
  0xaa   : > { %1561 = vperm.xlu0 %6365, %v1544_v37   ;;  %vm1540_vm3 = vmand %vm1508_vm10, %vm1524_vm4  ;;  %vm1527_vm9 = vcmp.lt.s32.totalorder %v1495_v49, 8  ;;  %vm1510_vm14 = vcmp.ge.s32.totalorder %v1494_v50, 0  ;;  %vm1526_vm0 = vcmp.lt.s32.totalorder %v1494_v50, 8  ;;  %5922 = vmatpush3.bf16.msra.mxu0 %v6376_v46  ;;  %v3728_v13 = vadd.s32 2, %v6984_v6 }
  0xab   : > { %v1556_v42 = vsel %vm1540_vm3, 1, %v9444_v0  ;;  %vm1543_vm2 = vmand %vm1511_vm8, %vm1527_vm9  ;;  %5923 = vmatprep.subr.bf16.mxu0 %v6378_v57  ;;  %5902 = vmatpush3.bf16.msra.mxu1 %v6381_v60  ;;  %v3729_v16 = vadd.s32 2, %v6997_v11  ;;  %v3730_v20 = vadd.s32 2, %v6979_v5  ;;  %vm9443_vm3 = vcmask 1040384  }
  0xac   : > { %vm1542_vm13 = vmand %vm1510_vm14, %vm1526_vm0  ;;  %v1559_v54 = vsel %vm1543_vm2, 1, %v9444_v0  ;;  %5903 = vmatprep.subr.bf16.mxu1 %v6383_v62  ;;  %vm3744_vm5 = vcmp.ge.s32.totalorder %v3728_v13, 0  ;;  %vm3760_vm7 = vcmp.lt.s32.totalorder %v3728_v13, 8  ;;  %vm1109_vm8 = vcmask 523264  }
  0xad   : > { %1570 = vperm.xlu1 %6366, %v1547_v40   ;;  %v1558_v55 = vsel %vm1542_vm13, 1, %v9444_v0  ;;  %vm3745_vm12 = vcmp.ge.s32.totalorder %v3729_v16, 0  ;;  %vm3761_vm1 = vcmp.lt.s32.totalorder %v3729_v16, 8  ;;  %vm3746_vm11 = vcmp.ge.s32.totalorder %v3730_v20, 0  ;;  %vm7337_vm15 = vmand %vm3744_vm5, %vm3760_vm7 }
  0xae   : > { %1567 = vperm.xlu0 %6365, %v1546_v41   ;;  %5924 = vmatpush3.bf16.msra.mxu0 %v6378_v57  ;;  %vm3762_vm6 = vcmp.lt.s32.totalorder %v3730_v20, 8  ;;  %vm7346_vm10 = vmand %vm3745_vm12, %vm3761_vm1  ;;  %v7363_v40 = vsel %vm7337_vm15, 1, %v9444_v0 }
  0xaf   : > { %5925 = vmatprep.subr.bf16.mxu0 %v6380_v59  ;;  %5904 = vmatpush3.bf16.msra.mxu1 %v6383_v62  ;;  %vm3778_vm4 = vmand %vm3746_vm11, %vm3762_vm6  ;;  %vm9440_vm6 = vcmask 1046528  }
  0xb0   : > { %5945 = vmatprep.subr.bf16.mxu1 %v7303_v63 }
  0xb1   : > { %1576 = vperm.xlu1 %6366, %v1549_v43  }
  0xb2   : > { %1573 = vperm.xlu0 %6365, %v1548_v44   ;;  %5926 = vmatpush3.bf16.msra.mxu0 %v6380_v59  ;;  %v7371_v44 = vsel %vm7346_vm10, 1, %v9444_v0 }
  0xb3   : > { %5927 = vmatprep.subr.bf16.mxu0 %v6382_v61 }
  0xb5   : > { %1582 = vperm.xlu1 %6366, %v1551_v34   ;;  %v7374_v34 = vsel %vm3778_vm4, 1, %v9444_v0 }
  0xb6   : > { %1579 = vperm.xlu0 %6365, %v1550_v45   ;;  %5928 = vmatpush3.bf16.msra.mxu0 %v6382_v61 }
  0xb9   : > { %1588 = vperm.xlu1 %6366, %v1553_v47  }
  0xba   : > { %1585 = vperm.xlu0 %6365, %v1552_v48  }
  0xbd   : > { %1594 = vperm.xlu1 %6366, %v1555_v51  }
  0xbe   : > { %1591 = vperm.xlu0 %6365, %v1554_v52  }
  0xc1   : > { %1600 = vperm.xlu1 %6366, %v1557_v53  }
  0xc2   : > { %1597 = vperm.xlu0 %6365, %v1556_v42  }
  0xc5   : > { %1606 = vperm.xlu1 %6366, %v1559_v54  }
  0xc6   : > { %1603 = vperm.xlu0 %6365, %v1558_v55  }
 0x104   : > { %v7306_v1 = vpop.permute.xlu1 %996 }
 0x105   : > { %v7308_v2 = vpop.permute.xlu0 %990  ;;  %vm9419_vm0 = vcmp.eq.s32.totalorder %v7306_v1, 1 }
 0x106   : > { %vm9424_vm9 = vcmp.eq.s32.totalorder %v7308_v2, 1 }
 0x108   : > { %v7310_v3 = vpop.permute.xlu1 %999 }
 0x109   : > { %v7312_v4 = vpop.permute.xlu0 %993  ;;  %vm9414_vm14 = vcmp.eq.s32.totalorder %v7310_v3, 1 }
 0x10a   : > { %vm9420_vm2 = vcmp.eq.s32.totalorder %v7312_v4, 1 }
 0x10c   : > { %v7314_v8 = vpop.permute.xlu1 %1005 }
 0x10d   : > { %9591 = vst [vmem:[#allocation25_spill] sm:$0xff] %v7314_v8  ;;  %v7316_v9 = vpop.permute.xlu0 %1002  ;;  %vm9412_vm13 = vcmp.eq.s32.totalorder %v7314_v8, 1 }
 0x10e   : > { %vm9413_vm7 = vcmp.eq.s32.totalorder %v7316_v9, 1 }
 0x110   : > { %v7318_v10 = vpop.permute.xlu1 %1011 }
 0x111   : > { %9592 = vst [vmem:[#allocation26_spill] sm:$0xff] %v7318_v10  ;;  %v7320_v12 = vpop.permute.xlu0 %1008  ;;  %vm9410_vm12 = vcmp.eq.s32.totalorder %v7318_v10, 1 }
 0x112   : > { %9593 = vst [vmem:[#allocation27_spill] sm:$0xff] %v7320_v12  ;;  %vm9411_vm5 = vcmp.eq.s32.totalorder %v7320_v12, 1 }
 0x114   : > { %v7324_v17 = vpop.permute.xlu1 %1017 }
 0x115   : > { %9594 = vst [vmem:[#allocation28_spill] sm:$0xff] %v7324_v17  ;;  %v7329_v21 = vpop.permute.xlu0 %1014  ;;  %vm9415_vm4 = vcmp.eq.s32.totalorder %v7324_v17, 1 }
 0x116   : > { %9595 = vst [vmem:[#allocation29_spill] sm:$0xff] %v7329_v21 }
 0x118   : > { %v7341_v28 = vpop.permute.xlu1 %1023 }
 0x119   : > { %9598 = vst [vmem:[#allocation30_spill] sm:$0xff] %v7341_v28  ;;  %v7350_v32 = vpop.permute.xlu0 %1020 }
 0x11a   : > { %9601 = vst [vmem:[#allocation31_spill] sm:$0xff] %v7350_v32 }
 0x11c   : > { %v7383_v51 = vpop.permute.xlu1 %1029 }
 0x11d   : > { %9602 = vst [vmem:[#allocation32_spill] sm:$0xff] %v7383_v51  ;;  %v7390_v42 = vpop.permute.xlu0 %1026 }
 0x11e   : > { %9603 = vst [vmem:[#allocation33_spill] sm:$0xff] %v7390_v42 }
 0x120   : > { %v7428_v27 = vpop.permute.xlu1 %1035 }
 0x121   : > { %9604 = vst [vmem:[#allocation34_spill] sm:$0xff] %v7428_v27 }
 0x14b   : > { %v5883_v14 = vpop.f32.mrf.mxu0 }
 0x14c   : > { %v773_v24 = vadd.f32 %v5883_v14, %v7326_v19  ;;  %v7412_v14 = vadd.s32 2, %v6989_v7 }
 0x14d   : > { %v764_v22 = vpop.f32.mrf.mxu0 }
 0x14e   : > { %v765_v25 = vadd.f32 %v7326_v19, %v764_v22  ;;  %v7352_v33 = vmax.f32 %v773_v24, 0.0  ;;  %vm3747_vm1 = vcmp.ge.s32.totalorder %v7412_v14, 0  ;;  %vm3763_vm11 = vcmp.lt.s32.totalorder %v7412_v14, 8 }
 0x14f   : > { %v5884_v26 = vpop.f32.mrf.mxu0 }
 0x150   : > { %v776_v6 = vadd.f32 %v5884_v26, %v7326_v19  ;;  %1850 = vrot.lane.b32.xlu0 %v765_v25, %s6730_s7  ;;  %v7335_v5 = vmax.f32 %v765_v25, 0.0  ;;  %v864_v45 = vrot.slane %v7352_v33, 7  ;;  %v7421_v25 = vadd.s32 2, %v7012_v18 }
 0x151   : > { %v767_v11 = vpop.f32.mrf.mxu0  ;;  %v7435_v18 = vadd.s32 2, %v7025_v23 }
 0x152   : > { %v7343_v29 = vmax.f32 %v776_v6, 0.0  ;;  %v768_v30 = vadd.f32 %v7326_v19, %v767_v11  ;;  %v861_v39 = vrot.slane %v7335_v5, 7  ;;  %vm3748_vm15 = vcmp.ge.s32.totalorder %v7421_v25, 0 }
 0x153   : > { %v5887_v35 = vpop.f32.mrf.mxu0  ;;  %vm3764_vm10 = vcmp.lt.s32.totalorder %v7421_v25, 8  ;;  %v7729_v25 = vld [vmem:[%s9383_s1 + $0x58] sm:$0xff] }
 0x154   : > { %v7354_v36 = vmax.f32 %v768_v30, 0.0  ;;  %1852 = vrot.lane.b32.xlu1 %v768_v30, %s6730_s7  ;;  %1854 = vrot.lane.b32.xlu0 %v773_v24, %s6730_s7  ;;  %v866_v37 = vrot.slane %v7343_v29, 7  ;;  %v1254_v47 = vpack.c.bf16 %v7343_v29, %v7352_v33  ;;  %v789_v48 = vadd.f32 %v5887_v35, %v7326_v19 }
 0x155   : > { %v780_v38 = vpop.f32.mrf.mxu0  ;;  %v908_v55 = vsel %vm9443_vm3, 0.0, %v861_v39  ;;  %v7432_v35 = vadd.s32 2, %v7005_v15  ;;  %v6385_v15 = vld [vmem:[%s9386_s4 + $0x50] sm:$0xff]  }
 0x156   : > { %v781_v41 = vadd.f32 %v7326_v19, %v780_v38  ;;  %v1253_v43 = vpack.c.bf16 %v7354_v36, %v7335_v5  ;;  %v862_v50 = vrot.slane %v7354_v36, 7  ;;  %v867_v57 = vsel %vm9443_vm3, %v864_v45, %v866_v37  ;;  %v7437_v38 = vpop.permute.xlu0 %1032 }
 0x157   : > { %v5888_v49 = vpop.f32.mrf.mxu0  ;;  %v7405_v60 = vmax.f32 %v789_v48, 0.0  ;;  %v1053_v20 = vsel %vm9424_vm9, %v908_v55, 0.0  ;;  %v1056_v22 = vsel %vm9414_vm14, %v867_v57, 0.0  ;;  %9605 = vst [vmem:[#allocation35_spill] sm:$0xff] %v7437_v38  ;;  %v6386_v57 = vld [vmem:[%s9386_s4 + $0x48] sm:$0xff]   ;;  %vm3750_vm14 = vcmp.ge.s32.totalorder %v7435_v18, 0 }
 0x158   : > { %v7385_v52 = vmax.f32 %v781_v41, 0.0  ;;  %v792_v53 = vadd.f32 %v5888_v49, %v7326_v19  ;;  %5929 = vmatprep.mubr.msk.bf16.mxu0 %vm1109_vm8, %v1253_v43  ;;  %1856 = vrot.lane.b32.xlu1 %v776_v6, %s6730_s7  ;;  %v863_v54 = vsel %vm9443_vm3, %v861_v39, %v862_v50  ;;  %v865_v56 = vsel %vm9443_vm3, %v862_v50, %v864_v45 }
 0x159   : > { %1858 = vrot.lane.b32.xlu0 %v781_v41, %s6730_s7  ;;  %v783_v46 = vpop.f32.mrf.mxu0  ;;  %5930 = vmatmul.mubr.msk.bf16.vlgmr.msra.gmra.mxu0 %vm1109_vm8, %v1254_v47  ;;  %v1054_v62 = vsel %vm9420_vm2, %v863_v54, 0.0  ;;  %v1055_v13 = vsel %vm9419_vm0, %v865_v56, 0.0  ;;  %v872_v39 = vrot.slane %v7405_v60, 7  ;;  %vm9421_vm0 = vcmp.eq.s32.totalorder %v7437_v38, 1  ;;  %vm7607_vm2 = vmand %vm3747_vm1, %vm3763_vm11 }
 0x15a   : > { %v7402_v58 = vmax.f32 %v792_v53, 0.0  ;;  %v784_v59 = vadd.f32 %v7326_v19, %v783_v46  ;;  %v868_v16 = vrot.slane %v7385_v52, 7  ;;  %v1069_v6 = vpack.c.bf16 %v1054_v62, %v1053_v20  ;;  %vm7629_vm1 = vmand %vm3748_vm15, %vm3764_vm10 }
 0x15b   : > { %v5891_v61 = vpop.f32.mrf.mxu0  ;;  %v1070_v31 = vpack.c.bf16 %v1056_v22, %v1055_v13  ;;  %v7486_v13 = vpop.permute.xlu1 %1564  ;;  %vm9425_vm11 = vcmp.eq.s32.totalorder %v7428_v27, 1 }
 0x15c   : > { %1860 = vrot.lane.b32.xlu1 %v784_v59, %s6730_s7  ;;  %v874_v24 = vrot.slane %v7402_v58, 7  ;;  %v7424_v26 = vmax.f32 %v784_v59, 0.0  ;;  %v805_v7 = vadd.f32 %v5891_v61, %v7326_v19  ;;  %v1256_v41 = vpack.c.bf16 %v7402_v58, %v7405_v60  ;;  %5905 = vmatprep.mubr.msk.bf16.mxu1 %vm1109_vm8, %v1069_v6  ;;  %9606 = vst [vmem:[#allocation36_spill] sm:$0xff] %v7486_v13 }
 0x15d   : > { %1862 = vrot.lane.b32.xlu0 %v789_v48, %s6730_s7  ;;  %v796_v11 = vpop.f32.mrf.mxu0  ;;  %5906 = vmatmul.mubr.msk.bf16.vlgmr.msra.gmra.mxu1 %vm1109_vm8, %v1070_v31  ;;  %v869_v50 = vsel %vm9443_vm3, %v866_v37, %v868_v16  ;;  %vm9430_vm10 = vcmp.eq.s32.totalorder %v7486_v13, 1 }
 0x15e   : > { %v797_v30 = vadd.f32 %v7326_v19, %v796_v11  ;;  %v870_v43 = vrot.slane %v7424_v26, 7  ;;  %v1255_v47 = vpack.c.bf16 %v7424_v26, %v7385_v52  ;;  %v7449_v23 = vmax.f32 %v805_v7, 0.0  ;;  %5946 = vmatpush3.bf16.msra.mxu1 %v7303_v63  ;;  %v7496_v11 = vpop.permute.xlu0 %1561 }
 0x15f   : > { %v5892_v45 = vpop.f32.mrf.mxu0  ;;  %v875_v56 = vsel %vm9443_vm3, %v872_v39, %v874_v24  ;;  %5947 = vmatprep.subr.bf16.mxu1 %v6385_v15  ;;  %v1057_v22 = vsel %vm9413_vm7, %v869_v50, 0.0  ;;  %9607 = vst [vmem:[#allocation37_spill] sm:$0xff] %v7496_v11  ;;  %vm3765_vm7 = vcmp.lt.s32.totalorder %v7432_v35, 8 }
 0x160   : > { %v7451_v48 = vmax.f32 %v797_v30, 0.0  ;;  %v7455_v49 = vadd.f32 %v5892_v45, %v7326_v19  ;;  %1864 = vrot.lane.b32.xlu1 %v792_v53, %s6730_s7  ;;  %5933 = vmatprep.mubr.msk.bf16.mxu0 %vm1109_vm8, %v1255_v47  ;;  %v871_v54 = vsel %vm9443_vm3, %v868_v16, %v870_v43  ;;  %v873_v55 = vsel %vm9443_vm3, %v870_v43, %v872_v39 }
 0x161   : > { %v799_v46 = vpop.f32.mrf.mxu0  ;;  %1866 = vrot.lane.b32.xlu0 %v797_v30, %s6730_s7  ;;  %5934 = vmatmul.mubr.msk.bf16.gmra.mxu0 %vm1109_vm8, %v1256_v41  ;;  %v1058_v61 = vsel %vm9412_vm13, %v871_v54, 0.0  ;;  %v1059_v62 = vsel %vm9411_vm5, %v873_v55, 0.0  ;;  %v880_v16 = vrot.slane %v7449_v23, 7  ;;  %v1060_v6 = vsel %vm9410_vm12, %v875_v56, 0.0 }
 0x162   : > { %v876_v53 = vrot.slane %v7451_v48, 7  ;;  %v7472_v37 = vmax.f32 %v7455_v49, 0.0  ;;  %v800_v63 = vadd.f32 %v7326_v19, %v799_v46  ;;  %v1071_v39 = vpack.c.bf16 %v1058_v61, %v1057_v22  ;;  %5948 = vmatpush3.bf16.msra.mxu1 %v6385_v15 }
 0x163   : > { %v5895_v59 = vpop.f32.mrf.mxu0  ;;  %v1072_v43 = vpack.c.bf16 %v1060_v6, %v1059_v62  ;;  %5949 = vmatprep.subr.bf16.mxu1 %v6386_v57  ;;  %vm9416_vm12 = vcmp.eq.s32.totalorder %v7329_v21, 1  ;;  %vm9417_vm5 = vcmp.eq.s32.totalorder %v7350_v32, 1  ;;  %vm3749_vm13 = vcmp.ge.s32.totalorder %v7432_v35, 0  ;;  %v7659_v35 = vld [vmem:[%s9383_s1 + $0x48] sm:$0xff] }
 0x164   : > { %v7489_v20 = vmax.f32 %v800_v63, 0.0  ;;  %1868 = vrot.lane.b32.xlu1 %v800_v63, %s6730_s7  ;;  %v882_v30 = vrot.slane %v7472_v37, 7  ;;  %v7500_v31 = vadd.f32 %v5895_v59, %v7326_v19  ;;  %v877_v46 = vsel %vm9443_vm3, %v874_v24, %v876_v53  ;;  %5909 = vmatprep.mubr.msk.bf16.mxu1 %vm1109_vm8, %v1071_v39  ;;  %v6387_v24 = vld [vmem:[%s9386_s4 + $0x40] sm:$0xff]  }
 0x165   : > { %v812_v41 = vpop.f32.mrf.mxu0  ;;  %1870 = vrot.lane.b32.xlu0 %v805_v7, %s6730_s7  ;;  %v1258_v7 = vpack.c.bf16 %v7472_v37, %v7449_v23  ;;  %5910 = vmatmul.mubr.msk.bf16.gmra.mxu1 %vm1109_vm8, %v1072_v43  ;;  %v1061_v62 = vsel %vm9416_vm12, %v877_v46, 0.0  ;;  %v7554_v43 = vpop.permute.xlu1 %1570  ;;  %vm3766_vm12 = vcmp.lt.s32.totalorder %v7435_v18, 8  ;;  %v7568_v46 = vld [vmem:[%s9383_s1 + $0x38] sm:$0xff] }
 0x166   : > { %v878_v45 = vrot.slane %v7489_v20, 7  ;;  %v813_v47 = vadd.f32 %v7326_v19, %v812_v41  ;;  %v1257_v50 = vpack.c.bf16 %v7489_v20, %v7451_v48  ;;  %v7534_v59 = vmax.f32 %v7500_v31, 0.0  ;;  %5950 = vmatpush3.bf16.msra.mxu1 %v6386_v57  ;;  %9608 = vst [vmem:[#allocation38_spill] sm:$0xff] %v7554_v43  ;;  %vm7652_vm9 = vmand %vm3750_vm14, %vm3766_vm12 }
 0x167   : > { %v5896_v15 = vpop.f32.mrf.mxu0  ;;  %v1433_v57 = vrot.slane %v7354_v36, 1  ;;  %5951 = vmatprep.subr.bf16.mxu1 %v6387_v24  ;;  %v1432_v36 = vrot.slane %v7335_v5, 1  ;;  %vm9428_vm12 = vcmp.eq.s32.totalorder %v7554_v43, 1 }
 0x168   : > { %v7525_v54 = vmax.f32 %v813_v47, 0.0  ;;  %v824_v55 = vadd.f32 %v5896_v15, %v7326_v19  ;;  %5937 = vmatprep.mubr.msk.bf16.mxu0 %vm1109_vm8, %v1257_v50  ;;  %v879_v56 = vsel %vm9443_vm3, %v876_v53, %v878_v45  ;;  %v881_v63 = vsel %vm9443_vm3, %v878_v45, %v880_v16  ;;  %1872 = vrot.lane.b32.xlu1 %v7455_v49, %s6730_s7  ;;  %v7556_v45 = vpop.permute.xlu0 %1567 }
 0x169   : > { %v815_v61 = vpop.f32.mrf.mxu0  ;;  %v1062_v22 = vsel %vm9415_vm4, %v879_v56, 0.0  ;;  %v883_v53 = vsel %vm9443_vm3, %v880_v16, %v882_v30  ;;  %1874 = vrot.lane.b32.xlu0 %v813_v47, %s6730_s7  ;;  %5938 = vmatmul.mubr.msk.bf16.gmra.mxu0 %vm1109_vm8, %v1258_v7  ;;  %v1063_v41 = vsel %vm9417_vm5, %v881_v63, 0.0  ;;  %vm9418_vm4 = vcmp.eq.s32.totalorder %v7341_v28, 1  ;;  %9609 = vst [vmem:[#allocation39_spill] sm:$0xff] %v7556_v45  ;;  %v7578_v56 = vld [vmem:[%s9383_s1 + $0x40] sm:$0xff] }
 0x16a   : > { %v884_v6 = vrot.slane %v7525_v54, 7  ;;  %v7546_v39 = vmax.f32 %v824_v55, 0.0  ;;  %v816_v49 = vadd.f32 %v7326_v19, %v815_v61  ;;  %v1073_v16 = vpack.c.bf16 %v1062_v22, %v1061_v62  ;;  %5952 = vmatpush3.bf16.msra.mxu1 %v6387_v24 }
 0x16b   : > { %v1064_v50 = vsel %vm9418_vm4, %v883_v53, 0.0  ;;  %v3735_v7 = vadd.s32 2, %v7568_v46  ;;  %vm9422_vm5 = vcmp.eq.s32.totalorder %v7383_v51, 1  ;;  %v7581_v63 = vadd.s32 2, %v7578_v56 }
 0x16c   : > { %v890_v47 = vrot.slane %v7546_v39, 7  ;;  %v7561_v19 = vmax.f32 %v816_v49, 0.0  ;;  %1876 = vrot.lane.b32.xlu1 %v816_v49, %s6730_s7  ;;  %5913 = vmatprep.mubr.msk.bf16.mxu1 %vm1109_vm8, %v1073_v16  ;;  %v1074_v15 = vpack.c.bf16 %v1064_v50, %v1063_v41  ;;  %v888_v61 = vrot.slane %v7534_v59, 7  ;;  %v7611_v50 = vpop.permute.xlu1 %1576 }
 0x16d   : > { %1878 = vrot.lane.b32.xlu0 %v7500_v31, %s6730_s7  ;;  %v885_v22 = vsel %vm9443_vm3, %v882_v30, %v884_v6  ;;  %vm9423_vm4 = vcmp.eq.s32.totalorder %v7390_v42, 1  ;;  %v1435_v53 = vrot.slane %v7352_v33, 1  ;;  %v1260_v49 = vpack.c.bf16 %v7546_v39, %v7534_v59  ;;  %9612 = vst [vmem:[#allocation40_spill] sm:$0xff] %v7611_v50  ;;  %v7735_v33 = vld [vmem:[%s9383_s1 + $0x60] sm:$0xff] }
 0x16e   : > { %v886_v62 = vrot.slane %v7561_v19, 7  ;;  %v1259_v5 = vpack.c.bf16 %v7561_v19, %v7525_v54  ;;  %v1434_v41 = vsel %vm9440_vm6, %v1432_v36, %v1433_v57  ;;  %5914 = vmatmul.mubr.msk.bf16.gmra.mxu1 %vm1109_vm8, %v1074_v15  ;;  %v891_v24 = vsel %vm9443_vm3, %v888_v61, %v890_v47  ;;  %v7613_v36 = vpop.permute.xlu0 %1573 }
 0x16f   : > { %9613 = vst [vmem:[#allocation41_spill] sm:$0xff] %v7613_v36  ;;  %v1436_v14 = vsel %vm9440_vm6, %v1433_v57, %v1435_v53  ;;  %vm3767_vm15 = vcmp.lt.s32.totalorder %v3735_v7, 8  ;;  %v3798_v16 = vsel %vm7652_vm9, 1, %v9444_v0 }
 0x170   : > { %5941 = vmatprep.mubr.msk.bf16.mxu0 %vm1109_vm8, %v1259_v5  ;;  %v887_v31 = vsel %vm9443_vm3, %v884_v6, %v886_v62  ;;  %v889_v30 = vsel %vm9443_vm3, %v886_v62, %v888_v61  ;;  %1880 = vrot.lane.b32.xlu1 %v824_v55, %s6730_s7  ;;  %v1065_v6 = vsel %vm9423_vm4, %v885_v22, 0.0  ;;  %vm9439_vm4 = vcmp.eq.s32.totalorder %v7496_v11, 1 }
 0x171   : > { %v1066_v47 = vsel %vm9422_vm5, %v887_v31, 0.0  ;;  %v1067_v15 = vsel %vm9421_vm0, %v889_v30, 0.0  ;;  %3809 = vperm.xlu0 %6365, %v7363_v40   ;;  %5942 = vmatmul.mubr.msk.bf16.gmra.mxu0 %vm1109_vm8, %v1260_v49  ;;  %vm7640_vm0 = vmand %vm3749_vm13, %vm3765_vm7  ;;  %vm3751_vm5 = vcmp.ge.s32.totalorder %v3735_v7, 0  ;;  %v1068_v40 = vsel %vm9425_vm11, %v891_v24, 0.0 }
 0x172   : > { %v1075_v55 = vpack.c.bf16 %v1066_v47, %v1065_v6  ;;  %v3737_v62 = vadd.s32 2, %v7659_v35  ;;  %2038 = vmatprep.mubr.bf16.mxu0 %v9444_v0  ;;  %v1439_v5 = vrot.slane %v7385_v52, 1  ;;  %v1076_v22 = vpack.c.bf16 %v1068_v40, %v1067_v15  ;;  %vm7676_vm14 = vmand %vm3751_vm5, %vm3767_vm15  ;;  %v7697_v6 = vpop.permute.xlu1 %1582  ;;  %v7699_v47 = vpop.permute.xlu0 %1579 }
 0x173   : > { %v1624_v18 = vsel %vm9439_vm4, %v1434_v41, 0.0  ;;  %v1625_v49 = vsel %vm9430_vm10, %v1436_v14, 0.0  ;;  %v1441_v31 = vrot.slane %v7424_v26, 1  ;;  %v3795_v30 = vsel %vm7607_vm2, 1, %v9444_v0  ;;  %v7683_v41 = vld [vmem:[%s9383_s1 + $0x50] sm:$0xff]  ;;  %9622 = vst [vmem:[#allocation42_spill] sm:$0xff] %v7697_v6 }
 0x174   : > { %5917 = vmatprep.mubr.msk.bf16.mxu1 %vm1109_vm8, %v1075_v55  ;;  %3812 = vperm.xlu1 %6366, %v7371_v44   ;;  %v3738_v24 = vadd.s32 2, %v7683_v41  ;;  %v1437_v26 = vrot.slane %v7343_v29, 1  ;;  %v3796_v44 = vsel %vm7629_vm1, 1, %v9444_v0  ;;  %v3797_v7 = vsel %vm7640_vm0, 1, %v9444_v0  ;;  %9623 = vst [vmem:[#allocation43_spill] sm:$0xff] %v7699_v47 }
 0x175   : > { %3815 = vperm.xlu0 %6365, %v7374_v34   ;;  %v1443_v29 = vrot.slane %v7405_v60, 1  ;;  %v1640_v15 = vpack.c.bf16 %v1625_v49, %v1624_v18  ;;  %vm3752_vm2 = vcmp.ge.s32.totalorder %v7581_v63, 0  ;;  %vm3768_vm13 = vcmp.lt.s32.totalorder %v7581_v63, 8 }
 0x176   : > { %v1440_v34 = vsel %vm9440_vm6, %v1437_v26, %v1439_v5  ;;  %5918 = vmatmul.mubr.msk.bf16.gmra.mxu1 %vm1109_vm8, %v1076_v22  ;;  %v3799_v14 = vsel %vm7676_vm14, 1, %v9444_v0  ;;  %vm3753_vm9 = vcmp.ge.s32.totalorder %v3737_v62, 0  ;;  %vm3769_vm0 = vcmp.lt.s32.totalorder %v3737_v62, 8  ;;  %vm7722_vm1 = vmand %vm3752_vm2, %vm3768_vm13  ;;  %v7745_v22 = vld [vmem:[%s9383_s1 + $0x68] sm:$0xff]  ;;  %v7754_v52 = vpop.permute.xlu1 %1588 }
 0x177   : > { %5953 = vmatprep.mubr.msk.bf16.mxu1 %vm1109_vm8, %v1640_v15  ;;  %v1442_v61 = vsel %vm9440_vm6, %v1439_v5, %v1441_v31  ;;  %v1444_v55 = vsel %vm9440_vm6, %v1441_v31, %v1443_v29  ;;  %vm3754_vm5 = vcmp.ge.s32.totalorder %v3738_v24, 0  ;;  %vm3770_vm7 = vcmp.lt.s32.totalorder %v3738_v24, 8  ;;  %9626 = vst [vmem:[#allocation44_spill] sm:$0xff] %v7754_v52  ;;  %vm3785_vm13 = vmand %vm3753_vm9, %vm3769_vm0 }
 0x178   : > { %3818 = vperm.xlu1 %6366, %v3795_v30   ;;  %v1438_v57 = vsel %vm9440_vm6, %v1435_v53, %v1437_v26  ;;  %v3739_v5 = vadd.s32 2, %v7729_v25  ;;  %v3740_v53 = vadd.s32 2, %v7735_v33  ;;  %vm9426_vm15 = vcmp.eq.s32.totalorder %v7611_v50, 1  ;;  %v7756_v26 = vpop.permute.xlu0 %1585 }
 0x179   : > { %3821 = vperm.xlu0 %6365, %v3796_v44   ;;  %vm9427_vm14 = vcmp.eq.s32.totalorder %v7613_v36, 1  ;;  %v1627_v63 = vsel %vm9428_vm12, %v1440_v34, 0.0  ;;  %v3741_v18 = vadd.s32 2, %v7745_v22  ;;  %vm9429_vm2 = vcmp.eq.s32.totalorder %v7556_v45, 1  ;;  %9627 = vst [vmem:[#allocation45_spill] sm:$0xff] %v7756_v26  ;;  %v7769_v34 = vld [vmem:[%s9383_s1 + $0x70] sm:$0xff] }
 0x17a   : > { %v1447_v49 = vrot.slane %v7451_v48, 1  ;;  %v1628_v31 = vsel %vm9427_vm14, %v1442_v61, 0.0  ;;  %v1629_v30 = vsel %vm9426_vm15, %v1444_v55, 0.0  ;;  %v1626_v44 = vsel %vm9429_vm2, %v1438_v57, 0.0  ;;  %v7815_v60 = vpop.permute.xlu1 %1594 }
 0x17b   : > { %v1449_v15 = vrot.slane %v7489_v20, 1  ;;  %v3800_v48 = vsel %vm7722_vm1, 1, %v9444_v0  ;;  %v3742_v61 = vadd.s32 2, %v7769_v34  ;;  %v1641_v55 = vpack.c.bf16 %v1627_v63, %v1626_v44  ;;  %vm7776_vm1 = vmand %vm3754_vm5, %vm3770_vm7  ;;  %9634 = vst [vmem:[#allocation46_spill] sm:$0xff] %v7815_v60 }
 0x17c   : > { %3824 = vperm.xlu1 %6366, %v3797_v7   ;;  %v1445_v57 = vrot.slane %v7402_v58, 1  ;;  %vm3755_vm11 = vcmp.ge.s32.totalorder %v3739_v5, 0  ;;  %vm3771_vm15 = vcmp.lt.s32.totalorder %v3739_v5, 8  ;;  %v1451_v20 = vrot.slane %v7449_v23, 1 }
 0x17d   : > { %3827 = vperm.xlu0 %6365, %v3798_v16   ;;  %v1642_v7 = vpack.c.bf16 %v1629_v30, %v1628_v31  ;;  %vm3756_vm9 = vcmp.ge.s32.totalorder %v3740_v53, 0  ;;  %vm3772_vm0 = vcmp.lt.s32.totalorder %v3740_v53, 8  ;;  %v3801_v40 = vsel %vm3785_vm13, 1, %v9444_v0  ;;  %vm7790_vm5 = vmand %vm3755_vm11, %vm3771_vm15  ;;  %v7810_v31 = vld [vmem:[%s9383_s1 + $0x78] sm:$0xff] }
 0x17e   : > { %5954 = vmatmul.mubr.msk.bf16.vlgmr.msra.gmra.mxu1 %vm1109_vm8, %v1641_v55  ;;  %v1448_v58 = vsel %vm9440_vm6, %v1445_v57, %v1447_v49  ;;  %vm3757_vm14 = vcmp.ge.s32.totalorder %v3741_v18, 0  ;;  %vm3773_vm12 = vcmp.lt.s32.totalorder %v3741_v18, 8  ;;  %v1450_v16 = vsel %vm9440_vm6, %v1447_v49, %v1449_v15  ;;  %vm7803_vm10 = vmand %vm3756_vm9, %vm3772_vm0  ;;  %v7858_v5 = vpop.permute.xlu1 %1600 }
 0x17f   : > { %5957 = vmatprep.mubr.msk.bf16.mxu1 %vm1109_vm8, %v1642_v7  ;;  %v1452_v24 = vsel %vm9440_vm6, %v1449_v15, %v1451_v20  ;;  %vm3758_vm7 = vcmp.ge.s32.totalorder %v3742_v61, 0  ;;  %vm3774_vm13 = vcmp.lt.s32.totalorder %v3742_v61, 8  ;;  %vm9433_vm2 = vcmp.eq.s32.totalorder %v7697_v6, 1  ;;  %v6453_v15 = vld [vmem:[%s9383_s1] sm:$0xff]  ;;  %9638 = vst [vmem:[#allocation48_spill] sm:$0xff] %v7858_v5 }
 0x180   : > { %3830 = vperm.xlu1 %6366, %v3799_v14   ;;  %v3802_v14 = vsel %vm7776_vm1, 1, %v9444_v0  ;;  %v1446_v49 = vsel %vm9440_vm6, %v1443_v29, %v1445_v57  ;;  %v3743_v30 = vadd.s32 2, %v7810_v31  ;;  %vm9431_vm11 = vcmp.eq.s32.totalorder %v7754_v52, 1  ;;  %v7817_v29 = vpop.permute.xlu0 %1591  ;;  %vm7823_vm1 = vmand %vm3757_vm14, %vm3773_vm12 }
 0x181   : > { %3833 = vperm.xlu0 %6365, %v3800_v48   ;;  %vm9432_vm15 = vcmp.eq.s32.totalorder %v7756_v26, 1  ;;  %9635 = vst [vmem:[#allocation47_spill] sm:$0xff] %v7817_v29  ;;  %v1631_v53 = vsel %vm9433_vm2, %v1448_v58, 0.0  ;;  %v4518_v48 = vadd.s32 4, %v6453_v15  ;;  %vm9438_vm9 = vcmp.eq.s32.totalorder %v7699_v47, 1  ;;  %vm3790_vm12 = vmand %vm3758_vm7, %vm3774_vm13 }
 0x182   : > { %v1455_v55 = vrot.slane %v7525_v54, 1  ;;  %v1632_v57 = vsel %vm9432_vm15, %v1450_v16, 0.0  ;;  %v1633_v7 = vsel %vm9431_vm11, %v1452_v24, 0.0  ;;  %v1457_v18 = vrot.slane %v7561_v19, 1  ;;  %v6454_v19 = vld [vmem:[%s9383_s1 + $0x8] sm:$0xff] }
 0x183   : > { %v1630_v62 = vsel %vm9438_vm9, %v1446_v49, 0.0  ;;  %v3803_v58 = vsel %vm7790_vm5, 1, %v9444_v0  ;;  %v1453_v54 = vrot.slane %v7472_v37, 1  ;;  %v3804_v24 = vsel %vm7803_vm10, 1, %v9444_v0 }
 0x184   : > { %3836 = vperm.xlu1 %6366, %v3801_v40   ;;  %v1643_v16 = vpack.c.bf16 %v1631_v53, %v1630_v62  ;;  %v4519_v61 = vadd.s32 4, %v6454_v19  ;;  %v1459_v40 = vrot.slane %v7534_v59, 1  ;;  %v1644_v49 = vpack.c.bf16 %v1633_v7, %v1632_v57  ;;  %v7860_v53 = vpop.permute.xlu0 %1597  ;;  %v6455_v57 = vld [vmem:[%s9383_s1 + $0x10] sm:$0xff] }
 0x185   : > { %3839 = vperm.xlu0 %6365, %v3802_v14   ;;  %v3805_v63 = vsel %vm7823_vm1, 1, %v9444_v0  ;;  %v3806_v37 = vsel %vm3790_vm12, 1, %v9444_v0  ;;  %v1456_v14 = vsel %vm9440_vm6, %v1453_v54, %v1455_v55  ;;  %vm3759_vm14 = vcmp.ge.s32.totalorder %v3743_v30, 0  ;;  %9639 = vst [vmem:[#allocation49_spill] sm:$0xff] %v7860_v53 }
 0x186   : > { %5958 = vmatmul.mubr.msk.bf16.gmra.mxu1 %vm1109_vm8, %v1643_v16  ;;  %vm3775_vm10 = vcmp.lt.s32.totalorder %v3743_v30, 8  ;;  %vm4534_vm0 = vcmp.ge.s32.totalorder %v4518_v48, 0  ;;  %v1458_v59 = vsel %vm9440_vm6, %v1455_v55, %v1457_v18  ;;  %v1460_v44 = vsel %vm9440_vm6, %v1457_v18, %v1459_v40  ;;  %v6456_v18 = vld [vmem:[%s9383_s1 + $0x18] sm:$0xff] }
 0x187   : > { %5961 = vmatprep.mubr.msk.bf16.mxu1 %vm1109_vm8, %v1644_v49  ;;  %vm4550_vm5 = vcmp.lt.s32.totalorder %v4518_v48, 8  ;;  %v4520_v7 = vadd.s32 4, %v6455_v57  ;;  %vm9434_vm7 = vcmp.eq.s32.totalorder %v7815_v60, 1  ;;  %v1454_v62 = vsel %vm9440_vm6, %v1451_v20, %v1453_v54  ;;  %vm3791_vm15 = vmand %vm3759_vm14, %vm3775_vm10  ;;  %v7892_v49 = vpop.permute.xlu1 %1606 }
 0x188   : > { %3842 = vperm.xlu1 %6366, %v3803_v58   ;;  %vm4535_vm13 = vcmp.ge.s32.totalorder %v4519_v61, 0  ;;  %vm4551_vm1 = vcmp.lt.s32.totalorder %v4519_v61, 8  ;;  %vm9435_vm12 = vcmp.eq.s32.totalorder %v7858_v5, 1  ;;  %vm9436_vm11 = vcmp.eq.s32.totalorder %v7860_v53, 1  ;;  %9640 = vst [vmem:[#allocation50_spill] sm:$0xff] %v7892_v49 }
 0x189   : > { %3845 = vperm.xlu0 %6365, %v3804_v24   ;;  %v1635_v55 = vsel %vm9434_vm7, %v1456_v14, 0.0  ;;  %v4521_v58 = vadd.s32 4, %v6456_v18  ;;  %vm9437_vm2 = vcmp.eq.s32.totalorder %v7817_v29, 1  ;;  %v1461_v23 = vrot.slane %v7546_v39, 1  ;;  %vm4566_vm7 = vmand %vm4534_vm0, %vm4550_vm5  ;;  %v7894_v14 = vpop.permute.xlu0 %1603 }
 0x18a   : > { %v1636_v20 = vsel %vm9436_vm11, %v1458_v59, 0.0  ;;  %v1637_v54 = vsel %vm9435_vm12, %v1460_v44, 0.0  ;;  %v1634_v30 = vsel %vm9437_vm2, %v1454_v62, 0.0  ;;  %vm4536_vm14 = vcmp.ge.s32.totalorder %v4520_v7, 0  ;;  %9641 = vst [vmem:[#allocation51_spill] sm:$0xff] %v7894_v14  ;;  %vm7899_vm0 = vmand %vm4535_vm13, %vm4551_vm1 }
 0x18b   : > { %vm4552_vm10 = vcmp.lt.s32.totalorder %v4520_v7, 8  ;;  %v4889_v16 = vadd.s32 6, %v6453_v15  ;;  %v1645_v24 = vpack.c.bf16 %v1635_v55, %v1634_v30  ;;  %v3807_v39 = vsel %vm3791_vm15, 1, %v9444_v0  ;;  %v6457_v55 = vld [vmem:[%s9383_s1 + $0x20] sm:$0xff] }
 0x18c   : > { %3848 = vperm.xlu1 %6366, %v3805_v63   ;;  %v1646_v59 = vpack.c.bf16 %v1637_v54, %v1636_v20  ;;  %v4582_v44 = vsel %vm4566_vm7, 1, %v9444_v0  ;;  %vm4537_vm5 = vcmp.ge.s32.totalorder %v4521_v58, 0  ;;  %v1479_v15 = vsel %vm9440_vm6, %v1461_v23, 0.0  ;;  %vm4568_vm12 = vmand %vm4536_vm14, %vm4552_vm10 }
 0x18d   : > { %3851 = vperm.xlu0 %6365, %v3806_v37   ;;  %v1462_v63 = vsel %vm9440_vm6, %v1459_v40, %v1461_v23  ;;  %vm4553_vm15 = vcmp.lt.s32.totalorder %v4521_v58, 8  ;;  %v4890_v37 = vadd.s32 6, %v6454_v19  ;;  %vm4905_vm7 = vcmp.ge.s32.totalorder %v4889_v16, 0 }
 0x18e   : > { %5962 = vmatmul.mubr.msk.bf16.gmra.mxu1 %vm1109_vm8, %v1645_v24  ;;  %vm4921_vm11 = vcmp.lt.s32.totalorder %v4889_v16, 8  ;;  %v4891_v61 = vadd.s32 6, %v6455_v57  ;;  %vm9441_vm13 = vcmp.eq.s32.totalorder %v7892_v49, 1  ;;  %vm9442_vm1 = vcmp.eq.s32.totalorder %v7894_v14, 1  ;;  %vm4569_vm14 = vmand %vm4537_vm5, %vm4553_vm15  ;;  %v6459_v16 = vld [vmem:[%s9383_s1 + $0x30] sm:$0xff] }
 0x18f   : > { %5965 = vmatprep.mubr.msk.bf16.mxu1 %vm1109_vm8, %v1646_v59  ;;  %v4583_v7 = vsel %vm7899_vm0, 1, %v9444_v0  ;;  %v4584_v62 = vsel %vm4568_vm12, 1, %v9444_v0  ;;  %v1638_v19 = vsel %vm9442_vm1, %v1462_v63, 0.0  ;;  %v1639_v40 = vsel %vm9441_vm13, %v1479_v15, 0.0  ;;  %vm4937_vm10 = vmand %vm4905_vm7, %vm4921_vm11 }
 0x190   : > { %3854 = vperm.xlu1 %6366, %v3807_v39   ;;  %vm4906_vm2 = vcmp.ge.s32.totalorder %v4890_v37, 0  ;;  %vm4922_vm9 = vcmp.lt.s32.totalorder %v4890_v37, 8  ;;  %v4892_v57 = vadd.s32 6, %v6456_v18  ;;  %vm4907_vm4 = vcmp.ge.s32.totalorder %v4891_v61, 0  ;;  %v6458_v18 = vld [vmem:[%s9383_s1 + $0x28] sm:$0xff] }
 0x191   : > { %4599 = vperm.xlu0 %6365, %v4582_v44   ;;  %vm4923_vm6 = vcmp.lt.s32.totalorder %v4891_v61, 8  ;;  %v4522_v23 = vadd.s32 4, %v6457_v55  ;;  %v1647_v20 = vpack.c.bf16 %v1639_v40, %v1638_v19  ;;  %v4585_v54 = vsel %vm4569_vm14, 1, %v9444_v0  ;;  %vm4938_vm12 = vmand %vm4906_vm2, %vm4922_vm9 }
 0x192   : > { %v4953_v30 = vsel %vm4937_vm10, 1, %v9444_v0  ;;  %vm4939_vm11 = vmand %vm4907_vm4, %vm4923_vm6  ;;  %vm4908_vm0 = vcmp.ge.s32.totalorder %v4892_v57, 0  ;;  %vm4924_vm5 = vcmp.lt.s32.totalorder %v4892_v57, 8  ;;  %v4523_v58 = vadd.s32 4, %v6458_v18 }
 0x193   : > { %vm4538_vm15 = vcmp.ge.s32.totalorder %v4522_v23, 0  ;;  %vm4554_vm7 = vcmp.lt.s32.totalorder %v4522_v23, 8  ;;  %v4524_v24 = vadd.s32 4, %v6459_v16  ;;  %v4954_v39 = vsel %vm4938_vm12, 1, %v9444_v0  ;;  %vm4940_vm6 = vmand %vm4908_vm0, %vm4924_vm5 }
 0x194   : > { %4602 = vperm.xlu1 %6366, %v4583_v7   ;;  %v4955_v59 = vsel %vm4939_vm11, 1, %v9444_v0  ;;  %vm4570_vm4 = vmand %vm4538_vm15, %vm4554_vm7  ;;  %vm4539_vm2 = vcmp.ge.s32.totalorder %v4523_v58, 0  ;;  %vm4555_vm9 = vcmp.lt.s32.totalorder %v4523_v58, 8  ;;  %v4525_v44 = vadd.s32 4, %v7568_v46  ;;  %v6388_v58 = vld [vmem:[%s9388_s6 + $0x30] ss:$8 sps:$4 sm:$0xff]  }
 0x195   : > { %4605 = vperm.xlu0 %6365, %v4584_v62   ;;  %vm4540_vm14 = vcmp.ge.s32.totalorder %v4524_v24, 0  ;;  %vm4556_vm10 = vcmp.lt.s32.totalorder %v4524_v24, 8  ;;  %v4893_v48 = vadd.s32 6, %v6457_v55  ;;  %v4956_v15 = vsel %vm4940_vm6, 1, %v9444_v0  ;;  %vm4571_vm13 = vmand %vm4539_vm2, %vm4555_vm9 }
 0x196   : > { %5966 = vmatmul.mubr.msk.bf16.gmra.mxu1 %vm1109_vm8, %v1647_v20  ;;  %v4586_v63 = vsel %vm4570_vm4, 1, %v9444_v0  ;;  %vm4572_vm1 = vmand %vm4540_vm14, %vm4556_vm10  ;;  %vm4541_vm12 = vcmp.ge.s32.totalorder %v4525_v44, 0  ;;  %vm4557_vm3 = vcmp.lt.s32.totalorder %v4525_v44, 8  ;;  %v4894_v37 = vadd.s32 6, %v6458_v18 }
 0x197   : > { %vm4909_vm11 = vcmp.ge.s32.totalorder %v4893_v48, 0  ;;  %vm4925_vm0 = vcmp.lt.s32.totalorder %v4893_v48, 8  ;;  %v4895_v61 = vadd.s32 6, %v6459_v16  ;;  %v4587_v7 = vsel %vm4571_vm13, 1, %v9444_v0  ;;  %vm4573_vm5 = vmand %vm4541_vm12, %vm4557_vm3  ;;  %v6390_v16 = vld [vmem:[%s9388_s6 + $0x34] ss:$8 sps:$4 sm:$0xff]  }
 0x198   : > { %4608 = vperm.xlu1 %6366, %v4585_v54   ;;  %v4588_v62 = vsel %vm4572_vm1, 1, %v9444_v0  ;;  %vm4941_vm15 = vmand %vm4909_vm11, %vm4925_vm0  ;;  %vm4910_vm7 = vcmp.ge.s32.totalorder %v4894_v37, 0  ;;  %vm4926_vm6 = vcmp.lt.s32.totalorder %v4894_v37, 8  ;;  %v4896_v19 = vadd.s32 6, %v7568_v46  ;;  %2014 = vmatprep.subr.bf16.mxu0 %v6390_v16 }
 0x199   : > { %4970 = vperm.xlu0 %6365, %v4953_v30   ;;  %vm4911_vm4 = vcmp.ge.s32.totalorder %v4895_v61, 0  ;;  %vm4927_vm2 = vcmp.lt.s32.totalorder %v4895_v61, 8  ;;  %v4526_v40 = vadd.s32 4, %v7578_v56  ;;  %v4589_v57 = vsel %vm4573_vm5, 1, %v9444_v0  ;;  %vm4942_vm9 = vmand %vm4910_vm7, %vm4926_vm6  ;;  %2015 = vmatpush1.bf16.msra.mxu0 %v6388_v58 }
 0x19a   : > { %v4957_v55 = vsel %vm4941_vm15, 1, %v9444_v0  ;;  %vm4943_vm13 = vmand %vm4911_vm4, %vm4927_vm2  ;;  %vm4912_vm14 = vcmp.ge.s32.totalorder %v4896_v19, 0  ;;  %vm4928_vm1 = vcmp.lt.s32.totalorder %v4896_v19, 8  ;;  %v4527_v23 = vadd.s32 4, %v7659_v35 }
 0x19b   : > { %v4528_v20 = vadd.s32 4, %v7683_v41  ;;  %vm4542_vm3 = vcmp.ge.s32.totalorder %v4526_v40, 0  ;;  %vm4558_vm10 = vcmp.lt.s32.totalorder %v4526_v40, 8  ;;  %v4958_v46 = vsel %vm4942_vm9, 1, %v9444_v0  ;;  %vm4944_vm12 = vmand %vm4912_vm14, %vm4928_vm1 }
 0x19c   : > { %4973 = vperm.xlu1 %6366, %v4954_v39   ;;  %v4959_v54 = vsel %vm4943_vm13, 1, %v9444_v0  ;;  %vm4574_vm11 = vmand %vm4542_vm3, %vm4558_vm10  ;;  %vm4543_vm0 = vcmp.ge.s32.totalorder %v4527_v23, 0  ;;  %vm4559_vm5 = vcmp.lt.s32.totalorder %v4527_v23, 8  ;;  %v4529_v30 = vadd.s32 4, %v7729_v25  ;;  %v6396_v23 = vld [vmem:[%s9388_s6 + $0x14] ss:$8 sps:$4 sm:$0xff]  }
 0x19d   : > { %4976 = vperm.xlu0 %6365, %v4955_v59   ;;  %vm4544_vm15 = vcmp.ge.s32.totalorder %v4528_v20, 0  ;;  %vm4560_vm7 = vcmp.lt.s32.totalorder %v4528_v20, 8  ;;  %v4897_v18 = vadd.s32 6, %v7578_v56  ;;  %v4960_v24 = vsel %vm4944_vm12, 1, %v9444_v0  ;;  %vm4575_vm6 = vmand %vm4543_vm0, %vm4559_vm5 }
 0x19e   : > { %v4590_v39 = vsel %vm4574_vm11, 1, %v9444_v0  ;;  %vm4576_vm4 = vmand %vm4544_vm15, %vm4560_vm7  ;;  %vm4545_vm2 = vcmp.ge.s32.totalorder %v4529_v30, 0  ;;  %vm4561_vm9 = vcmp.lt.s32.totalorder %v4529_v30, 8  ;;  %v4898_v56 = vadd.s32 6, %v7659_v35 }
 0x19f   : > { %v4899_v59 = vadd.s32 6, %v7683_v41  ;;  %vm4913_vm13 = vcmp.ge.s32.totalorder %v4897_v18, 0  ;;  %vm4929_vm14 = vcmp.lt.s32.totalorder %v4897_v18, 8  ;;  %v4591_v44 = vsel %vm4575_vm6, 1, %v9444_v0  ;;  %vm4577_vm1 = vmand %vm4545_vm2, %vm4561_vm9  ;;  %v6391_v41 = vld [vmem:[%s9388_s6 + $0x20] ss:$8 sps:$4 sm:$0xff]  }
 0x1a0   : > { %4979 = vperm.xlu1 %6366, %v4956_v15   ;;  %v4592_v48 = vsel %vm4576_vm4, 1, %v9444_v0  ;;  %vm4945_vm3 = vmand %vm4913_vm13, %vm4929_vm14  ;;  %vm4914_vm10 = vcmp.ge.s32.totalorder %v4898_v56, 0  ;;  %vm4930_vm12 = vcmp.lt.s32.totalorder %v4898_v56, 8  ;;  %v4900_v15 = vadd.s32 6, %v7729_v25 }
 0x1a1   : > { %4611 = vperm.xlu0 %6365, %v4586_v63   ;;  %vm4915_vm11 = vcmp.ge.s32.totalorder %v4899_v59, 0  ;;  %vm4931_vm0 = vcmp.lt.s32.totalorder %v4899_v59, 8  ;;  %v4530_v35 = vadd.s32 4, %v7735_v33  ;;  %v6393_v63 = vld [vmem:[%s9388_s6 + $0x24] ss:$8 sps:$4 sm:$0xff]   ;;  %v4593_v37 = vsel %vm4577_vm1, 1, %v9444_v0  ;;  %vm4946_vm5 = vmand %vm4914_vm10, %vm4930_vm12 }
 0x1a2   : > { %v4961_v61 = vsel %vm4945_vm3, 1, %v9444_v0  ;;  %2016 = vmatprep.subr.bf16.mxu0 %v6393_v63  ;;  %vm4947_vm15 = vmand %vm4915_vm11, %vm4931_vm0  ;;  %vm4916_vm7 = vcmp.ge.s32.totalorder %v4900_v15, 0  ;;  %vm4932_vm6 = vcmp.lt.s32.totalorder %v4900_v15, 8  ;;  %v4531_v25 = vadd.s32 4, %v7745_v22  ;;  %v6400_v59 = vld [vmem:[%s9390_s8 + $0x38] sm:$0xff]   ;;  %v6403_v15 = vld [vmem:[%s9390_s8 + $0x28] sm:$0xff]  }
 0x1a3   : > { %2017 = vmatpush1.bf16.msra.mxu0 %v6391_v41  ;;  %vm4546_vm4 = vcmp.ge.s32.totalorder %v4530_v35, 0  ;;  %vm4562_vm2 = vcmp.lt.s32.totalorder %v4530_v35, 8  ;;  %v4963_v19 = vsel %vm4947_vm15, 1, %v9444_v0  ;;  %vm4948_vm9 = vmand %vm4916_vm7, %vm4932_vm6  ;;  %v4533_v40 = vadd.s32 4, %v7810_v31  ;;  %5969 = vmatprep.subr.bf16.mxu1 %v6400_v59 }
 0x1a4   : > { %4614 = vperm.xlu1 %6366, %v4587_v7   ;;  %v4532_v7 = vadd.s32 4, %v7769_v34  ;;  %vm4578_vm13 = vmand %vm4546_vm4, %vm4562_vm2  ;;  %vm4547_vm14 = vcmp.ge.s32.totalorder %v4531_v25, 0  ;;  %vm4563_vm1 = vcmp.lt.s32.totalorder %v4531_v25, 8  ;;  %v4964_v20 = vsel %vm4948_vm9, 1, %v9444_v0  ;;  %2018 = vmatprep.subr.bf16.mxu0 %v6396_v23 }
 0x1a5   : > { %4617 = vperm.xlu0 %6365, %v4588_v62   ;;  %v4962_v62 = vsel %vm4946_vm5, 1, %v9444_v0  ;;  %vm4579_vm12 = vmand %vm4547_vm14, %vm4563_vm1  ;;  %vm4549_vm0 = vcmp.ge.s32.totalorder %v4533_v40, 0  ;;  %vm4565_vm5 = vcmp.lt.s32.totalorder %v4533_v40, 8  ;;  %v4904_v58 = vadd.s32 6, %v7810_v31  ;;  %v6397_v31 = vld [vmem:[%s9388_s6] ss:$8 sps:$4 sm:$0xff]   ;;  %5970 = vmatpush3.bf16.msra.mxu1 %v6400_v59 }
 0x1a6   : > { %vm4548_vm3 = vcmp.ge.s32.totalorder %v4532_v7, 0  ;;  %vm4564_vm10 = vcmp.lt.s32.totalorder %v4532_v7, 8  ;;  %v4595_v30 = vsel %vm4579_vm12, 1, %v9444_v0  ;;  %vm4581_vm6 = vmand %vm4549_vm0, %vm4565_vm5  ;;  %vm9647_vm5 = vcmp.eq.s32.totalorder %v7308_v2, 1 }
 0x1a7   : > { %vm4580_vm11 = vmand %vm4548_vm3, %vm4564_vm10  ;;  %vm4920_vm10 = vcmp.ge.s32.totalorder %v4904_v58, 0  ;;  %vm4936_vm12 = vcmp.lt.s32.totalorder %v4904_v58, 8 }
 0x1a8   : > { %4620 = vperm.xlu1 %6366, %v4589_v57   ;;  %v4901_v57 = vadd.s32 6, %v7735_v33  ;;  %v4902_v33 = vadd.s32 6, %v7745_v22  ;;  %v4596_v18 = vsel %vm4580_vm11, 1, %v9444_v0  ;;  %v4597_v22 = vsel %vm4581_vm6, 1, %v9444_v0  ;;  %vm4952_vm11 = vmand %vm4920_vm10, %vm4936_vm12 }
 0x1a9   : > { %4982 = vperm.xlu0 %6365, %v4957_v55   ;;  %v6394_v55 = vld [vmem:[%s9388_s6 + $0x10] ss:$8 sps:$4 sm:$0xff]   ;;  %v4968_v56 = vsel %vm4952_vm11, 1, %v9444_v0  ;;  %vm9649_vm6 = vcmask 1046528   ;;  %vm9656_vm10 = vcmp.eq.s32.totalorder %v7310_v3, 1 }
 0x1aa   : > { %2019 = vmatpush1.bf16.msra.mxu0 %v6394_v55  ;;  %vm4917_vm15 = vcmp.ge.s32.totalorder %v4901_v57, 0  ;;  %vm4933_vm7 = vcmp.lt.s32.totalorder %v4901_v57, 8  ;;  %vm4918_vm2 = vcmp.ge.s32.totalorder %v4902_v33, 0  ;;  %vm4934_vm9 = vcmp.lt.s32.totalorder %v4902_v33, 8 }
 0x1ab   : > { %vm4949_vm4 = vmand %vm4917_vm15, %vm4933_vm7  ;;  %vm9648_vm15 = vcmp.eq.s32.totalorder %v7312_v4, 1 }
 0x1ac   : > { %4985 = vperm.xlu1 %6366, %v4958_v46   ;;  %v4594_v46 = vsel %vm4578_vm13, 1, %v9444_v0  ;;  %v4965_v16 = vsel %vm4949_vm4, 1, %v9444_v0  ;;  %vm4950_vm1 = vmand %vm4918_vm2, %vm4934_vm9  ;;  %vm9651_vm2 = vcmp.eq.s32.totalorder %v7496_v11, 1  ;;  %vm9652_vm9 = vcmp.eq.s32.totalorder %v7486_v13, 1  ;;  %v9704_v13 = vld [vmem:[#allocation49_spill] sm:$0xff] }
 0x1ad   : > { %4988 = vperm.xlu0 %6365, %v4959_v54   ;;  %v4903_v54 = vadd.s32 6, %v7769_v34  ;;  %v4966_v34 = vsel %vm4950_vm1, 1, %v9444_v0  ;;  %vm5504_vm7 = vmpackc.low %vm9648_vm15, %vm9647_vm5  ;;  %vm9660_vm5 = vcmp.eq.s32.totalorder %v7554_v43, 1 }
 0x1ae   : > { %vm9650_vm4 = vmmov %vm9649_vm6 }
 0x1af   : > { %vm4919_vm13 = vcmp.ge.s32.totalorder %v4903_v54, 0  ;;  %vm4935_vm14 = vcmp.lt.s32.totalorder %v4903_v54, 8  ;;  %vm9657_vm11 = vmmov %vm9650_vm4 }
 0x1b0   : > { %4991 = vperm.xlu1 %6366, %v4960_v24   ;;  %vm4951_vm3 = vmand %vm4919_vm13, %vm4935_vm14 }
 0x1b1   : > { %4623 = vperm.xlu0 %6365, %v4590_v39   ;;  %v4967_v24 = vsel %vm4951_vm3, 1, %v9444_v0  ;;  %v6399_v39 = vld [vmem:[%s9388_s6 + $0x4] ss:$8 sps:$4 sm:$0xff]   ;;  %vm5577_vm13 = vmpackc.low %vm9652_vm9, %vm9651_vm2  ;;  %vm9655_vm3 = vcmp.eq.s32.totalorder %v7306_v1, 1  ;;  %vm9664_vm2 = vcmp.eq.s32.totalorder %v7314_v8, 1 }
 0x1b2   : > { %2020 = vmatprep.subr.bf16.mxu0 %v6399_v39  ;;  %vm5507_vm12 = vmpackc.low %vm9656_vm10, %vm9655_vm3  ;;  %vm9668_vm3 = vcmp.eq.s32.totalorder %v7611_v50, 1 }
 0x1b3   : > { %2021 = vmatpush1.bf16.msra.mxu0 %v6397_v31 }
 0x1b4   : > { %4626 = vperm.xlu1 %6366, %v4591_v44   ;;  %v6401_v44 = vld [vmem:[%s9390_s8 + $0x30] sm:$0xff]  }
 0x1b5   : > { %4629 = vperm.xlu0 %6365, %v4592_v48   ;;  %v8008_v48 = vld [vmem:[%s9390_s8 + $0xb8] sm:$0xff]   ;;  %5971 = vmatprep.subr.bf16.mxu1 %v6401_v44 }
 0x1b6   : > { %6033 = vmatprep.subr.bf16.mxu0 %v8008_v48  ;;  %5972 = vmatpush3.bf16.msra.mxu1 %v6401_v44 }
 0x1b7   : > { %5973 = vmatprep.subr.bf16.mxu1 %v6403_v15 }
 0x1b8   : > { %4632 = vperm.xlu1 %6366, %v4593_v37  }
 0x1b9   : > { %4994 = vperm.xlu0 %6365, %v4961_v61  }
 0x1ba   : > { %5974 = vmatpush3.bf16.msra.mxu1 %v6403_v15 }
 0x1bc   : > { %4997 = vperm.xlu1 %6366, %v4962_v62  }
 0x1bd   : > { %5000 = vperm.xlu0 %6365, %v4963_v19  }
 0x1c0   : > { %5003 = vperm.xlu1 %6366, %v4964_v20  }
 0x1c1   : > { %4635 = vperm.xlu0 %6365, %v4594_v46  }
 0x1c2   : > { %v1851_v51 = vpop.permute.xlu0 %1850 }
 0x1c4   : > { %4638 = vperm.xlu1 %6366, %v4595_v30   ;;  %v8030_v30 = vld [vmem:[#allocation7] ss:$0 sm:$0xff] }
 0x1c5   : > { %4641 = vperm.xlu0 %6365, %v4596_v18  }
 0x1c6   : > { %v1853_v42 = vpop.permute.xlu1 %1852 }
 0x1c8   : > { %4644 = vperm.xlu1 %6366, %v4597_v22  }
 0x1c9   : > { %5006 = vperm.xlu0 %6365, %v4965_v16  }
 0x1cc   : > { %5009 = vperm.xlu1 %6366, %v4966_v34  }
 0x1cd   : > { %5012 = vperm.xlu0 %6365, %v4967_v24  }
 0x1d0   : > { %5015 = vperm.xlu1 %6366, %v4968_v56  }
 0x219   : > { %v5931_v40 = vpop.f32.mrf.mxu0 }
 0x21b   : > { %v1352_v23 = vpop.f32.mrf.mxu0 }
 0x21d   : > { %v5907_v35 = vpop.f32.mrf.mxu1  ;;  %v5932_v33 = vpop.f32.mrf.mxu0 }
 0x21e   : > { %v1239_v0 = vadd.f32 %v5907_v35, %v8030_v30 }
 0x21f   : > { %v1168_v41 = vpop.f32.mrf.mxu1  ;;  %v1355_v22 = vpop.f32.mrf.mxu0 }
 0x220   : > { %v1237_v58 = vadd.f32 %v8030_v30, %v1168_v41  ;;  %v1417_v60 = vadd.f32 %v5931_v40, %v1239_v0 }
 0x221   : > { %v5908_v63 = vpop.f32.mrf.mxu1  ;;  %v5935_v39 = vpop.f32.mrf.mxu0 }
 0x222   : > { %v1415_v31 = vadd.f32 %v1352_v23, %v1237_v58  ;;  %v1240_v59 = vadd.f32 %v5908_v63, %v8030_v30 }
 0x223   : > { %v1171_v37 = vpop.f32.mrf.mxu1  ;;  %v1368_v14 = vpop.f32.mrf.mxu0 }
 0x224   : > { %v1238_v24 = vadd.f32 %v8030_v30, %v1171_v37  ;;  %v1418_v41 = vadd.f32 %v5932_v33, %v1240_v59  ;;  %v1857_v33 = vpop.permute.xlu1 %1856 }
 0x225   : > { %v8014_v61 = vpop.f32.mrf.mxu1  ;;  %v5936_v58 = vpop.f32.mrf.mxu0 }
 0x226   : > { %v1416_v49 = vadd.f32 %v1355_v22, %v1238_v24 }
 0x227   : > { %v1184_v25 = vpop.f32.mrf.mxu1 }
 0x228   : > { %v1241_v22 = vadd.f32 %v8030_v30, %v1184_v25 }
 0x229   : > { %v8016_v7 = vpop.f32.mrf.mxu1 }
 0x22b   : > { %v1187_v62 = vpop.f32.mrf.mxu1 }
 0x22c   : > { %v1242_v63 = vadd.f32 %v8030_v30, %v1187_v62  ;;  %v9644_v62 = vmov 0  }
 0x22e   : > { %v8018_v19 = vpop.f32.mrf.mxu1 }
 0x230   : > { %v8020_v57 = vpop.f32.mrf.mxu1 }
 0x232   : > { %v8022_v55 = vpop.f32.mrf.mxu1 }
 0x234   : > { %v8024_v20 = vpop.f32.mrf.mxu1 }
 0x236   : > { %v8026_v46 = vpop.f32.mrf.mxu1 }
 0x238   : > { %v8028_v54 = vpop.f32.mrf.mxu1 }
 0x23a   : > { %v8032_v18 = vpop.f32.mrf.mxu1 }
 0x23c   : > { %v8035_v16 = vpop.f32.mrf.mxu1 }
 0x23e   : > { %v5955_v34 = vpop.f32.mrf.mxu1 }
 0x240   : > { %v1739_v56 = vpop.f32.mrf.mxu1 }
 0x241   : > { %v1802_v44 = vadd.f32 %v1739_v56, %v1415_v31  ;;  %v1804_v31 = vadd.f32 %v5955_v34, %v1417_v60  ;;  %v1244_v34 = vadd.f32 %v8016_v7, %v8030_v30 }
 0x242   : > { %v5956_v15 = vpop.f32.mrf.mxu1 }
 0x243   : > { %v1818_v38 = vmax.f32 %v1802_v44, 0.0  ;;  %v1805_v37 = vadd.f32 %v5956_v15, %v1418_v41  ;;  %v1820_v40 = vmax.f32 %v1804_v31, 0.0  ;;  %v1243_v41 = vadd.f32 %v8014_v61, %v8030_v30 }
 0x244   : > { %v1742_v27 = vpop.f32.mrf.mxu1  ;;  %v1246_v61 = vadd.f32 %v8030_v30, %v8024_v20 }
 0x245   : > { %v1803_v5 = vadd.f32 %v1742_v27, %v1416_v49  ;;  %v1898_v56 = vadd.f32 %v1851_v51, %v1818_v38  ;;  %v1821_v24 = vmax.f32 %v1805_v37, 0.0  ;;  %v6404_v27 = vld [vmem:[%s9390_s8 + $0xb0] sm:$0xff]   ;;  %v1371_v49 = vpop.f32.mrf.mxu0  ;;  %v1855_v51 = vpop.permute.xlu0 %1854  ;;  %v1419_v38 = vadd.f32 %v1368_v14, %v1241_v22 }
 0x246   : > { %v5959_v53 = vpop.f32.mrf.mxu1  ;;  %v1900_v59 = vadd.f32 %v1855_v51, %v1820_v40  ;;  %v1861_v14 = vpop.permute.xlu1 %1860  ;;  %v1245_v40 = vadd.f32 %v8030_v30, %v8020_v57  ;;  %v1248_v57 = vadd.f32 %v8022_v55, %v8030_v30 }
 0x247   : > { %v1819_v23 = vmax.f32 %v1803_v5, 0.0  ;;  %v1420_v5 = vadd.f32 %v1371_v49, %v1242_v63 }
 0x248   : > { %v1755_v29 = vpop.f32.mrf.mxu1 }
 0x249   : > { %v1899_v28 = vadd.f32 %v1853_v42, %v1819_v23  ;;  %v1901_v42 = vadd.f32 %v1857_v33, %v1821_v24  ;;  %v1806_v15 = vadd.f32 %v1755_v29, %v1419_v38  ;;  %v1859_v22 = vpop.permute.xlu0 %1858  ;;  %v1421_v24 = vadd.f32 %v5935_v39, %v1243_v41 }
 0x24a   : > { %v5960_v35 = vpop.f32.mrf.mxu1  ;;  %v1865_v39 = vpop.permute.xlu1 %1864 }
 0x24b   : > { %v1914_v44 = vpack.c.bf16 %v1899_v28, %v1898_v56  ;;  %v5939_v28 = vpop.f32.mrf.mxu0  ;;  %v1915_v37 = vpack.c.bf16 %v1901_v42, %v1900_v59  ;;  %v1822_v31 = vmax.f32 %v1806_v15, 0.0  ;;  %v1422_v56 = vadd.f32 %v5936_v58, %v1244_v34 }
 0x24c   : > { %v1758_v0 = vpop.f32.mrf.mxu1  ;;  %v1808_v49 = vadd.f32 %v5959_v53, %v1421_v24 }
 0x24d   : > { %5488 = vmatmul.mubr.msk.bf16.vlgmr.msra.gmra.mxu0 %vm1109_vm8, %v1914_v44  ;;  %v1807_v60 = vadd.f32 %v1758_v0, %v1420_v5  ;;  %v1384_v63 = vpop.f32.mrf.mxu0  ;;  %v1809_v7 = vadd.f32 %v5960_v35, %v1422_v56  ;;  %v1902_v0 = vadd.f32 %v1859_v22, %v1822_v31  ;;  %v1863_v35 = vpop.permute.xlu0 %1862 }
 0x24e   : > { %2048 = vmatprep.mubr.bf16.mxu0 %v9644_v62  ;;  %6034 = vmatpush3.bf16.msra.mxu0 %v8008_v48  ;;  %v5963_v25 = vpop.f32.mrf.mxu1  ;;  %v1824_v42 = vmax.f32 %v1808_v49, 0.0  ;;  %v1423_v34 = vadd.f32 %v1384_v63, %v1245_v40  ;;  %v1869_v63 = vpop.permute.xlu1 %1868 }
 0x24f   : > { %6035 = vmatprep.subr.bf16.mxu0 %v6404_v27  ;;  %v1823_v23 = vmax.f32 %v1807_v60, 0.0  ;;  %v5940_v29 = vpop.f32.mrf.mxu0  ;;  %v1825_v58 = vmax.f32 %v1809_v7, 0.0 }
 0x250   : > { %v1771_v48 = vpop.f32.mrf.mxu1  ;;  %v1904_v15 = vadd.f32 %v1863_v35, %v1824_v42  ;;  %v1426_v24 = vadd.f32 %v5940_v29, %v1248_v57 }
 0x251   : > { %v1903_v44 = vadd.f32 %v1861_v14, %v1823_v23  ;;  %v1387_v33 = vpop.f32.mrf.mxu0  ;;  %v1905_v60 = vadd.f32 %v1865_v39, %v1825_v58  ;;  %v1810_v41 = vadd.f32 %v1771_v48, %v1423_v34  ;;  %v1867_v7 = vpop.permute.xlu0 %1866  ;;  %v1249_v58 = vadd.f32 %v8030_v30, %v8028_v54 }
 0x252   : > { %6036 = vmatpush3.bf16.msra.mxu0 %v6404_v27  ;;  %v5964_v27 = vpop.f32.mrf.mxu1  ;;  %v1424_v38 = vadd.f32 %v1387_v33, %v1246_v61  ;;  %v1251_v34 = vadd.f32 %v8026_v46, %v8030_v30 }
 0x253   : > { %v1916_v5 = vpack.c.bf16 %v1903_v44, %v1902_v0  ;;  %v5943_v53 = vpop.f32.mrf.mxu0  ;;  %v1917_v23 = vpack.c.bf16 %v1905_v60, %v1904_v15  ;;  %v1826_v22 = vmax.f32 %v1810_v41, 0.0  ;;  %v1813_v61 = vadd.f32 %v5964_v27, %v1426_v24 }
 0x254   : > { %v1774_v51 = vpop.f32.mrf.mxu1 }
 0x255   : > { %5489 = vmatmul.mubr.msk.bf16.gmra.mxu0 %vm1109_vm8, %v1915_v37  ;;  %v1811_v20 = vadd.f32 %v1774_v51, %v1424_v38  ;;  %v1247_v37 = vadd.f32 %v8018_v19, %v8030_v30  ;;  %v1400_v56 = vpop.f32.mrf.mxu0  ;;  %v1250_v19 = vadd.f32 %v8030_v30, %v8035_v16  ;;  %v1906_v40 = vadd.f32 %v1867_v7, %v1826_v22  ;;  %v1871_v16 = vpop.permute.xlu0 %1870 }
 0x256   : > { %2058 = vmatprep.mubr.bf16.mxu0 %v9644_v62  ;;  %v5967_v59 = vpop.f32.mrf.mxu1  ;;  %v1829_v29 = vmax.f32 %v1813_v61, 0.0  ;;  %v1427_v39 = vadd.f32 %v1400_v56, %v1249_v58  ;;  %v6413_v58 = vld [vmem:[%s9390_s8] sm:$0xff]  }
 0x257   : > { %v1827_v31 = vmax.f32 %v1811_v20, 0.0  ;;  %v1425_v44 = vadd.f32 %v5939_v28, %v1247_v37  ;;  %v5944_v49 = vpop.f32.mrf.mxu0  ;;  %v1873_v28 = vpop.permute.xlu1 %1872 }
 0x258   : > { %v1787_v14 = vpop.f32.mrf.mxu1  ;;  %v1909_v27 = vadd.f32 %v1873_v28, %v1829_v29  ;;  %v6414_v29 = vld [vmem:[%s9390_s8 + $0x88] sm:$0xff]  }
 0x259   : > { %v1907_v55 = vadd.f32 %v1869_v63, %v1827_v31  ;;  %v1812_v0 = vadd.f32 %v5963_v25, %v1425_v44  ;;  %v1403_v33 = vpop.f32.mrf.mxu0  ;;  %v1252_v25 = vadd.f32 %v8032_v18, %v8030_v30  ;;  %v1814_v54 = vadd.f32 %v1787_v14, %v1427_v39  ;;  %v1875_v22 = vpop.permute.xlu0 %1874  ;;  %v8120_v28 = vld [vmem:[#allocation8] sm:$0x3] }
 0x25a   : > { %v5968_v48 = vpop.f32.mrf.mxu1  ;;  %v1428_v38 = vadd.f32 %v1403_v33, %v1250_v19  ;;  %v6410_v19 = vld [vmem:[%s9390_s8 + $0x98] sm:$0xff]  }
 0x25b   : > { %v1828_v42 = vmax.f32 %v1812_v0, 0.0  ;;  %v1830_v15 = vmax.f32 %v1814_v54, 0.0  ;;  %v1430_v41 = vadd.f32 %v5944_v49, %v1252_v25  ;;  %v1877_v37 = vpop.permute.xlu1 %1876  ;;  %v6408_v49 = vld [vmem:[%s9390_s8 + $0xa0] sm:$0xff]   ;;  %v6411_v0 = vld [vmem:[%s9390_s8 + $0x8] sm:$0xff]   ;;  %v6416_v33 = vld [vmem:[%s9390_s8 + $0x78] sm:$0xff]  }
 0x25c   : > { %v1790_v51 = vpop.f32.mrf.mxu1 }
 0x25d   : > { %5490 = vmatmul.mubr.msk.bf16.gmra.mxu0 %vm1109_vm8, %v1916_v5  ;;  %v1918_v5 = vpack.c.bf16 %v1907_v55, %v1906_v40  ;;  %v1815_v35 = vadd.f32 %v1790_v51, %v1428_v38  ;;  %v1908_v60 = vadd.f32 %v1871_v16, %v1828_v42  ;;  %v1817_v31 = vadd.f32 %v5968_v48, %v1430_v41  ;;  %v1879_v44 = vpop.permute.xlu0 %1878  ;;  %v6409_v48 = vld [vmem:[%s9390_s8 + $0x10] sm:$0xff]  }
 0x25e   : > { %2068 = vmatprep.mubr.bf16.mxu0 %v9644_v62  ;;  %v1910_v18 = vadd.f32 %v1875_v22, %v1830_v15  ;;  %v6412_v40 = vld [vmem:[%s9390_s8 + $0x90] sm:$0xff]   ;;  %v1932_v51 = vlaneseq }
 0x25f   : > { %v1919_v20 = vpack.c.bf16 %v1909_v27, %v1908_v60  ;;  %v1831_v57 = vmax.f32 %v1815_v35, 0.0  ;;  %v1833_v63 = vmax.f32 %v1817_v31, 0.0  ;;  %v1881_v46 = vpop.permute.xlu1 %1880 }
 0x260   : > { %v8117_v42 = vshrl.u32 %v1932_v51, 7 }
 0x261   : > { %v1911_v56 = vadd.f32 %v1877_v37, %v1831_v57  ;;  %v1913_v30 = vadd.f32 %v1881_v46, %v1833_v63 }
 0x262   : > { %v1934_v38 = vsub.s32 0, %v8117_v42 }
 0x263   : > { %v1920_v14 = vpack.c.bf16 %v1911_v56, %v1910_v18 }
 0x264   : > { %v8123_v27 = vrot.slane %v8120_v28, %v1934_v38  ;;  %v6417_v38 = vld [vmem:[%s9390_s8 + $0x70] sm:$0xff]  }
 0x265   : > { %5491 = vmatmul.mubr.msk.bf16.gmra.mxu0 %vm1109_vm8, %v1917_v23  ;;  %v1429_v23 = vadd.f32 %v5943_v53, %v1251_v34  ;;  %v6405_v53 = vld [vmem:[%s9390_s8 + $0x20] sm:$0xff]  }
 0x266   : > { %2078 = vmatprep.mubr.bf16.mxu0 %v9644_v62  ;;  %5975 = vmatprep.subr.bf16.mxu1 %v6405_v53 }
 0x267   : > { %v1816_v24 = vadd.f32 %v5967_v59, %v1429_v23  ;;  %v6406_v59 = vld [vmem:[%s9390_s8 + $0xa8] sm:$0xff]   ;;  %5976 = vmatpush3.bf16.msra.mxu1 %v6405_v53 }
 0x268   : > { %6037 = vmatprep.subr.bf16.mxu0 %v6406_v59 }
 0x269   : > { %v1832_v7 = vmax.f32 %v1816_v24, 0.0  ;;  %6038 = vmatpush3.bf16.msra.mxu0 %v6406_v59 }
 0x26a   : > { %6039 = vmatprep.subr.bf16.mxu0 %v6408_v49 }
 0x26b   : > { %v1912_v61 = vadd.f32 %v1879_v44, %v1832_v7 }
 0x26d   : > { %5492 = vmatmul.mubr.msk.bf16.gmra.mxu0 %vm1109_vm8, %v1918_v5  ;;  %v1921_v55 = vpack.c.bf16 %v1913_v30, %v1912_v61  ;;  %v6415_v5 = vld [vmem:[%s9390_s8 + $0x80] sm:$0xff]  }
 0x26e   : > { %2088 = vmatprep.mubr.bf16.mxu0 %v9644_v62  ;;  %6040 = vmatpush3.bf16.msra.mxu0 %v6408_v49 }
 0x26f   : > { %6041 = vmatprep.subr.bf16.mxu0 %v6410_v19 }
 0x272   : > { %6042 = vmatpush3.bf16.msra.mxu0 %v6410_v19 }
 0x273   : > { %6043 = vmatprep.subr.bf16.mxu0 %v6412_v40 }
 0x275   : > { %5493 = vmatmul.mubr.msk.bf16.gmra.mxu0 %vm1109_vm8, %v1919_v20 }
 0x276   : > { %2098 = vmatprep.mubr.bf16.mxu0 %v9644_v62  ;;  %6044 = vmatpush3.bf16.msra.mxu0 %v6412_v40 }
 0x277   : > { %6045 = vmatprep.subr.bf16.mxu0 %v6414_v29 }
 0x27a   : > { %6046 = vmatpush3.bf16.msra.mxu0 %v6414_v29 }
 0x27b   : > { %6047 = vmatprep.subr.bf16.mxu0 %v6415_v5 }
 0x27d   : > { %5494 = vmatmul.mubr.msk.bf16.gmra.mxu0 %vm1109_vm8, %v1920_v14 }
 0x27e   : > { %2108 = vmatprep.mubr.bf16.mxu0 %v9644_v62  ;;  %v6407_v62 = vld [vmem:[%s9390_s8 + $0x18] sm:$0xff]   ;;  %6048 = vmatpush3.bf16.msra.mxu0 %v6415_v5 }
 0x27f   : > { %5977 = vmatprep.subr.bf16.mxu1 %v6407_v62 }
 0x280   : > { %5978 = vmatpush3.bf16.msra.mxu1 %v6407_v62 }
 0x281   : > { %5979 = vmatprep.subr.bf16.mxu1 %v6409_v48 }
 0x284   : > { %5980 = vmatpush3.bf16.msra.mxu1 %v6409_v48 }
 0x285   : > { %5495 = vmatmul.mubr.msk.bf16.gmra.mxu0 %vm1109_vm8, %v1921_v55  ;;  %5981 = vmatprep.subr.bf16.mxu1 %v6411_v0  ;;  %vm9645_vm8 = vcmask 1040384  }
 0x286   : > { %vm9646_vm0 = vmmov %vm9645_vm8 }
 0x287   : > { %vm9653_vm14 = vmmov %vm9646_vm0 }
 0x288   : > { %5982 = vmatpush3.bf16.msra.mxu1 %v6411_v0  ;;  %vm9654_vm1 = vmmov %vm9646_vm0 }
 0x289   : > { %5983 = vmatprep.subr.bf16.mxu1 %v6413_v58 }
 0x28c   : > { %5984 = vmatpush3.bf16.msra.mxu1 %v6413_v58 }
 0x28d   : > { %6001 = vmatprep.subr.bf16.mxu1 %v6416_v33 }
 0x30d   : > { %v2040_v39 = vpop.f32.mrf.mxu0 }
 0x30e   : > { %v2041_v35 = vadd.f32 %v2040_v39, %v8123_v27 }
 0x30f   : > { %v8126_v16 = vpop.f32.mrf.mxu0 }
 0x310   : > { %v8128_v25 = vmax.f32 %v2041_v35, 0.0 }
 0x311   : > { %v2044_v60 = vpop.f32.mrf.mxu0 }
 0x312   : > { %v2045_v54 = vadd.f32 %v2044_v60, %v8123_v27  ;;  %v2152_v20 = vrot.slane %v8128_v25, 7  ;;  %v2593_v14 = vrot.slane %v8128_v25, 1 }
 0x313   : > { %v8131_v34 = vpop.f32.mrf.mxu0 }
 0x314   : > { %v8134_v57 = vmax.f32 %v2045_v54, 0.0  ;;  %v2199_v31 = vsel %vm9645_vm8, 0.0, %v2152_v20  ;;  %vm9658_vm8 = vmmov %vm9650_vm4 }
 0x315   : > { %v2050_v15 = vpop.f32.mrf.mxu0 }
 0x316   : > { %v2153_v41 = vrot.slane %v8134_v57, 7  ;;  %v2051_v37 = vadd.f32 %v2050_v15, %v8123_v27  ;;  %v2594_v56 = vrot.slane %v8134_v57, 1 }
 0x317   : > { %v8138_v23 = vpop.f32.mrf.mxu0 }
 0x318   : > { %v8142_v22 = vmax.f32 %v2051_v37, 0.0  ;;  %v2154_v24 = vsel %vm9646_vm0, %v2152_v20, %v2153_v41  ;;  %v2595_v55 = vsel %vm9649_vm6, %v2593_v14, %v2594_v56  ;;  %vm9659_vm0 = vcmp.eq.s32.totalorder %v7556_v45, 1  ;;  %vm9662_vm6 = vmmov %vm9654_vm1 }
 0x319   : > { %v2054_v18 = vpop.f32.mrf.mxu0  ;;  %v5505_v63 = vpack.c.bf16 %v2154_v24, %v2199_v31  ;;  %vm5580_vm15 = vmpackc.low %vm9660_vm5, %vm9659_vm0  ;;  %vm9672_vm0 = vcmp.eq.s32.totalorder %v7318_v10, 1 }
 0x31a   : > { %v2596_v7 = vrot.slane %v8142_v22, 1  ;;  %v2055_v46 = vadd.f32 %v2054_v18, %v8123_v27  ;;  %v2155_v44 = vrot.slane %v8142_v22, 7 }
 0x31b   : > { %v8152_v30 = vpop.f32.mrf.mxu0  ;;  %5985 = vmatprep.mubr.msk.bf16.mxu1 %vm5504_vm7, %v5505_v63  ;;  %vm9661_vm7 = vmmov %vm9654_vm1 }
 0x31c   : > { %v8155_v61 = vmax.f32 %v2055_v46, 0.0  ;;  %v2597_v53 = vsel %vm9650_vm4, %v2594_v56, %v2596_v7  ;;  %v2156_v0 = vsel %vm9653_vm14, %v2153_v41, %v2155_v44  ;;  %v6418_v56 = vld [vmem:[%s9390_s8 + $0x68] sm:$0xff]   ;;  %vm9663_vm4 = vcmp.eq.s32.totalorder %v7316_v9, 1  ;;  %vm9666_vm14 = vmmov %vm9658_vm8 }
 0x31d   : > { %v2060_v59 = vpop.f32.mrf.mxu0  ;;  %v5578_v62 = vpack.c.bf16 %v2597_v53, %v2595_v55  ;;  %v6419_v53 = vld [vmem:[%s9390_s8 + $0x60] sm:$0xff]   ;;  %vm5510_vm9 = vmpackc.low %vm9664_vm2, %vm9663_vm4  ;;  %vm9676_vm4 = vcmp.eq.s32.totalorder %v7697_v6, 1 }
 0x31e   : > { %v2157_v49 = vrot.slane %v8155_v61, 7  ;;  %v2061_v48 = vadd.f32 %v2060_v59, %v8123_v27  ;;  %v2598_v58 = vrot.slane %v8155_v61, 1 }
 0x31f   : > { %v8165_v19 = vpop.f32.mrf.mxu0  ;;  %6049 = vmatprep.mubr.msk.bf16.mxu0 %vm5577_vm13, %v5578_v62  ;;  %vm9665_vm13 = vmmov %vm9658_vm8 }
 0x320   : > { %v2158_v40 = vsel %vm9654_vm1, %v2155_v44, %v2157_v49  ;;  %v8170_v29 = vmax.f32 %v2061_v48, 0.0  ;;  %v2599_v54 = vsel %vm9657_vm11, %v2596_v7, %v2598_v58  ;;  %vm9667_vm1 = vcmp.eq.s32.totalorder %v7613_v36, 1  ;;  %vm9670_vm11 = vmmov %vm9662_vm6 }
 0x321   : > { %v5508_v5 = vpack.c.bf16 %v2158_v40, %v2156_v0  ;;  %v2064_v51 = vpop.f32.mrf.mxu0  ;;  %vm5583_vm10 = vmpackc.low %vm9668_vm3, %vm9667_vm1  ;;  %vm9680_vm1 = vcmp.eq.s32.totalorder %v7324_v17, 1 }
 0x322   : > { %v2600_v39 = vrot.slane %v8170_v29, 1  ;;  %v2065_v35 = vadd.f32 %v2064_v51, %v8123_v27  ;;  %v2159_v20 = vrot.slane %v8170_v29, 7 }
 0x323   : > { %v8181_v60 = vpop.f32.mrf.mxu0  ;;  %5986 = vmatmul.mubr.msk.bf16.vlgmr.msra.gmra.mxu1 %vm5507_vm12, %v5508_v5  ;;  %vm9669_vm12 = vmmov %vm9662_vm6 }
 0x324   : > { %v2601_v15 = vsel %vm9658_vm8, %v2598_v58, %v2600_v39  ;;  %v8186_v41 = vmax.f32 %v2065_v35, 0.0  ;;  %6002 = vmatpush3.bf16.msra.mxu1 %v6416_v33  ;;  %v2160_v7 = vsel %vm9661_vm7, %v2157_v49, %v2159_v20  ;;  %vm9671_vm8 = vcmp.eq.s32.totalorder %v7320_v12, 1  ;;  %vm9674_vm7 = vmmov %vm9665_vm13 }
 0x325   : > { %v5581_v37 = vpack.c.bf16 %v2601_v15, %v2599_v54  ;;  %v2070_v31 = vpop.f32.mrf.mxu0  ;;  %6003 = vmatprep.subr.bf16.mxu1 %v6417_v38  ;;  %vm5513_vm5 = vmpackc.low %vm9672_vm0, %vm9671_vm8  ;;  %vm9684_vm8 = vcmp.eq.s32.totalorder %v7754_v52, 1  ;;  %v9692_v52 = vld [vmem:[#allocation47_spill] sm:$0xff] }
 0x326   : > { %v2161_v24 = vrot.slane %v8186_v41, 7  ;;  %v2071_v18 = vadd.f32 %v2070_v31, %v8123_v27  ;;  %v2602_v33 = vrot.slane %v8186_v41, 1 }
 0x327   : > { %v8197_v63 = vpop.f32.mrf.mxu0  ;;  %6050 = vmatmul.mubr.msk.bf16.vlgmr.msra.gmra.mxu0 %vm5580_vm15, %v5581_v37  ;;  %vm9673_vm15 = vmmov %vm9665_vm13 }
 0x328   : > { %v8200_v14 = vmax.f32 %v2071_v18, 0.0  ;;  %v2162_v46 = vsel %vm9662_vm6, %v2159_v20, %v2161_v24  ;;  %6004 = vmatpush3.bf16.msra.mxu1 %v6417_v38  ;;  %v2603_v40 = vsel %vm9665_vm13, %v2600_v39, %v2602_v33  ;;  %v6420_v38 = vld [vmem:[%s9390_s8 + $0x58] sm:$0xff]   ;;  %vm9675_vm6 = vcmp.eq.s32.totalorder %v7699_v47, 1 }
 0x329   : > { %v2074_v44 = vpop.f32.mrf.mxu0  ;;  %v5511_v55 = vpack.c.bf16 %v2162_v46, %v2160_v7  ;;  %6005 = vmatprep.subr.bf16.mxu1 %v6418_v56  ;;  %vm5586_vm2 = vmpackc.low %vm9676_vm4, %vm9675_vm6 }
 0x32a   : > { %v2604_v59 = vrot.slane %v8200_v14, 1  ;;  %v2075_v62 = vadd.f32 %v2074_v44, %v8123_v27  ;;  %v2163_v48 = vrot.slane %v8200_v14, 7 }
 0x32b   : > { %v8213_v49 = vpop.f32.mrf.mxu0  ;;  %5989 = vmatprep.mubr.msk.bf16.mxu1 %vm5510_vm9, %v5511_v55  ;;  %vm9677_vm9 = vmmov %vm9670_vm11 }
 0x32c   : > { %v8216_v0 = vmax.f32 %v2075_v62, 0.0  ;;  %v2605_v58 = vsel %vm9666_vm14, %v2602_v33, %v2604_v59  ;;  %6006 = vmatpush3.bf16.msra.mxu1 %v6418_v56  ;;  %v2164_v37 = vsel %vm9669_vm12, %v2161_v24, %v2163_v48  ;;  %v6421_v33 = vld [vmem:[%s9390_s8 + $0x50] sm:$0xff]   ;;  %vm9678_vm13 = vmmov %vm9677_vm9  ;;  %vm9679_vm14 = vcmp.eq.s32.totalorder %v7329_v21, 1 }
 0x32d   : > { %v2080_v5 = vpop.f32.mrf.mxu0  ;;  %v5584_v51 = vpack.c.bf16 %v2605_v58, %v2603_v40  ;;  %6007 = vmatprep.subr.bf16.mxu1 %v6419_v53  ;;  %v6422_v58 = vld [vmem:[%s9390_s8 + $0x48] sm:$0xff]   ;;  %vm5516_vm3 = vmpackc.low %vm9680_vm1, %vm9679_vm14 }
 0x32e   : > { %v2165_v35 = vrot.slane %v8216_v0, 7  ;;  %v2081_v54 = vadd.f32 %v2080_v5, %v8123_v27  ;;  %v2606_v20 = vrot.slane %v8216_v0, 1  ;;  %vm9682_vm12 = vmmov %vm9674_vm7 }
 0x32f   : > { %v8229_v39 = vpop.f32.mrf.mxu0  ;;  %6053 = vmatprep.mubr.msk.bf16.mxu0 %vm5583_vm10, %v5584_v51  ;;  %vm9681_vm10 = vmmov %vm9674_vm7 }
 0x330   : > { %v8232_v15 = vmax.f32 %v2081_v54, 0.0  ;;  %v2166_v31 = vsel %vm9670_vm11, %v2163_v48, %v2165_v35  ;;  %6008 = vmatpush3.bf16.msra.mxu1 %v6419_v53  ;;  %v2607_v53 = vsel %vm9673_vm15, %v2604_v59, %v2606_v20  ;;  %vm9683_vm11 = vcmp.eq.s32.totalorder %v7756_v26, 1  ;;  %v9694_v26 = vld [vmem:[#allocation46_spill] sm:$0xff] }
 0x331   : > { %v2084_v56 = vpop.f32.mrf.mxu0  ;;  %v5514_v18 = vpack.c.bf16 %v2166_v31, %v2164_v37  ;;  %6009 = vmatprep.subr.bf16.mxu1 %v6420_v38  ;;  %vm5589_vm0 = vmpackc.low %vm9684_vm8, %vm9683_vm11  ;;  %vm9695_vm14 = vcmp.eq.s32.totalorder %v9694_v26, 1 }
 0x332   : > { %v2608_v7 = vrot.slane %v8232_v15, 1  ;;  %v2085_v46 = vadd.f32 %v2084_v56, %v8123_v27  ;;  %v2167_v44 = vrot.slane %v8232_v15, 7 }
 0x333   : > { %v8245_v24 = vpop.f32.mrf.mxu0  ;;  %5990 = vmatmul.mubr.msk.bf16.gmra.mxu1 %vm5513_vm5, %v5514_v18  ;;  %v6423_v18 = vld [vmem:[%s9390_s8 + $0x40] sm:$0xff]   ;;  %vm9685_vm5 = vmmov %vm9677_vm9 }
 0x334   : > { %v8248_v55 = vmax.f32 %v2085_v46, 0.0  ;;  %v2609_v62 = vsel %vm9674_vm7, %v2606_v20, %v2608_v7  ;;  %6010 = vmatpush3.bf16.msra.mxu1 %v6420_v38  ;;  %v2168_v20 = vsel %vm9677_vm9, %v2165_v35, %v2167_v44  ;;  %vm9686_vm15 = vmmov %vm9685_vm5  ;;  %vm9687_vm7 = vcmp.eq.s32.totalorder %v7350_v32, 1 }
 0x335   : > { %v2090_v48 = vpop.f32.mrf.mxu0  ;;  %v5587_v40 = vpack.c.bf16 %v2609_v62, %v2607_v53  ;;  %6011 = vmatprep.subr.bf16.mxu1 %v6421_v33 }
 0x336   : > { %v2169_v5 = vrot.slane %v8248_v55, 7  ;;  %v2091_v51 = vadd.f32 %v2090_v48, %v8123_v27  ;;  %v2610_v38 = vrot.slane %v8248_v55, 1 }
 0x337   : > { %v8261_v59 = vpop.f32.mrf.mxu0  ;;  %6054 = vmatmul.mubr.msk.bf16.gmra.mxu0 %vm5586_vm2, %v5587_v40  ;;  %vm9690_vm2 = vmmov %vm9681_vm10 }
 0x338   : > { %v8264_v54 = vmax.f32 %v2091_v51, 0.0  ;;  %v2170_v37 = vsel %vm9678_vm13, %v2167_v44, %v2169_v5  ;;  %6012 = vmatpush3.bf16.msra.mxu1 %v6421_v33  ;;  %v2611_v62 = vsel %vm9681_vm10, %v2608_v7, %v2610_v38  ;;  %vm9691_vm9 = vmmov %vm9690_vm2  ;;  %vm9693_vm13 = vcmp.eq.s32.totalorder %v9692_v52, 1 }
 0x339   : > { %v2094_v31 = vpop.f32.mrf.mxu0  ;;  %v5517_v56 = vpack.c.bf16 %v2170_v37, %v2168_v20  ;;  %6013 = vmatprep.subr.bf16.mxu1 %v6422_v58  ;;  %vm5592_vm1 = vmpackc.low %vm9695_vm14, %vm9693_vm13 }
 0x33a   : > { %v2612_v46 = vrot.slane %v8264_v54, 1  ;;  %v2095_v53 = vadd.f32 %v2094_v31, %v8123_v27  ;;  %v2171_v33 = vrot.slane %v8264_v54, 7 }
 0x33b   : > { %v8277_v35 = vpop.f32.mrf.mxu0  ;;  %5993 = vmatprep.mubr.msk.bf16.mxu1 %vm5516_vm3, %v5517_v56  ;;  %vm9696_vm3 = vmmov %vm9685_vm5 }
 0x33c   : > { %v8280_v44 = vmax.f32 %v2095_v53, 0.0  ;;  %v2613_v48 = vsel %vm9682_vm12, %v2610_v38, %v2612_v46  ;;  %6014 = vmatpush3.bf16.msra.mxu1 %v6422_v58  ;;  %v2172_v58 = vsel %vm9685_vm5, %v2169_v5, %v2171_v33  ;;  %vm9697_vm10 = vmmov %vm9696_vm3 }
 0x33d   : > { %v2100_v40 = vpop.f32.mrf.mxu0  ;;  %v5590_v51 = vpack.c.bf16 %v2613_v48, %v2611_v62  ;;  %6015 = vmatprep.subr.bf16.mxu1 %v6423_v18  ;;  %v9688_v48 = vld [vmem:[#allocation30_spill] sm:$0xff] }
 0x33e   : > { %v2173_v20 = vrot.slane %v8280_v44, 7  ;;  %v2101_v37 = vadd.f32 %v2100_v40, %v8123_v27  ;;  %v2614_v7 = vrot.slane %v8280_v44, 1  ;;  %vm9689_vm6 = vcmp.eq.s32.totalorder %v9688_v48, 1 }
 0x33f   : > { %v8290_v31 = vpop.f32.mrf.mxu0  ;;  %6057 = vmatprep.mubr.msk.bf16.mxu0 %vm5589_vm0, %v5590_v51  ;;  %vm5519_vm4 = vmpackc.low %vm9689_vm6, %vm9687_vm7 }
 0x340   : > { %v8293_v56 = vmax.f32 %v2101_v37, 0.0  ;;  %v2174_v38 = vsel %vm9686_vm15, %v2171_v33, %v2173_v20  ;;  %6016 = vmatpush3.bf16.msra.mxu1 %v6423_v18  ;;  %v2615_v33 = vsel %vm9690_vm2, %v2612_v46, %v2614_v7  ;;  %vm9702_vm0 = vmmov %vm9690_vm2  ;;  %vm9705_vm15 = vcmp.eq.s32.totalorder %v9704_v13, 1 }
 0x341   : > { %v2104_v53 = vpop.f32.mrf.mxu0  ;;  %v5520_v62 = vpack.c.bf16 %v2174_v38, %v2172_v58  ;;  %vm9703_vm5 = vmmov %vm9702_vm0  ;;  %v1938_v13 = vsub.s32 1, %v8117_v42 }
 0x342   : > { %v2616_v40 = vrot.slane %v8293_v56, 1  ;;  %v2105_v51 = vadd.f32 %v2104_v53, %v8123_v27  ;;  %v2175_v37 = vrot.slane %v8293_v56, 7  ;;  %vm9709_vm2 = vmmov %vm9696_vm3 }
 0x343   : > { %v8303_v47 = vpop.f32.mrf.mxu0  ;;  %5994 = vmatmul.mubr.msk.bf16.gmra.mxu1 %vm5519_vm4, %v5520_v62  ;;  %vm9708_vm4 = vmmov %vm9702_vm0 }
 0x344   : > { %v2132_v5 = vmax.f32 %v2105_v51, 0.0  ;;  %v2617_v18 = vsel %vm9691_vm9, %v2614_v7, %v2616_v40  ;;  %v2176_v51 = vsel %vm9696_vm3, %v2173_v20, %v2175_v37  ;;  %vm9710_vm9 = vmmov %vm9709_vm2 }
 0x345   : > { %v2110_v58 = vpop.f32.mrf.mxu0  ;;  %v5593_v38 = vpack.c.bf16 %v2617_v18, %v2615_v33  ;;  %v9698_v33 = vld [vmem:[#allocation33_spill] sm:$0xff]  ;;  %v9700_v18 = vld [vmem:[#allocation32_spill] sm:$0xff]  ;;  %vm9711_vm13 = vmmov %vm9702_vm0 }
 0x346   : > { %v2177_v6 = vrot.slane %v2132_v5, 7  ;;  %v2111_v53 = vadd.f32 %v2110_v58, %v8123_v27  ;;  %v2618_v62 = vrot.slane %v2132_v5, 1  ;;  %vm9699_vm12 = vcmp.eq.s32.totalorder %v9698_v33, 1 }
 0x347   : > { %v8313_v50 = vpop.f32.mrf.mxu0  ;;  %6058 = vmatmul.mubr.msk.bf16.gmra.mxu0 %vm5592_vm1, %v5593_v38  ;;  %vm9701_vm11 = vcmp.eq.s32.totalorder %v9700_v18, 1 }
 0x348   : > { %v2133_v36 = vmax.f32 %v2111_v53, 0.0  ;;  %v2178_v46 = vsel %vm9697_vm10, %v2175_v37, %v2177_v6  ;;  %vm5522_vm8 = vmpackc.low %vm9701_vm11, %vm9699_vm12  ;;  %v2619_v38 = vsel %vm9702_vm0, %v2616_v40, %v2618_v62  ;;  %v9706_v37 = vld [vmem:[#allocation48_spill] sm:$0xff]  ;;  %v9712_v40 = vld [vmem:[#allocation35_spill] sm:$0xff] }
 0x349   : > { %v2114_v7 = vpop.f32.mrf.mxu0  ;;  %v5523_v43 = vpack.c.bf16 %v2178_v46, %v2176_v51  ;;  %vm9707_vm7 = vcmp.eq.s32.totalorder %v9706_v37, 1  ;;  %vm9713_vm14 = vcmp.eq.s32.totalorder %v9712_v40, 1  ;;  %v9718_v37 = vld [vmem:[#allocation50_spill] sm:$0xff]  ;;  %vm9721_vm0 = vmmov %vm9709_vm2 }
 0x34a   : > { %v2620_v52 = vrot.slane %v2133_v36, 1  ;;  %v2115_v26 = vadd.f32 %v2114_v7, %v8123_v27  ;;  %v2179_v58 = vrot.slane %v2133_v36, 7  ;;  %vm5595_vm6 = vmpackc.low %vm9707_vm7, %vm9705_vm15  ;;  %vm9719_vm12 = vcmp.eq.s32.totalorder %v9718_v37, 1 }
 0x34b   : > { %5997 = vmatprep.mubr.msk.bf16.mxu1 %vm5522_vm8, %v5523_v43  ;;  %vm9720_vm8 = vmmov %vm9709_vm2  ;;  %vm9723_vm15 = vcmp.eq.s32.totalorder %v7306_v1, 1  ;;  %vm9724_vm7 = vcmask 130048  }
 0x34c   : > { %v2134_v45 = vmax.f32 %v2115_v26, 0.0  ;;  %v2621_v53 = vsel %vm9703_vm5, %v2618_v62, %v2620_v52  ;;  %v2180_v27 = vsel %vm9709_vm2, %v2177_v6, %v2179_v58  ;;  %v9714_v62 = vld [vmem:[#allocation34_spill] sm:$0xff]  ;;  %v2408_v6 = vpack.c.bf16 %v8155_v61, %v8142_v22  ;;  %vm9722_vm5 = vmmov %vm9721_vm0 }
 0x34d   : > { %v5596_v20 = vpack.c.bf16 %v2621_v53, %v2619_v38  ;;  %vm9715_vm1 = vcmp.eq.s32.totalorder %v9714_v62, 1  ;;  %v9716_v53 = vld [vmem:[#allocation51_spill] sm:$0xff]  ;;  %v6424_v61 = vld [vmem:[%s9392_s10 + $0x38] sm:$0xff]   ;;  %vm9727_vm2 = vcmp.eq.s32.totalorder %v7312_v4, 1 }
 0x34e   : > { %v2181_v51 = vrot.slane %v2134_v45, 7  ;;  %v2622_v46 = vrot.slane %v2134_v45, 1  ;;  %vm5525_vm3 = vmpackc.low %vm9715_vm1, %vm9713_vm14  ;;  %vm9717_vm10 = vcmp.eq.s32.totalorder %v9716_v53, 1  ;;  %v2414_v22 = vpack.c.bf16 %v2134_v45, %v2133_v36  ;;  %6065 = vmatprep.subr.bf16.mxu1 %v6424_v61  ;;  %v6427_v45 = vld [vmem:[%s9392_s10 + $0x20] sm:$0xff]   ;;  %v6428_v36 = vld [vmem:[%s9392_s10 + $0x18] sm:$0xff]  }
 0x34f   : > { %6061 = vmatprep.mubr.msk.bf16.mxu0 %vm5595_vm6, %v5596_v20  ;;  %vm5598_vm11 = vmpackc.low %vm9719_vm12, %vm9717_vm10  ;;  %v2407_v20 = vpack.c.bf16 %v8134_v57, %v8128_v25  ;;  %v2412_v25 = vpack.c.bf16 %v8280_v44, %v8264_v54  ;;  %v2413_v57 = vpack.c.bf16 %v2132_v5, %v8293_v56  ;;  %v8377_v54 = vld [vmem:[#allocation11 + $0x8] sm:$0xff]  }
 0x350   : > { %v2640_v11 = vsel %vm9708_vm4, %v2622_v46, 0.0  ;;  %v2182_v43 = vsel %vm9710_vm9, %v2179_v58, %v2181_v51  ;;  %v2623_v26 = vsel %vm9711_vm13, %v2620_v52, %v2622_v46  ;;  %v2409_v52 = vpack.c.bf16 %v8186_v41, %v8170_v29  ;;  %v6425_v29 = vld [vmem:[%s9392_s10 + $0x30] sm:$0xff]   ;;  %v6426_v41 = vld [vmem:[%s9392_s10 + $0x28] sm:$0xff]   ;;  %vm9725_vm6 = vmmov %vm9721_vm0 }
 0x351   : > { %v5526_v7 = vpack.c.bf16 %v2182_v43, %v2180_v27  ;;  %v5599_v38 = vpack.c.bf16 %v2640_v11, %v2623_v26  ;;  %v2410_v11 = vpack.c.bf16 %v8216_v0, %v8200_v14  ;;  %v2411_v58 = vpack.c.bf16 %v8248_v55, %v8232_v15  ;;  %v6429_v14 = vld [vmem:[%s9392_s10 + $0x10] sm:$0xff]   ;;  %v6430_v0 = vld [vmem:[%s9392_s10 + $0x8] sm:$0xff]   ;;  %v6431_v15 = vld [vmem:[%s9392_s10] sm:$0xff]   ;;  %v8380_v26 = vpop.f32.mrf.mxu0 }
 0x352   : > { %v6432_v55 = vld [vmem:[#allocation11] sm:$0xff]   ;;  %vm9726_vm4 = vmmov %vm9724_vm7  ;;  %vm9728_vm9 = vcmp.eq.s32.totalorder %v7310_v3, 1  ;;  %vm9729_vm13 = vcmp.eq.s32.totalorder %v7308_v2, 1  ;;  %v8518_v3 = vpop.permute.xlu1 %3812 }
 0x353   : > { %5998 = vmatmul.mubr.msk.bf16.gmra.mxu1 %vm5525_vm3, %v5526_v7  ;;  %6062 = vmatmul.mubr.msk.bf16.gmra.mxu0 %vm5598_vm11, %v5599_v38  ;;  %vm9730_vm14 = vmmov %vm9726_vm4  ;;  %vm3679_vm11 = vcmask 1045504  }
 0x354   : > { %6017 = vmatprep.mubr.bf16.mxu1 %v2407_v20  ;;  %6097 = vmatprep.subr.bf16.mxu0 %v6432_v55  ;;  %vm9731_vm1 = vmmov %vm9726_vm4 }
 0x355   : > { %6098 = vmatpush3.bf16.msra.mxu0 %v6432_v55  ;;  %vm9732_vm3 = vmmov %vm9721_vm0 }
 0x356   : > { %vm9733_vm10 = vmmov %vm9721_vm0 }
 0x357   : > { %vm9734_vm12 = vmmov %vm9731_vm1 }
 0x35b   : > { %6018 = vmatmul.mubr.bf16.vlgmr.msra.gmra.mxu1 %v2408_v6 }
 0x35c   : > { %6021 = vmatprep.mubr.bf16.mxu1 %v2409_v52  ;;  %6066 = vmatpush3.bf16.msra.mxu1 %v6424_v61 }
 0x35d   : > { %6067 = vmatprep.subr.bf16.mxu1 %v6425_v29 }
 0x360   : > { %6068 = vmatpush3.bf16.msra.mxu1 %v6425_v29 }
 0x361   : > { %6069 = vmatprep.subr.bf16.mxu1 %v6426_v41 }
 0x363   : > { %6022 = vmatmul.mubr.bf16.gmra.mxu1 %v2410_v11 }
 0x364   : > { %6025 = vmatprep.mubr.bf16.mxu1 %v2411_v58  ;;  %6070 = vmatpush3.bf16.msra.mxu1 %v6426_v41  ;;  %v8394_v41 = vld [vmem:[#allocation10] ss:$0 sm:$0xff] }
 0x365   : > { %6071 = vmatprep.subr.bf16.mxu1 %v6427_v45 }
 0x368   : > { %6072 = vmatpush3.bf16.msra.mxu1 %v6427_v45 }
 0x369   : > { %6073 = vmatprep.subr.bf16.mxu1 %v6428_v36 }
 0x36b   : > { %6026 = vmatmul.mubr.bf16.gmra.mxu1 %v2412_v25 }
 0x36c   : > { %6029 = vmatprep.mubr.bf16.mxu1 %v2413_v57  ;;  %6074 = vmatpush3.bf16.msra.mxu1 %v6428_v36 }
 0x36d   : > { %6075 = vmatprep.subr.bf16.mxu1 %v6429_v14 }
 0x370   : > { %6076 = vmatpush3.bf16.msra.mxu1 %v6429_v14 }
 0x371   : > { %6077 = vmatprep.subr.bf16.mxu1 %v6430_v0 }
 0x373   : > { %6030 = vmatmul.mubr.bf16.gmra.mxu1 %v2414_v22 }
 0x374   : > { %6078 = vmatpush3.bf16.msra.mxu1 %v6430_v0 }
 0x375   : > { %6079 = vmatprep.subr.bf16.mxu1 %v6431_v15 }
 0x378   : > { %6080 = vmatpush3.bf16.msra.mxu1 %v6431_v15 }
 0x379   : > { %6115 = vmatprep.subr.bf16.mxu1 %v8377_v54 }
 0x3e3   : > { %v5987_v44 = vpop.f32.mrf.mxu1 }
 0x3e4   : > { %v2393_v0 = vadd.f32 %v5987_v44, %v8394_v41  ;;  %v8406_v44 = vrot.slane %v8120_v28, %v1938_v13 }
 0x3e5   : > { %v2322_v56 = vpop.f32.mrf.mxu1 }
 0x3e6   : > { %v2391_v37 = vadd.f32 %v8394_v41, %v2322_v56 }
 0x3e7   : > { %v5988_v5 = vpop.f32.mrf.mxu1  ;;  %v6051_v38 = vpop.f32.mrf.mxu0 }
 0x3e8   : > { %v2394_v40 = vadd.f32 %v5988_v5, %v8394_v41  ;;  %v2043_v5 = vadd.f32 %v8126_v16, %v8406_v44 }
 0x3e9   : > { %v2325_v51 = vpop.f32.mrf.mxu1  ;;  %v2764_v6 = vpop.f32.mrf.mxu0 }
 0x3ea   : > { %v2392_v17 = vadd.f32 %v8394_v41, %v2325_v51 }
 0x3eb   : > { %v6052_v11 = vpop.f32.mrf.mxu0 }
 0x3ed   : > { %v2767_v25 = vpop.f32.mrf.mxu0 }
 0x3f3   : > { %v5991_v46 = vpop.f32.mrf.mxu1 }
 0x3f4   : > { %v2397_v56 = vadd.f32 %v5991_v46, %v8394_v41 }
 0x3f5   : > { %v2338_v27 = vpop.f32.mrf.mxu1 }
 0x3f7   : > { %v5992_v43 = vpop.f32.mrf.mxu1  ;;  %v6055_v22 = vpop.f32.mrf.mxu0 }
 0x3f9   : > { %v2341_v7 = vpop.f32.mrf.mxu1  ;;  %v2780_v45 = vpop.f32.mrf.mxu0 }
 0x3fb   : > { %v6056_v15 = vpop.f32.mrf.mxu0 }
 0x3fd   : > { %v2783_v48 = vpop.f32.mrf.mxu0 }
 0x403   : > { %v8382_v20 = vpop.f32.mrf.mxu1 }
 0x405   : > { %v8384_v52 = vpop.f32.mrf.mxu1 }
 0x407   : > { %v8386_v58 = vpop.f32.mrf.mxu1  ;;  %v6059_v12 = vpop.f32.mrf.mxu0 }
 0x409   : > { %v8388_v57 = vpop.f32.mrf.mxu1 }
 0x413   : > { %v8390_v61 = vpop.f32.mrf.mxu1 }
 0x415   : > { %v8392_v29 = vpop.f32.mrf.mxu1 }
 0x417   : > { %v8396_v36 = vpop.f32.mrf.mxu1 }
 0x419   : > { %v8398_v14 = vpop.f32.mrf.mxu1 }
 0x41b   : > { %v6019_v55 = vpop.f32.mrf.mxu1 }
 0x41c   : > { %v2579_v53 = vadd.f32 %v6019_v55, %v2393_v0 }
 0x41d   : > { %v2514_v62 = vpop.f32.mrf.mxu1 }
 0x41e   : > { %v2829_v18 = vadd.f32 %v6051_v38, %v2579_v53  ;;  %v2577_v33 = vadd.f32 %v2514_v62, %v2391_v37  ;;  %v2053_v53 = vadd.f32 %v8138_v23, %v8406_v44  ;;  %v2057_v37 = vadd.f32 %v8152_v30, %v8406_v44 }
 0x41f   : > { %v6020_v32 = vpop.f32.mrf.mxu1  ;;  %v2395_v62 = vadd.f32 %v8394_v41, %v2338_v27  ;;  %v2398_v30 = vadd.f32 %v5992_v43, %v8394_v41  ;;  %v2399_v43 = vadd.f32 %v8394_v41, %v8384_v52  ;;  %v2402_v52 = vadd.f32 %v8386_v58, %v8394_v41 }
 0x420   : > { %v2827_v21 = vadd.f32 %v2764_v6, %v2577_v33  ;;  %v2580_v10 = vadd.f32 %v6020_v32, %v2394_v40  ;;  %v2845_v0 = vmax.f32 %v2829_v18, 0.0 }
 0x421   : > { %v2517_v8 = vpop.f32.mrf.mxu1 }
 0x422   : > { %v2830_v42 = vadd.f32 %v6052_v11, %v2580_v10  ;;  %v2578_v55 = vadd.f32 %v2517_v8, %v2392_v17  ;;  %v2843_v32 = vmax.f32 %v2827_v21, 0.0  ;;  %v2047_v10 = vadd.f32 %v8131_v34, %v8406_v44  ;;  %v2796_v8 = vpop.f32.mrf.mxu0 }
 0x423   : > { %v6023_v33 = vpop.f32.mrf.mxu1  ;;  %v2861_v18 = vadd.f32 %v2845_v0, %v2053_v53  ;;  %v2396_v21 = vadd.f32 %v8394_v41, %v2341_v7  ;;  %v2401_v34 = vadd.f32 %v8382_v20, %v8394_v41 }
 0x424   : > { %v2846_v40 = vmax.f32 %v2830_v42, 0.0  ;;  %v2828_v13 = vadd.f32 %v2767_v25, %v2578_v55  ;;  %v2583_v28 = vadd.f32 %v6023_v33, %v2397_v56  ;;  %v2859_v6 = vadd.f32 %v2843_v32, %v2043_v5  ;;  %v6060_v56 = vpop.f32.mrf.mxu0 }
 0x425   : > { %v2530_v17 = vpop.f32.mrf.mxu1  ;;  %v2073_v32 = vadd.f32 %v8197_v63, %v8406_v44  ;;  %v2063_v63 = vadd.f32 %v8165_v19, %v8406_v44 }
 0x426   : > { %v2862_v23 = vadd.f32 %v2846_v40, %v2057_v37  ;;  %v2844_v51 = vmax.f32 %v2828_v13, 0.0  ;;  %v2581_v46 = vadd.f32 %v2530_v17, %v2395_v62  ;;  %v2833_v27 = vadd.f32 %v6055_v22, %v2583_v28  ;;  %v2799_v40 = vpop.f32.mrf.mxu0 }
 0x427   : > { %v6024_v38 = vpop.f32.mrf.mxu1 }
 0x428   : > { %v2876_v11 = vpack.c.bf16 %v2862_v23, %v2861_v18  ;;  %v2860_v25 = vadd.f32 %v2844_v51, %v2047_v10  ;;  %v2831_v16 = vadd.f32 %v2780_v45, %v2581_v46  ;;  %v2584_v42 = vadd.f32 %v6024_v38, %v2398_v30  ;;  %v6063_v10 = vpop.f32.mrf.mxu0 }
 0x429   : > { %v2533_v55 = vpop.f32.mrf.mxu1  ;;  %v2849_v37 = vmax.f32 %v2833_v27, 0.0  ;;  %v2077_v45 = vadd.f32 %v8213_v49, %v8406_v44  ;;  %v2400_v51 = vadd.f32 %v8394_v41, %v8388_v57  ;;  %v2403_v57 = vadd.f32 %v8394_v41, %v8392_v29 }
 0x42a   : > { %v2582_v0 = vadd.f32 %v2533_v55, %v2396_v21  ;;  %v2875_v53 = vpack.c.bf16 %v2860_v25, %v2859_v6  ;;  %v2834_v62 = vadd.f32 %v6056_v15, %v2584_v42  ;;  %v2847_v13 = vmax.f32 %v2831_v16, 0.0  ;;  %v2812_v19 = vpop.f32.mrf.mxu0 }
 0x42b   : > { %v6027_v33 = vpop.f32.mrf.mxu1  ;;  %v2067_v15 = vadd.f32 %v8181_v60, %v8406_v44  ;;  %v2865_v49 = vadd.f32 %v2849_v37, %v2073_v32  ;;  %v2083_v29 = vadd.f32 %v8229_v39, %v8406_v44 }
 0x42c   : > { %v2832_v22 = vadd.f32 %v2783_v48, %v2582_v0  ;;  %v2587_v7 = vadd.f32 %v6027_v33, %v2401_v34  ;;  %6081 = vmatprep.mubr.bf16.mxu1 %v2875_v53  ;;  %v2850_v20 = vmax.f32 %v2834_v62, 0.0  ;;  %v2863_v30 = vadd.f32 %v2847_v13, %v2063_v63  ;;  %v6064_v33 = vpop.f32.mrf.mxu0 }
 0x42d   : > { %v2546_v28 = vpop.f32.mrf.mxu1  ;;  %6082 = vmatmul.mubr.bf16.vlgmr.msra.gmra.mxu1 %v2876_v11  ;;  %v2103_v63 = vadd.f32 %v8290_v31, %v8406_v44 }
 0x42e   : > { %v2848_v48 = vmax.f32 %v2832_v22, 0.0  ;;  %v2585_v5 = vadd.f32 %v2546_v28, %v2399_v43  ;;  %6116 = vmatpush3.bf16.msra.mxu1 %v8377_v54  ;;  %v2866_v17 = vadd.f32 %v2850_v20, %v2077_v45  ;;  %v2837_v18 = vadd.f32 %v6059_v12, %v2587_v7 }
 0x42f   : > { %v6028_v23 = vpop.f32.mrf.mxu1  ;;  %v2097_v54 = vadd.f32 %v8277_v35, %v8406_v44  ;;  %v2405_v12 = vadd.f32 %v8390_v61, %v8394_v41  ;;  %v2406_v35 = vadd.f32 %v8396_v36, %v8394_v41 }
 0x430   : > { %v2864_v46 = vadd.f32 %v2848_v48, %v2067_v15  ;;  %v2588_v60 = vadd.f32 %v6028_v23, %v2402_v52  ;;  %v2835_v27 = vadd.f32 %v2796_v8, %v2585_v5  ;;  %v2878_v38 = vpack.c.bf16 %v2866_v17, %v2865_v49  ;;  %v2815_v15 = vpop.f32.mrf.mxu0 }
 0x431   : > { %v2549_v58 = vpop.f32.mrf.mxu1  ;;  %v2853_v11 = vmax.f32 %v2837_v18, 0.0  ;;  %v2087_v8 = vadd.f32 %v8245_v24, %v8406_v44 }
 0x432   : > { %v2838_v21 = vadd.f32 %v6060_v56, %v2588_v60  ;;  %v2586_v6 = vadd.f32 %v2549_v58, %v2400_v51  ;;  %v2877_v16 = vpack.c.bf16 %v2864_v46, %v2863_v30  ;;  %v2093_v56 = vadd.f32 %v8261_v59, %v8406_v44  ;;  %v8461_v30 = vld [vmem:[#allocation11 + $0x10] sm:$0xff]  }
 0x433   : > { %v6031_v25 = vpop.f32.mrf.mxu1  ;;  %v2851_v34 = vmax.f32 %v2835_v27, 0.0  ;;  %v2404_v59 = vadd.f32 %v8394_v41, %v8398_v14  ;;  %v2107_v41 = vadd.f32 %v8303_v47, %v8406_v44  ;;  %v2117_v14 = vadd.f32 %v8380_v26, %v8406_v44  ;;  %6133 = vmatprep.subr.bf16.mxu0 %v8461_v30  ;;  %v6435_v47 = vld [vmem:[#allocation11 + $0x18] sm:$0xff]   ;;  %v8467_v27 = vld [vmem:[%s9393_s11] ss:$0 sm:$0xff] }
 0x434   : > { %v2854_v42 = vmax.f32 %v2838_v21, 0.0  ;;  %v2836_v55 = vadd.f32 %v2799_v40, %v2586_v6  ;;  %6085 = vmatprep.mubr.bf16.mxu1 %v2877_v16  ;;  %v2591_v61 = vadd.f32 %v6031_v25, %v2405_v12  ;;  %v2869_v43 = vadd.f32 %v2853_v11, %v2093_v56  ;;  %6151 = vmatprep.subr.bf16.mxu1 %v6435_v47 }
 0x435   : > { %v2562_v0 = vpop.f32.mrf.mxu1  ;;  %6086 = vmatmul.mubr.bf16.gmra.mxu1 %v2878_v38  ;;  %v2867_v32 = vadd.f32 %v2851_v34, %v2083_v29 }
 0x436   : > { %v2870_v53 = vadd.f32 %v2854_v42, %v2097_v54  ;;  %v2852_v37 = vmax.f32 %v2836_v55, 0.0  ;;  %v2589_v62 = vadd.f32 %v2562_v0, %v2403_v57  ;;  %v2841_v13 = vadd.f32 %v6063_v10, %v2591_v61 }
 0x437   : > { %v6032_v24 = vpop.f32.mrf.mxu1  ;;  %v2113_v10 = vadd.f32 %v8313_v50, %v8406_v44 }
 0x438   : > { %v2868_v22 = vadd.f32 %v2852_v37, %v2087_v8  ;;  %v2839_v7 = vadd.f32 %v2812_v19, %v2589_v62  ;;  %v2592_v36 = vadd.f32 %v6032_v24, %v2406_v35  ;;  %v2880_v40 = vpack.c.bf16 %v2870_v53, %v2869_v43 }
 0x439   : > { %v2565_v45 = vpop.f32.mrf.mxu1  ;;  %v2857_v49 = vmax.f32 %v2841_v13, 0.0 }
 0x43a   : > { %v2842_v20 = vadd.f32 %v6064_v33, %v2592_v36  ;;  %v2590_v28 = vadd.f32 %v2565_v45, %v2404_v59  ;;  %v2879_v52 = vpack.c.bf16 %v2868_v22, %v2867_v32  ;;  %v2855_v48 = vmax.f32 %v2839_v7, 0.0 }
 0x43b   : > { %v2873_v46 = vadd.f32 %v2857_v49, %v2113_v10 }
 0x43c   : > { %v2858_v5 = vmax.f32 %v2842_v20, 0.0  ;;  %v2840_v39 = vadd.f32 %v2815_v15, %v2590_v28  ;;  %6089 = vmatprep.mubr.bf16.mxu1 %v2879_v52  ;;  %v2871_v18 = vadd.f32 %v2855_v48, %v2103_v63  ;;  %v8514_v52 = vpop.permute.xlu0 %3809 }
 0x43d   : > { %6090 = vmatmul.mubr.bf16.gmra.mxu1 %v2880_v40 }
 0x43e   : > { %v2856_v17 = vmax.f32 %v2840_v39, 0.0  ;;  %v2874_v23 = vadd.f32 %v2858_v5, %v2117_v14 }
 0x440   : > { %v2872_v51 = vadd.f32 %v2856_v17, %v2107_v41  ;;  %v2882_v31 = vpack.c.bf16 %v2874_v23, %v2873_v46 }
 0x442   : > { %v2881_v60 = vpack.c.bf16 %v2872_v51, %v2871_v18 }
 0x444   : > { %6093 = vmatprep.mubr.bf16.mxu1 %v2881_v60 }
 0x445   : > { %6094 = vmatmul.mubr.bf16.gmra.mxu1 %v2882_v31 }
 0x4ed   : > { %v6083_v26 = vpop.f32.mrf.mxu1 }
 0x4ee   : > { %v2997_v44 = vadd.f32 %v6083_v26, %v8467_v27  ;;  %v8541_v26 = vpop.permute.xlu0 %3815 }
 0x4ef   : > { %v2988_v50 = vpop.f32.mrf.mxu1 }
 0x4f0   : > { %v2989_v38 = vadd.f32 %v8467_v27, %v2988_v50  ;;  %v8473_v19 = vmax.f32 %v2997_v44, 0.0 }
 0x4f1   : > { %v6084_v58 = vpop.f32.mrf.mxu1 }
 0x4f2   : > { %v3000_v21 = vadd.f32 %v6084_v58, %v8467_v27  ;;  %v8477_v25 = vmax.f32 %v2989_v38, 0.0  ;;  %v3087_v55 = vrot.slane %v8473_v19, 7  ;;  %v3464_v50 = vrot.slane %v8473_v19, 1  ;;  %v8548_v38 = vpop.permute.xlu1 %3818 }
 0x4f3   : > { %v2991_v6 = vpop.f32.mrf.mxu1 }
 0x4f4   : > { %v2992_v54 = vadd.f32 %v8467_v27, %v2991_v6  ;;  %v8475_v11 = vmax.f32 %v3000_v21, 0.0  ;;  %v3084_v35 = vrot.slane %v8477_v25, 7  ;;  %v3683_v21 = vrot.slane %v8473_v19, 2 }
 0x4f5   : > { %v6087_v12 = vpop.f32.mrf.mxu1 }
 0x4f6   : > { %v8479_v16 = vmax.f32 %v2992_v54, 0.0  ;;  %v3089_v8 = vrot.slane %v8475_v11, 7  ;;  %v3013_v53 = vadd.f32 %v6087_v12, %v8467_v27  ;;  %v3308_v33 = vpack.c.bf16 %v8475_v11, %v8473_v19  ;;  %v9737_v12 = vld [vmem:[#allocation25_spill] sm:$0xff] }
 0x4f7   : > { %v3004_v42 = vpop.f32.mrf.mxu1  ;;  %v3131_v36 = vsel %vm9725_vm6, 0.0, %v3084_v35  ;;  %vm3856_vm6 = vcmp.eq.s32.totalorder %v8514_v52, 1 }
 0x4f8   : > { %v3085_v57 = vrot.slane %v8479_v16, 7  ;;  %v3005_v56 = vadd.f32 %v8467_v27, %v3004_v42  ;;  %v3307_v37 = vpack.c.bf16 %v8479_v16, %v8477_v25  ;;  %v3090_v29 = vsel %vm9722_vm5, %v3087_v55, %v3089_v8 }
 0x4f9   : > { %v6088_v34 = vpop.f32.mrf.mxu1  ;;  %v3135_v45 = vsel %vm9728_vm9, %v3090_v29, 0.0  ;;  %v8507_v40 = vmax.f32 %v3013_v53, 0.0  ;;  %v3132_v15 = vsel %vm9729_vm13, %v3131_v36, 0.0  ;;  %vm9736_vm5 = vcmp.eq.s32.totalorder %v7316_v9, 1  ;;  %vm9742_vm9 = vmmov %vm9731_vm1 }
 0x4fa   : > { %v3088_v0 = vsel %vm9720_vm8, %v3085_v57, %v3087_v55  ;;  %v3086_v62 = vsel %vm9721_vm0, %v3084_v35, %v3085_v57  ;;  %v8494_v43 = vmax.f32 %v3005_v56, 0.0  ;;  %v3016_v59 = vadd.f32 %v6088_v34, %v8467_v27  ;;  %6117 = vmatprep.mubr.msk.bf16.mxu1 %vm9724_vm7, %v3307_v37  ;;  %vm9735_vm8 = vmmov %vm9731_vm1 }
 0x4fb   : > { %v3007_v61 = vpop.f32.mrf.mxu1  ;;  %v3134_v24 = vsel %vm9723_vm15, %v3088_v0, 0.0  ;;  %6118 = vmatmul.mubr.msk.bf16.vlgmr.msra.gmra.mxu1 %vm9726_vm4, %v3308_v33  ;;  %v3133_v32 = vsel %vm9727_vm2, %v3086_v62, 0.0  ;;  %v3095_v41 = vrot.slane %v8507_v40, 7  ;;  %vm9738_vm15 = vcmp.eq.s32.totalorder %v9737_v12, 1  ;;  %vm9739_vm7 = vmmov %vm9721_vm0  ;;  %v9740_v0 = vld [vmem:[#allocation27_spill] sm:$0xff]  ;;  %v9743_v33 = vld [vmem:[#allocation26_spill] sm:$0xff] }
 0x4fc   : > { %v3008_v22 = vadd.f32 %v8467_v27, %v3007_v61  ;;  %6152 = vmatpush3.bf16.msra.mxu1 %v6435_v47  ;;  %v3149_v13 = vpack.c.bf16 %v3135_v45, %v3134_v24  ;;  %v3091_v20 = vrot.slane %v8494_v43, 7  ;;  %v8516_v48 = vmax.f32 %v3016_v59, 0.0  ;;  %v8579_v45 = vpop.permute.xlu0 %3821 }
 0x4fd   : > { %v6091_v7 = vpop.f32.mrf.mxu1  ;;  %v3148_v4 = vpack.c.bf16 %v3133_v32, %v3132_v15  ;;  %vm3857_vm4 = vcmp.eq.s32.totalorder %v8518_v3, 1  ;;  %vm9741_vm2 = vcmp.eq.s32.totalorder %v9740_v0, 1  ;;  %vm9744_vm13 = vcmp.eq.s32.totalorder %v9743_v33, 1 }
 0x4fe   : > { %v8510_v28 = vmax.f32 %v3008_v22, 0.0  ;;  %v3029_v49 = vadd.f32 %v6091_v7, %v8467_v27  ;;  %v3092_v18 = vsel %vm9732_vm3, %v3089_v8, %v3091_v20  ;;  %v3097_v23 = vrot.slane %v8516_v48, 7  ;;  %vm9748_vm3 = vmmov %vm9735_vm8 }
 0x4ff   : > { %v3020_v1 = vpop.f32.mrf.mxu1  ;;  %6099 = vmatprep.mubr.msk.bf16.mxu0 %vm9730_vm14, %v3148_v4  ;;  %v3310_v46 = vpack.c.bf16 %v8516_v48, %v8507_v40  ;;  %v3136_v54 = vsel %vm9736_vm5, %v3092_v18, 0.0  ;;  %v3680_v22 = vrot.slane %v8477_v25, 2  ;;  %v3681_v7 = vrot.slane %v8479_v16, 2  ;;  %vm9745_vm14 = vmmov %vm9731_vm1  ;;  %v8586_v4 = vpop.permute.xlu1 %3824  ;;  %v9754_v18 = vld [vmem:[#allocation28_spill] sm:$0xff] }
 0x500   : > { %v3093_v39 = vrot.slane %v8510_v28, 7  ;;  %v3021_v63 = vadd.f32 %v8467_v27, %v3020_v1  ;;  %6100 = vmatmul.mubr.msk.bf16.vlgmr.msra.gmra.mxu0 %vm9731_vm1, %v3149_v13  ;;  %v3309_v17 = vpack.c.bf16 %v8510_v28, %v8494_v43  ;;  %v8551_v6 = vmax.f32 %v3029_v49, 0.0  ;;  %vm9746_vm1 = vmmov %vm9721_vm0  ;;  %9747 = vst [vmem:[#allocation25_spill] sm:$0xff] %v8586_v4 }
 0x501   : > { %v6092_v5 = vpop.f32.mrf.mxu1  ;;  %6134 = vmatpush3.bf16.msra.mxu0 %v8461_v30  ;;  %v3098_v56 = vsel %vm9739_vm7, %v3095_v41, %v3097_v23  ;;  %v3462_v1 = vrot.slane %v8479_v16, 1 }
 0x502   : > { %v3032_v14 = vadd.f32 %v6092_v5, %v8467_v27  ;;  %v8532_v51 = vmax.f32 %v3021_v63, 0.0  ;;  %v3094_v31 = vsel %vm9733_vm10, %v3091_v20, %v3093_v39  ;;  %6121 = vmatprep.mubr.msk.bf16.mxu1 %vm9734_vm12, %v3309_v17  ;;  %v3096_v58 = vsel %vm9721_vm0, %v3093_v39, %v3095_v41  ;;  %vm9749_vm10 = vmmov %vm9748_vm3  ;;  %v9752_v17 = vld [vmem:[#allocation29_spill] sm:$0xff] }
 0x503   : > { %v3023_v2 = vpop.f32.mrf.mxu1  ;;  %6122 = vmatmul.mubr.msk.bf16.gmra.mxu1 %vm9735_vm8, %v3310_v46  ;;  %v3137_v57 = vsel %vm9738_vm15, %v3094_v31, 0.0  ;;  %v3138_v9 = vsel %vm9741_vm2, %v3096_v58, 0.0  ;;  %v3139_v24 = vsel %vm9744_vm13, %v3098_v56, 0.0  ;;  %v3103_v13 = vrot.slane %v8551_v6, 7  ;;  %vm9750_vm12 = vmmov %vm9721_vm0  ;;  %v9756_v31 = vld [vmem:[#allocation31_spill] sm:$0xff]  ;;  %v9758_v58 = vld [vmem:[#allocation30_spill] sm:$0xff]  ;;  %v8619_v56 = vpop.permute.xlu0 %3827 }
 0x504   : > { %v3024_v10 = vadd.f32 %v8467_v27, %v3023_v2  ;;  %v8544_v44 = vmax.f32 %v3032_v14, 0.0  ;;  %v3099_v42 = vrot.slane %v8532_v51, 7  ;;  %v3150_v55 = vpack.c.bf16 %v3137_v57, %v3136_v54  ;;  %vm9751_vm8 = vmmov %vm9721_vm0  ;;  %9760 = vst [vmem:[#allocation27_spill] sm:$0xff] %v8619_v56 }
 0x505   : > { %v6095_v60 = vpop.f32.mrf.mxu1  ;;  %v3151_v36 = vpack.c.bf16 %v3139_v24, %v3138_v9  ;;  %v3687_v5 = vrot.slane %v8494_v43, 2  ;;  %vm9753_vm5 = vcmp.eq.s32.totalorder %v9752_v17, 1  ;;  %vm9755_vm15 = vcmp.eq.s32.totalorder %v9754_v18, 1  ;;  %vm9761_vm13 = vmmov %vm9748_vm3  ;;  %v9768_v24 = vld [vmem:[#allocation32_spill] sm:$0xff] }
 0x506   : > { %v8539_v47 = vmax.f32 %v3024_v10, 0.0  ;;  %v3045_v34 = vadd.f32 %v6095_v60, %v8467_v27  ;;  %v3105_v61 = vrot.slane %v8544_v44, 7  ;;  %6103 = vmatprep.mubr.msk.bf16.mxu0 %vm9742_vm9, %v3150_v55  ;;  %v3312_v20 = vpack.c.bf16 %v8544_v44, %v8551_v6 }
 0x507   : > { %v3036_v30 = vpop.f32.mrf.mxu1  ;;  %v3100_v15 = vsel %vm9746_vm1, %v3097_v23, %v3099_v42  ;;  %v3682_v46 = vsel %vm3679_vm11, %v3680_v22, %v3681_v7  ;;  %vm9757_vm7 = vcmp.eq.s32.totalorder %v9756_v31, 1  ;;  %vm9759_vm2 = vcmp.eq.s32.totalorder %v9758_v58, 1  ;;  %vm9763_vm1 = vmmov %vm9721_vm0  ;;  %v9784_v58 = vld [vmem:[#allocation37_spill] sm:$0xff] }
 0x508   : > { %v3037_v8 = vadd.f32 %v8467_v27, %v3036_v30  ;;  %v3311_v37 = vpack.c.bf16 %v8539_v47, %v8532_v51  ;;  %v3101_v62 = vrot.slane %v8539_v47, 7  ;;  %v8589_v39 = vmax.f32 %v3045_v34, 0.0  ;;  %6104 = vmatmul.mubr.msk.bf16.gmra.mxu0 %vm9748_vm3, %v3151_v36 }
 0x509   : > { %v6096_v35 = vpop.f32.mrf.mxu1  ;;  %v3106_v2 = vsel %vm9721_vm0, %v3103_v13, %v3105_v61  ;;  %v3140_v10 = vsel %vm9753_vm5, %v3100_v15, 0.0  ;;  %vm3858_vm9 = vcmp.eq.s32.totalorder %v8541_v26, 1  ;;  %v3685_v36 = vrot.slane %v8475_v11, 2  ;;  %vm9771_vm5 = vmmov %vm9761_vm13 }
 0x50a   : > { %v3048_v53 = vadd.f32 %v6096_v35, %v8467_v27  ;;  %v8571_v29 = vmax.f32 %v3037_v8, 0.0  ;;  %6125 = vmatprep.mubr.msk.bf16.mxu1 %vm9745_vm14, %v3311_v37  ;;  %v3102_v41 = vsel %vm9750_vm12, %v3099_v42, %v3101_v62  ;;  %v3104_v14 = vsel %vm9751_vm8, %v3101_v62, %v3103_v13  ;;  %vm9762_vm14 = vmmov %vm9748_vm3  ;;  %v9766_v62 = vld [vmem:[#allocation33_spill] sm:$0xff] }
 0x50b   : > { %v3039_v59 = vpop.f32.mrf.mxu1  ;;  %6126 = vmatmul.mubr.msk.bf16.gmra.mxu1 %vm9749_vm10, %v3312_v20  ;;  %v3141_v23 = vsel %vm9755_vm15, %v3102_v41, 0.0  ;;  %v3142_v30 = vsel %vm9757_vm7, %v3104_v14, 0.0  ;;  %v3143_v54 = vsel %vm9759_vm2, %v3106_v2, 0.0  ;;  %v3111_v57 = vrot.slane %v8589_v39, 7  ;;  %vm9764_vm3 = vmmov %vm9721_vm0 }
 0x50c   : > { %v3040_v32 = vadd.f32 %v8467_v27, %v3039_v59  ;;  %v8592_v27 = vmax.f32 %v3048_v53, 0.0  ;;  %v3107_v16 = vrot.slane %v8571_v29, 7  ;;  %v3152_v60 = vpack.c.bf16 %v3141_v23, %v3140_v10  ;;  %v8629_v53 = vpop.permute.xlu1 %3830  ;;  %vm9770_vm8 = vmmov %vm9721_vm0  ;;  %v8659_v10 = vpop.permute.xlu0 %3833 }
 0x50d   : > { %v3153_v55 = vpack.c.bf16 %v3143_v54, %v3142_v30  ;;  %v3684_v8 = vsel %vm3679_vm11, %v3681_v7, %v3683_v21  ;;  %v3872_v35 = vsel %vm3856_vm6, %v3682_v46, 0.0  ;;  %9765 = vst [vmem:[#allocation26_spill] sm:$0xff] %v8629_v53  ;;  %v3689_v37 = vrot.slane %v8510_v28, 2  ;;  %vm9772_vm15 = vmmov %vm9763_vm1  ;;  %v9781_v46 = vld [vmem:[#allocation34_spill] sm:$0xff] }
 0x50e   : > { %v8594_v63 = vmax.f32 %v3040_v32, 0.0  ;;  %v3113_v42 = vrot.slane %v8592_v27, 7  ;;  %6107 = vmatprep.mubr.msk.bf16.mxu0 %vm9761_vm13, %v3152_v60  ;;  %v3873_v34 = vsel %vm3857_vm4, %v3684_v8, 0.0  ;;  %v3108_v0 = vsel %vm9763_vm1, %v3105_v61, %v3107_v16  ;;  %vm9773_vm7 = vmmov %vm9771_vm5  ;;  %9780 = vst [vmem:[#allocation29_spill] sm:$0xff] %v8659_v10 }
 0x50f   : > { %vm9767_vm10 = vcmp.eq.s32.totalorder %v9766_v62, 1  ;;  %vm9769_vm12 = vcmp.eq.s32.totalorder %v9768_v24, 1  ;;  %v3461_v7 = vrot.slane %v8477_v25, 1  ;;  %v3314_v61 = vpack.c.bf16 %v8592_v27, %v8589_v39  ;;  %vm9774_vm2 = vmmov %vm9771_vm5  ;;  %v9775_v25 = vld [vmem:[#allocation35_spill] sm:$0xff] }
 0x510   : > { %v3109_v49 = vrot.slane %v8594_v63, 7  ;;  %v3313_v12 = vpack.c.bf16 %v8594_v63, %v8571_v29  ;;  %v3144_v33 = vsel %vm9767_vm10, %v3108_v0, 0.0  ;;  %vm3859_vm0 = vcmp.eq.s32.totalorder %v8548_v38, 1  ;;  %6108 = vmatmul.mubr.msk.bf16.gmra.mxu0 %vm9771_vm5, %v3153_v55  ;;  %v8668_v31 = vpop.permute.xlu1 %3836  ;;  %v8694_v24 = vpop.permute.xlu0 %3839 }
 0x511   : > { %v3691_v13 = vrot.slane %v8507_v40, 2  ;;  %v3888_v20 = vpack.c.bf16 %v3873_v34, %v3872_v35  ;;  %v3114_v15 = vsel %vm9772_vm15, %v3111_v57, %v3113_v42  ;;  %vm9776_vm13 = vcmp.eq.s32.totalorder %v9775_v25, 1  ;;  %9783 = vst [vmem:[#allocation28_spill] sm:$0xff] %v8668_v31  ;;  %9791 = vst [vmem:[#allocation31_spill] sm:$0xff] %v8694_v24  ;;  %v9802_v25 = vld [vmem:[#allocation41_spill] sm:$0xff] }
 0x512   : > { %6129 = vmatprep.mubr.msk.bf16.mxu1 %vm9762_vm14, %v3313_v12  ;;  %v3110_v9 = vsel %vm9764_vm3, %v3107_v16, %v3109_v49  ;;  %v3112_v22 = vsel %vm9770_vm8, %v3109_v49, %v3111_v57  ;;  %v3688_v16 = vsel %vm3679_vm11, %v3685_v36, %v3687_v5  ;;  %vm9777_vm14 = vcmask 1046528   ;;  %v9786_v12 = vld [vmem:[#allocation36_spill] sm:$0xff] }
 0x513   : > { %v3145_v59 = vsel %vm9769_vm12, %v3110_v9, 0.0  ;;  %6130 = vmatmul.mubr.msk.bf16.gmra.mxu1 %vm9773_vm7, %v3314_v61  ;;  %v3146_v41 = vsel %vm9776_vm13, %v3112_v22, 0.0  ;;  %v3463_v14 = vsel %vm9777_vm14, %v3461_v7, %v3462_v1  ;;  %vm9778_vm1 = vmmov %vm9777_vm14  ;;  %vm3860_vm3 = vcmp.eq.s32.totalorder %v8579_v45, 1 }
 0x514   : > { %v3154_v32 = vpack.c.bf16 %v3145_v59, %v3144_v33  ;;  %v3465_v2 = vsel %vm9778_vm1, %v3462_v1, %v3464_v50  ;;  %vm9488_vm10 = vcmp.eq.s32.totalorder %v8586_v4, 1  ;;  %vm9779_vm12 = vmmov %vm9774_vm2  ;;  %v3690_v49 = vsel %vm3679_vm11, %v3687_v5, %v3689_v37  ;;  %v8703_v59 = vpop.permute.xlu1 %3842 }
 0x515   : > { %6153 = vmatprep.mubr.msk.bf16.mxu1 %vm9779_vm12, %v3888_v20  ;;  %v3692_v17 = vsel %vm3679_vm11, %v3689_v37, %v3691_v13  ;;  %v3466_v18 = vrot.slane %v8475_v11, 1  ;;  %v3686_v23 = vsel %vm3679_vm11, %v3683_v21, %v3685_v36  ;;  %v3468_v1 = vrot.slane %v8494_v43, 1  ;;  %vm9788_vm7 = vmmov %vm9778_vm1  ;;  %9796 = vst [vmem:[#allocation30_spill] sm:$0xff] %v8703_v59  ;;  %v9798_v36 = vld [vmem:[#allocation39_spill] sm:$0xff] }
 0x516   : > { %6111 = vmatprep.mubr.msk.bf16.mxu0 %vm9774_vm2, %v3154_v32  ;;  %vm9782_vm8 = vcmp.eq.s32.totalorder %v9781_v46, 1  ;;  %v3875_v5 = vsel %vm3859_vm0, %v3688_v16, 0.0  ;;  %vm9785_vm5 = vcmp.eq.s32.totalorder %v9784_v58, 1  ;;  %vm9787_vm15 = vcmp.eq.s32.totalorder %v9786_v12, 1  ;;  %vm9789_vm2 = vmmov %vm9778_vm1  ;;  %v9800_v32 = vld [vmem:[#allocation38_spill] sm:$0xff] }
 0x517   : > { %v3147_v60 = vsel %vm9782_vm8, %v3114_v15, 0.0  ;;  %v3509_v54 = vsel %vm9785_vm5, %v3463_v14, 0.0  ;;  %v3510_v11 = vsel %vm9787_vm15, %v3465_v2, 0.0  ;;  %v3470_v57 = vrot.slane %v8510_v28, 1  ;;  %vm9790_vm13 = vmmov %vm9779_vm12  ;;  %v9804_v14 = vld [vmem:[#allocation40_spill] sm:$0xff] }
 0x518   : > { %v3155_v30 = vpack.c.bf16 %v3147_v60, %v3146_v41  ;;  %v3695_v21 = vrot.slane %v8532_v51, 2  ;;  %v3876_v43 = vsel %vm3860_vm3, %v3690_v49, 0.0  ;;  %v3877_v42 = vsel %vm9488_vm10, %v3692_v17, 0.0  ;;  %vm9792_vm1 = vmmov %vm9779_vm12  ;;  %v8736_v12 = vpop.permute.xlu1 %3848 }
 0x519   : > { %v3874_v55 = vsel %vm3858_vm9, %v3686_v23, 0.0  ;;  %v3697_v8 = vrot.slane %v8539_v47, 2  ;;  %v3472_v35 = vrot.slane %v8507_v40, 1  ;;  %v3693_v0 = vrot.slane %v8516_v48, 2  ;;  %vm9793_vm12 = vmmov %vm9792_vm1  ;;  %9807 = vst [vmem:[#allocation32_spill] sm:$0xff] %v8736_v12 }
 0x51a   : > { %v3889_v34 = vpack.c.bf16 %v3875_v5, %v3874_v55  ;;  %v3525_v9 = vpack.c.bf16 %v3510_v11, %v3509_v54  ;;  %v3467_v28 = vsel %vm9788_vm7, %v3464_v50, %v3466_v18  ;;  %v3469_v37 = vsel %vm9789_vm2, %v3466_v18, %v3468_v1  ;;  %6112 = vmatmul.mubr.msk.bf16.gmra.mxu0 %vm9790_vm13, %v3155_v30  ;;  %vm9794_vm8 = vmmov %vm9789_vm2  ;;  %v8731_v5 = vpop.permute.xlu0 %3845 }
 0x51b   : > { %v3699_v62 = vrot.slane %v8551_v6, 2  ;;  %v3890_v33 = vpack.c.bf16 %v3877_v42, %v3876_v43  ;;  %vm9486_vm14 = vcmp.eq.s32.totalorder %v8619_v56, 1  ;;  %v3471_v40 = vsel %vm9794_vm8, %v3468_v1, %v3470_v57  ;;  %vm9795_vm5 = vmmov %vm9789_vm2  ;;  %9806 = vst [vmem:[#allocation33_spill] sm:$0xff] %v8731_v5 }
 0x51c   : > { %6135 = vmatprep.mubr.msk.bf16.mxu0 %vm9792_vm1, %v3525_v9  ;;  %6154 = vmatmul.mubr.msk.bf16.vlgmr.msra.gmra.mxu1 %vm9793_vm12, %v3889_v34  ;;  %v3473_v19 = vsel %vm9795_vm5, %v3470_v57, %v3472_v35  ;;  %v3696_v50 = vsel %vm3679_vm11, %v3693_v0, %v3695_v21  ;;  %vm9487_vm15 = vcmp.eq.s32.totalorder %v8629_v53, 1  ;;  %vm9485_vm7 = vcmp.eq.s32.totalorder %v8659_v10, 1  ;;  %vm9797_vm2 = vmmov %vm9792_vm1 }
 0x51d   : > { %6157 = vmatprep.mubr.msk.bf16.mxu1 %vm9797_vm2, %v3890_v33  ;;  %v3698_v22 = vsel %vm3679_vm11, %v3695_v21, %v3697_v8  ;;  %v3700_v7 = vsel %vm3679_vm11, %v3697_v8, %v3699_v62  ;;  %vm9484_vm13 = vcmp.eq.s32.totalorder %v8668_v31, 1  ;;  %vm9799_vm1 = vcmp.eq.s32.totalorder %v9798_v36, 1  ;;  %v9818_v33 = vld [vmem:[#allocation45_spill] sm:$0xff] }
 0x51e   : > { %v3511_v61 = vsel %vm9799_vm1, %v3467_v28, 0.0  ;;  %vm9801_vm12 = vcmp.eq.s32.totalorder %v9800_v32, 1  ;;  %v3694_v15 = vsel %vm3679_vm11, %v3691_v13, %v3693_v0  ;;  %v3476_v16 = vrot.slane %v8532_v51, 1  ;;  %v9816_v0 = vld [vmem:[#allocation42_spill] sm:$0xff] }
 0x51f   : > { %v3512_v20 = vsel %vm9801_vm12, %v3469_v37, 0.0  ;;  %vm9803_vm8 = vcmp.eq.s32.totalorder %v9802_v25, 1  ;;  %vm9805_vm5 = vcmp.eq.s32.totalorder %v9804_v14, 1  ;;  %v3879_v49 = vsel %vm9487_vm15, %v3696_v50, 0.0 }
 0x520   : > { %v3513_v41 = vsel %vm9803_vm8, %v3471_v40, 0.0  ;;  %v3514_v2 = vsel %vm9805_vm5, %v3473_v19, 0.0  ;;  %v3478_v17 = vrot.slane %v8539_v47, 1  ;;  %v3703_v18 = vrot.slane %v8571_v29, 2  ;;  %v9820_v19 = vld [vmem:[#allocation44_spill] sm:$0xff] }
 0x521   : > { %v3880_v23 = vsel %vm9485_vm7, %v3698_v22, 0.0  ;;  %v3881_v13 = vsel %vm9484_vm13, %v3700_v7, 0.0  ;;  %v3526_v51 = vpack.c.bf16 %v3512_v20, %v3511_v61  ;;  %v3474_v1 = vrot.slane %v8516_v48, 1  ;;  %v9822_v7 = vld [vmem:[#allocation43_spill] sm:$0xff] }
 0x522   : > { %v3705_v46 = vrot.slane %v8594_v63, 2  ;;  %v3878_v60 = vsel %vm9486_vm14, %v3694_v15, 0.0  ;;  %v3480_v47 = vrot.slane %v8551_v6, 1  ;;  %v3701_v30 = vrot.slane %v8544_v44, 2 }
 0x523   : > { %v3527_v58 = vpack.c.bf16 %v3514_v2, %v3513_v41  ;;  %v3891_v54 = vpack.c.bf16 %v3879_v49, %v3878_v60  ;;  %vm3866_vm2 = vcmp.eq.s32.totalorder %v8694_v24, 1  ;;  %v3707_v11 = vrot.slane %v8589_v39, 2  ;;  %v8777_v41 = vpop.permute.xlu1 %3854  ;;  %v9836_v60 = vld [vmem:[#allocation48_spill] sm:$0xff] }
 0x524   : > { %vm9808_vm1 = vcmask 130048   ;;  %v3892_v48 = vpack.c.bf16 %v3881_v13, %v3880_v23  ;;  %vm9809_vm12 = vcmask 1046528   ;;  %vm3867_vm8 = vcmp.eq.s32.totalorder %v8703_v59, 1  ;;  %9825 = vst [vmem:[#allocation34_spill] sm:$0xff] %v8777_v41  ;;  %v9832_v13 = vld [vmem:[#allocation46_spill] sm:$0xff] }
 0x525   : > { %6136 = vmatmul.mubr.msk.bf16.vlgmr.msra.gmra.mxu0 %vm9808_vm1, %v3526_v51  ;;  %v3477_v57 = vsel %vm9809_vm12, %v3474_v1, %v3476_v16  ;;  %vm9810_vm5 = vmmov %vm9808_vm1  ;;  %v3704_v43 = vsel %vm3679_vm11, %v3701_v30, %v3703_v18  ;;  %vm9490_vm15 = vcmp.eq.s32.totalorder %v8731_v5, 1  ;;  %v3706_v55 = vsel %vm3679_vm11, %v3703_v18, %v3705_v46 }
 0x526   : > { %6139 = vmatprep.mubr.msk.bf16.mxu0 %vm9810_vm5, %v3527_v58  ;;  %vm9811_vm13 = vmmov %vm9808_vm1  ;;  %v3708_v8 = vsel %vm3679_vm11, %v3705_v46, %v3707_v11  ;;  %v3484_v34 = vrot.slane %v8571_v29, 1  ;;  %v3702_v28 = vsel %vm3679_vm11, %v3699_v62, %v3701_v30  ;;  %v3709_v37 = vrot.slane %v8592_v27, 2 }
 0x527   : > { %6158 = vmatmul.mubr.msk.bf16.gmra.mxu1 %vm9811_vm13, %v3891_v54  ;;  %vm9812_vm7 = vmmov %vm9809_vm12  ;;  %vm9489_vm12 = vcmp.eq.s32.totalorder %v8736_v12, 1  ;;  %v3883_v50 = vsel %vm3867_vm8, %v3704_v43, 0.0  ;;  %v3486_v22 = vrot.slane %v8594_v63, 1  ;;  %vm9823_vm13 = vcmp.eq.s32.totalorder %v9822_v7, 1  ;;  %v8775_v63 = vpop.permute.xlu0 %3851  ;;  %v9838_v54 = vld [vmem:[#allocation47_spill] sm:$0xff] }
 0x528   : > { %v3479_v6 = vsel %vm9812_vm7, %v3476_v16, %v3478_v17  ;;  %vm9813_vm14 = vmmov %vm9812_vm7  ;;  %v3884_v36 = vsel %vm9490_vm15, %v3706_v55, 0.0  ;;  %v3885_v62 = vsel %vm9489_vm12, %v3708_v8, 0.0  ;;  %v3482_v61 = vrot.slane %v8544_v44, 1  ;;  %9824 = vst [vmem:[#allocation35_spill] sm:$0xff] %v8775_v63  ;;  %v9843_v43 = vld [vmem:[#allocation51_spill] sm:$0xff]  ;;  %v9845_v55 = vld [vmem:[#allocation50_spill] sm:$0xff] }
 0x529   : > { %v3481_v21 = vsel %vm9813_vm14, %v3478_v17, %v3480_v47  ;;  %vm9814_vm10 = vmmov %vm9808_vm1  ;;  %vm9819_vm14 = vcmp.eq.s32.totalorder %v9818_v33, 1  ;;  %v3882_v20 = vsel %vm3866_vm2, %v3702_v28, 0.0  ;;  %v3488_v15 = vrot.slane %v8589_v39, 1  ;;  %v6438_v28 = vld [vmem:[#allocation13] sm:$0xff]   ;;  %v8814_v33 = vld [vmem:[#allocation13 + $0x28] sm:$0xff]  }
 0x52a   : > { %6161 = vmatprep.mubr.msk.bf16.mxu1 %vm9814_vm10, %v3892_v48  ;;  %vm9815_vm1 = vmmov %vm9812_vm7  ;;  %vm9817_vm7 = vcmp.eq.s32.totalorder %v9816_v0, 1  ;;  %v3517_v40 = vsel %vm9819_vm14, %v3479_v6, 0.0  ;;  %vm9821_vm10 = vcmp.eq.s32.totalorder %v9820_v19, 1  ;;  %v3893_v25 = vpack.c.bf16 %v3883_v50, %v3882_v20  ;;  %v6436_v0 = vld [vmem:[#allocation13 + $0x8] sm:$0xff]  }
 0x52b   : > { %v3475_v42 = vsel %vm9815_vm1, %v3472_v35, %v3474_v1  ;;  %v3516_v9 = vsel %vm9817_vm7, %v3477_v57, 0.0  ;;  %v3518_v35 = vsel %vm9821_vm10, %v3481_v21, 0.0  ;;  %v3894_v14 = vpack.c.bf16 %v3885_v62, %v3884_v36  ;;  %vm9826_vm7 = vmmov %vm9810_vm5  ;;  %v9834_v1 = vld [vmem:[#allocation49_spill] sm:$0xff]  ;;  %6169 = vmatprep.subr.bf16.mxu0 %v6436_v0 }
 0x52c   : > { %v3515_v29 = vsel %vm9823_vm13, %v3475_v42, 0.0  ;;  %v3529_v16 = vpack.c.bf16 %v3518_v35, %v3517_v40  ;;  %v3485_v2 = vsel %vm9815_vm1, %v3482_v61, %v3484_v34  ;;  %vm9827_vm14 = vmmov %vm9810_vm5  ;;  %v3710_v39 = vsel %vm3679_vm11, %v3707_v11, %v3709_v37  ;;  %6170 = vmatpush3.bf16.msra.mxu0 %v6436_v0  ;;  %v8816_v40 = vld [vmem:[#allocation13 + $0x38] sm:$0xff]  }
 0x52d   : > { %v3528_v32 = vpack.c.bf16 %v3516_v9, %v3515_v29  ;;  %vm9828_vm10 = vmmov %vm9815_vm1  ;;  %v3727_v17 = vsel %vm3679_vm11, %v3709_v37, 0.0  ;;  %v3490_v23 = vrot.slane %v8592_v27, 1  ;;  %v6437_v9 = vld [vmem:[#allocation13 + $0x18] sm:$0xff]   ;;  %v6439_v37 = vld [vmem:[#allocation13 + $0x10] sm:$0xff]   ;;  %6171 = vmatprep.subr.bf16.mxu0 %v6438_v28 }
 0x52e   : > { %v3487_v44 = vsel %vm9828_vm10, %v3484_v34, %v3486_v22  ;;  %vm9829_vm13 = vmmov %vm9815_vm1  ;;  %vm9837_vm10 = vcmp.eq.s32.totalorder %v9836_v60, 1  ;;  %6189 = vmatprep.subr.bf16.mxu1 %v6437_v9  ;;  %v8846_v60 = vpop.permute.xlu1 %4602 }
 0x52f   : > { %6140 = vmatmul.mubr.msk.bf16.gmra.mxu0 %vm9810_vm5, %v3528_v32  ;;  %6162 = vmatmul.mubr.msk.bf16.gmra.mxu1 %vm9827_vm14, %v3893_v25  ;;  %v3489_v49 = vsel %vm9829_vm13, %v3486_v22, %v3488_v15  ;;  %vm9830_vm12 = vmmov %vm9810_vm5  ;;  %vm9491_vm5 = vcmp.eq.s32.totalorder %v8775_v63, 1  ;;  %vm9835_vm14 = vcmp.eq.s32.totalorder %v9834_v1, 1  ;;  %v3491_v6 = vsel %vm9829_vm13, %v3488_v15, %v3490_v23  ;;  %v8842_v1 = vpop.permute.xlu0 %4599  ;;  %9849 = vst [vmem:[#allocation36_spill] sm:$0xff] %v8846_v60 }
 0x530   : > { %6143 = vmatprep.mubr.msk.bf16.mxu0 %vm9826_vm7, %v3529_v16  ;;  %6165 = vmatprep.mubr.msk.bf16.mxu1 %vm9830_vm12, %v3894_v14  ;;  %vm9831_vm15 = vmmov %vm9815_vm1  ;;  %vm9492_vm1 = vcmp.eq.s32.totalorder %v8777_v41, 1  ;;  %vm9833_vm7 = vcmp.eq.s32.totalorder %v9832_v13, 1  ;;  %v3521_v46 = vsel %vm9835_vm14, %v3487_v44, 0.0  ;;  %v3522_v30 = vsel %vm9837_vm10, %v3489_v49, 0.0  ;;  %9848 = vst [vmem:[#allocation37_spill] sm:$0xff] %v8842_v1 }
 0x531   : > { %v3483_v18 = vsel %vm9831_vm15, %v3480_v47, %v3482_v61  ;;  %v3520_v51 = vsel %vm9833_vm7, %v3485_v2, 0.0  ;;  %v3886_v58 = vsel %vm9491_vm5, %v3710_v39, 0.0  ;;  %v3887_v47 = vsel %vm9492_vm1, %v3727_v17, 0.0  ;;  %vm9840_vm7 = vmmov %vm9829_vm13  ;;  %6190 = vmatpush3.bf16.msra.mxu1 %v6437_v9  ;;  %6172 = vmatpush3.bf16.msra.mxu0 %v6438_v28 }
 0x532   : > { %vm9839_vm15 = vcmp.eq.s32.totalorder %v9838_v54, 1  ;;  %v3531_v27 = vpack.c.bf16 %v3522_v30, %v3521_v46  ;;  %v3895_v57 = vpack.c.bf16 %v3887_v47, %v3886_v58  ;;  %v3508_v21 = vsel %vm9840_vm7, %v3490_v23, 0.0  ;;  %vm9841_vm14 = vmmov %vm9830_vm12  ;;  %6191 = vmatprep.subr.bf16.mxu1 %v6439_v37  ;;  %6209 = vmatprep.subr.bf16.mxu0 %v8814_v33 }
 0x533   : > { %v3519_v11 = vsel %vm9839_vm15, %v3483_v18, 0.0  ;;  %vm9842_vm10 = vmmov %vm9830_vm12  ;;  %vm9844_vm5 = vcmp.eq.s32.totalorder %v9843_v43, 1  ;;  %vm9846_vm1 = vcmp.eq.s32.totalorder %v9845_v55, 1  ;;  %v8867_v43 = vld [vmem:[%s9395_s13] ss:$0 sm:$0xff] }
 0x534   : > { %v3530_v48 = vpack.c.bf16 %v3520_v51, %v3519_v11  ;;  %v3523_v42 = vsel %vm9844_vm5, %v3491_v6, 0.0  ;;  %v3524_v8 = vsel %vm9846_vm1, %v3508_v21, 0.0  ;;  %vm9847_vm15 = vmmov %vm9842_vm10  ;;  %vm4083_vm5 = vcmask 261120  }
 0x535   : > { %v3532_v34 = vpack.c.bf16 %v3524_v8, %v3523_v42  ;;  %6192 = vmatpush3.bf16.msra.mxu1 %v6439_v37 }
 0x536   : > { %6229 = vmatprep.subr.bf16.mxu1 %v8816_v40  ;;  %v9857_v45 = vld [vmem:[#allocation36_spill] sm:$0xff] }
 0x537   : > { %6144 = vmatmul.mubr.msk.bf16.gmra.mxu0 %vm9830_vm12, %v3530_v48  ;;  %6166 = vmatmul.mubr.msk.bf16.gmra.mxu1 %vm9842_vm10, %v3895_v57  ;;  %v8856_v48 = vpop.permute.xlu0 %4605  ;;  %v8860_v57 = vpop.permute.xlu1 %4608 }
 0x538   : > { %6147 = vmatprep.mubr.msk.bf16.mxu0 %vm9841_vm14, %v3531_v27  ;;  %9850 = vst [vmem:[#allocation39_spill] sm:$0xff] %v8856_v48  ;;  %9851 = vst [vmem:[#allocation38_spill] sm:$0xff] %v8860_v57 }
 0x53b   : > { %v8872_v0 = vpop.permute.xlu0 %4970  ;;  %v8875_v37 = vpop.permute.xlu1 %4973 }
 0x53c   : > { %9852 = vst [vmem:[#allocation41_spill] sm:$0xff] %v8872_v0  ;;  %9853 = vst [vmem:[#allocation40_spill] sm:$0xff] %v8875_v37 }
 0x53f   : > { %6148 = vmatmul.mubr.msk.bf16.gmra.mxu0 %vm9847_vm15, %v3532_v34 }
 0x5bb   : > { %v6119_v19 = vpop.f32.mrf.mxu1 }
 0x5bd   : > { %v3382_v35 = vpop.f32.mrf.mxu1 }
 0x5bf   : > { %v6120_v50 = vpop.f32.mrf.mxu1 }
 0x5c0   : > { %v6101_v22 = vpop.f32.mrf.mxu0 }
 0x5c1   : > { %v3385_v7 = vpop.f32.mrf.mxu1  ;;  %v3293_v9 = vadd.f32 %v6101_v22, %v8867_v43  ;;  %v8882_v22 = vpop.permute.xlu0 %4976 }
 0x5c2   : > { %v3222_v29 = vpop.f32.mrf.mxu0 }
 0x5c3   : > { %v8820_v36 = vpop.f32.mrf.mxu1  ;;  %v3291_v41 = vadd.f32 %v8867_v43, %v3222_v29  ;;  %v3447_v48 = vadd.f32 %v6119_v19, %v3293_v9  ;;  %v8884_v29 = vpop.permute.xlu1 %4979 }
 0x5c4   : > { %v6102_v62 = vpop.f32.mrf.mxu0 }
 0x5c5   : > { %v3398_v61 = vpop.f32.mrf.mxu1  ;;  %v3294_v8 = vadd.f32 %v6102_v62, %v8867_v43  ;;  %v3445_v31 = vadd.f32 %v3382_v35, %v3291_v41 }
 0x5c6   : > { %v3225_v32 = vpop.f32.mrf.mxu0 }
 0x5c7   : > { %v8822_v20 = vpop.f32.mrf.mxu1  ;;  %v3292_v12 = vadd.f32 %v8867_v43, %v3225_v32  ;;  %v3448_v24 = vadd.f32 %v6120_v50, %v3294_v8 }
 0x5c8   : > { %v6105_v16 = vpop.f32.mrf.mxu0 }
 0x5c9   : > { %v8824_v15 = vpop.f32.mrf.mxu1  ;;  %v3446_v37 = vadd.f32 %v3385_v7, %v3292_v12  ;;  %v3297_v19 = vadd.f32 %v6105_v16, %v8867_v43  ;;  %v8897_v16 = vpop.permute.xlu1 %4614 }
 0x5ca   : > { %v3238_v14 = vpop.f32.mrf.mxu0 }
 0x5cb   : > { %v8826_v25 = vpop.f32.mrf.mxu1  ;;  %v3295_v62 = vadd.f32 %v8867_v43, %v3238_v14 }
 0x5cc   : > { %v6106_v44 = vpop.f32.mrf.mxu0 }
 0x5cd   : > { %v8828_v2 = vpop.f32.mrf.mxu1  ;;  %v3449_v8 = vadd.f32 %v3398_v61, %v3295_v62 }
 0x5ce   : > { %v3241_v39 = vpop.f32.mrf.mxu0 }
 0x5cf   : > { %v8830_v49 = vpop.f32.mrf.mxu1  ;;  %v3296_v12 = vadd.f32 %v8867_v43, %v3241_v39 }
 0x5d0   : > { %v8834_v18 = vpop.f32.mrf.mxu0 }
 0x5d1   : > { %v8832_v17 = vpop.f32.mrf.mxu1 }
 0x5d2   : > { %v8838_v13 = vpop.f32.mrf.mxu0 }
 0x5d3   : > { %v8836_v23 = vpop.f32.mrf.mxu1 }
 0x5d4   : > { %v8844_v46 = vpop.f32.mrf.mxu0 }
 0x5d5   : > { %v8840_v51 = vpop.f32.mrf.mxu1 }
 0x5d6   : > { %v8850_v58 = vpop.f32.mrf.mxu0 }
 0x5d7   : > { %v8848_v30 = vpop.f32.mrf.mxu1 }
 0x5d9   : > { %v8852_v47 = vpop.f32.mrf.mxu1 }
 0x5da   : > { %v8854_v54 = vpop.f32.mrf.mxu0 }
 0x5dc   : > { %v6155_v11 = vpop.f32.mrf.mxu1  ;;  %v8858_v27 = vpop.f32.mrf.mxu0 }
 0x5de   : > { %v3963_v6 = vpop.f32.mrf.mxu1  ;;  %v8862_v21 = vpop.f32.mrf.mxu0 }
 0x5e0   : > { %v6156_v42 = vpop.f32.mrf.mxu1  ;;  %v8869_v55 = vpop.f32.mrf.mxu0 }
 0x5e2   : > { %v3966_v34 = vpop.f32.mrf.mxu1 }
 0x5e5   : > { %v6137_v28 = vpop.f32.mrf.mxu0 }
 0x5e6   : > { %v3665_v56 = vadd.f32 %v6137_v28, %v3447_v48 }
 0x5e7   : > { %v8878_v63 = vpop.f32.mrf.mxu1  ;;  %v3600_v5 = vpop.f32.mrf.mxu0 }
 0x5e8   : > { %v3663_v60 = vadd.f32 %v3600_v5, %v3445_v31  ;;  %v4028_v41 = vadd.f32 %v6155_v11, %v3665_v56 }
 0x5e9   : > { %v3979_v59 = vpop.f32.mrf.mxu1  ;;  %v6138_v57 = vpop.f32.mrf.mxu0 }
 0x5ea   : > { %v3666_v0 = vadd.f32 %v6138_v57, %v3448_v24  ;;  %v3298_v24 = vadd.f32 %v6106_v44, %v8867_v43  ;;  %v4026_v7 = vadd.f32 %v3963_v6, %v3663_v60  ;;  %v3451_v44 = vadd.f32 %v8820_v36, %v3297_v19 }
 0x5eb   : > { %v6160_v10 = vpop.f32.mrf.mxu1  ;;  %v3603_v53 = vpop.f32.mrf.mxu0  ;;  %v8904_v39 = vmax.f32 %v4028_v41, 0.0 }
 0x5ec   : > { %v4029_v32 = vadd.f32 %v6156_v42, %v3666_v0  ;;  %v3664_v4 = vadd.f32 %v3603_v53, %v3446_v37  ;;  %v8895_v53 = vpop.permute.xlu0 %4611  ;;  %v3452_v60 = vadd.f32 %v8822_v20, %v3298_v24  ;;  %v8907_v6 = vmax.f32 %v4026_v7, 0.0  ;;  %v8926_v41 = vpop.permute.xlu1 %4620 }
 0x5ed   : > { %v3982_v1 = vpop.f32.mrf.mxu1  ;;  %v3301_v0 = vadd.f32 %v8834_v18, %v8867_v43 }
 0x5ee   : > { %v4027_v35 = vadd.f32 %v3966_v34, %v3664_v4  ;;  %v8891_v57 = vmax.f32 %v4029_v32, 0.0  ;;  %v3299_v4 = vadd.f32 %v8867_v43, %v8838_v13  ;;  %v3450_v34 = vadd.f32 %v8824_v15, %v3296_v12  ;;  %v6442_v12 = vld [vmem:[#allocation13 + $0x20] sm:$0xff]  }
 0x5ef   : > { %v6141_v50 = vpop.f32.mrf.mxu0  ;;  %v8887_v9 = vpop.f32.mrf.mxu1  ;;  %v3302_v13 = vadd.f32 %v8844_v46, %v8867_v43  ;;  %v3300_v15 = vadd.f32 %v8867_v43, %v8850_v58  ;;  %v4243_v46 = vrot.slane %v8907_v6, 2 }
 0x5f0   : > { %v8899_v61 = vmax.f32 %v4027_v35, 0.0  ;;  %v3669_v42 = vadd.f32 %v6141_v50, %v3451_v44  ;;  %v4248_v28 = vrot.slane %v8891_v57, 2  ;;  %v4246_v50 = vrot.slane %v8904_v39, 2  ;;  %v8924_v24 = vpop.permute.xlu0 %4617  ;;  %v8961_v26 = vpop.permute.xlu1 %4985 }
 0x5f1   : > { %v3616_v14 = vpop.f32.mrf.mxu0  ;;  %v8893_v5 = vpop.f32.mrf.mxu1  ;;  %v3453_v19 = vadd.f32 %v8828_v2, %v3299_v4  ;;  %v4060_v35 = vpack.c.bf16 %v8891_v57, %v8904_v39  ;;  %v3455_v4 = vadd.f32 %v8826_v25, %v3301_v0  ;;  %v3303_v25 = vadd.f32 %v8867_v43, %v8858_v27 }
 0x5f2   : > { %v3667_v48 = vadd.f32 %v3616_v14, %v3449_v8  ;;  %v4244_v20 = vrot.slane %v8899_v61, 2  ;;  %v4059_v18 = vpack.c.bf16 %v8899_v61, %v8907_v6  ;;  %v4032_v14 = vadd.f32 %v8878_v63, %v3669_v42 }
 0x5f3   : > { %v6142_v31 = vpop.f32.mrf.mxu0  ;;  %v6164_v37 = vpop.f32.mrf.mxu1  ;;  %v4249_v7 = vsel %vm3679_vm11, %v4246_v50, %v4248_v28 }
 0x5f4   : > { %v4030_v56 = vadd.f32 %v3979_v59, %v3667_v48  ;;  %v3670_v36 = vadd.f32 %v6142_v31, %v3452_v60  ;;  %6173 = vmatprep.mubr.msk.bf16.mxu0 %vm4083_vm5, %v4059_v18  ;;  %v4245_v63 = vsel %vm3679_vm11, %v4243_v46, %v4244_v20  ;;  %v4247_v42 = vsel %vm3679_vm11, %v4244_v20, %v4246_v50  ;;  %v8959_v27 = vpop.permute.xlu0 %4982 }
 0x5f5   : > { %v3619_v11 = vpop.f32.mrf.mxu0  ;;  %v3998_v2 = vpop.f32.mrf.mxu1  ;;  %6174 = vmatmul.mubr.msk.bf16.vlgmr.msra.gmra.mxu0 %vm4083_vm5, %v4060_v35  ;;  %v4293_v0 = vsel %vm3858_vm9, %v4249_v7, 0.0  ;;  %v4292_v38 = vsel %vm3857_vm4, %v4247_v42, 0.0  ;;  %v3304_v46 = vadd.f32 %v8867_v43, %v8869_v55 }
 0x5f6   : > { %v8916_v62 = vmax.f32 %v4030_v56, 0.0  ;;  %v3668_v32 = vadd.f32 %v3619_v11, %v3450_v34  ;;  %v4033_v48 = vadd.f32 %v6160_v10, %v3670_v36  ;;  %v3305_v11 = vadd.f32 %v8854_v54, %v8867_v43  ;;  %6210 = vmatpush3.bf16.msra.mxu0 %v8814_v33 }
 0x5f7   : > { %v6145_v59 = vpop.f32.mrf.mxu0  ;;  %v3456_v10 = vadd.f32 %v8830_v49, %v3302_v13  ;;  %6211 = vmatprep.subr.bf16.mxu0 %v6442_v12  ;;  %v6167_v13 = vpop.f32.mrf.mxu1 }
 0x5f8   : > { %v4250_v58 = vrot.slane %v8916_v62, 2  ;;  %v4031_v31 = vadd.f32 %v3982_v1, %v3668_v32  ;;  %v3454_v1 = vadd.f32 %v8832_v17, %v3300_v15  ;;  %v8953_v36 = vmax.f32 %v4033_v48, 0.0 }
 0x5f9   : > { %v3632_v8 = vpop.f32.mrf.mxu0  ;;  %v3673_v33 = vadd.f32 %v6145_v59, %v3455_v4  ;;  %v4291_v17 = vsel %vm3856_vm6, %v4245_v63, 0.0  ;;  %v3459_v59 = vadd.f32 %v8836_v23, %v3305_v11  ;;  %v4011_v48 = vpop.f32.mrf.mxu1  ;;  %vm4469_vm6 = vcmask 1043456  }
 0x5fa   : > { %v4251_v56 = vsel %vm3679_vm11, %v4248_v28, %v4250_v58  ;;  %v3671_v60 = vadd.f32 %v3632_v8, %v3453_v19  ;;  %v8949_v28 = vmax.f32 %v4032_v14, 0.0  ;;  %v8955_v49 = vmax.f32 %v4031_v31, 0.0  ;;  %6212 = vmatpush3.bf16.msra.mxu0 %v6442_v12 }
 0x5fb   : > { %v6146_v44 = vpop.f32.mrf.mxu0  ;;  %v4294_v54 = vsel %vm3859_vm0, %v4251_v56, 0.0  ;;  %v3306_v8 = vadd.f32 %v8862_v21, %v8867_v43  ;;  %v4307_v35 = vpack.c.bf16 %v4292_v38, %v4291_v17  ;;  %v4036_v3 = vadd.f32 %v8887_v9, %v3673_v33  ;;  %v9854_v17 = vld [vmem:[#allocation25_spill] sm:$0xff] }
 0x5fc   : > { %v4034_v32 = vadd.f32 %v8893_v5, %v3671_v60  ;;  %v3674_v15 = vadd.f32 %v6146_v44, %v3456_v10  ;;  %v4308_v18 = vpack.c.bf16 %v4294_v54, %v4293_v0  ;;  %v4252_v19 = vrot.slane %v8955_v49, 2  ;;  %v6443_v44 = vld [vmem:[#allocation13 + $0x30] sm:$0xff]  }
 0x5fd   : > { %v3635_v34 = vpop.f32.mrf.mxu0  ;;  %v3457_v5 = vadd.f32 %v8840_v51, %v3303_v25  ;;  %v4061_v31 = vpack.c.bf16 %v8955_v49, %v8916_v62  ;;  %v4254_v12 = vrot.slane %v8949_v28, 2  ;;  %v4062_v21 = vpack.c.bf16 %v8953_v36, %v8949_v28  ;;  %6193 = vmatprep.mubr.msk.bf16.mxu1 %vm4083_vm5, %v4307_v35 }
 0x5fe   : > { %v3672_v50 = vadd.f32 %v3635_v34, %v3454_v1  ;;  %v4037_v14 = vadd.f32 %v6164_v37, %v3674_v15  ;;  %v8979_v56 = vmax.f32 %v4034_v32, 0.0  ;;  %6194 = vmatmul.mubr.msk.bf16.vlgmr.msra.gmra.mxu1 %vm4083_vm5, %v4308_v18  ;;  %v4253_v9 = vsel %vm3679_vm11, %v4250_v58, %v4252_v19  ;;  %v8987_v37 = vpop.permute.xlu0 %4988  ;;  %v6168_v58 = vpop.f32.mrf.mxu1  ;;  %v9856_v32 = vld [vmem:[#allocation37_spill] sm:$0xff] }
 0x5ff   : > { %v6149_v20 = vpop.f32.mrf.mxu0  ;;  %6177 = vmatprep.mubr.msk.bf16.mxu0 %vm4083_vm5, %v4061_v31  ;;  %6230 = vmatpush3.bf16.msra.mxu1 %v8816_v40  ;;  %v4255_v60 = vsel %vm3679_vm11, %v4252_v19, %v4254_v12  ;;  %v3460_v63 = vadd.f32 %v8848_v30, %v3306_v8  ;;  %v4256_v11 = vrot.slane %v8953_v36, 2  ;;  %v8996_v42 = vmax.f32 %v4036_v3, 0.0 }
 0x600   : > { %v4035_v7 = vadd.f32 %v3998_v2, %v3672_v50  ;;  %v3677_v55 = vadd.f32 %v6149_v20, %v3459_v59  ;;  %v8989_v2 = vpop.permute.xlu1 %4991  ;;  %6178 = vmatmul.mubr.msk.bf16.gmra.mxu0 %vm4083_vm5, %v4062_v21  ;;  %v8998_v10 = vmax.f32 %v4037_v14, 0.0  ;;  %v4295_v1 = vsel %vm3860_vm3, %v4253_v9, 0.0  ;;  %6231 = vmatprep.subr.bf16.mxu1 %v6443_v44  ;;  %v4014_v59 = vpop.f32.mrf.mxu1 }
 0x601   : > { %v3648_v52 = vpop.f32.mrf.mxu0  ;;  %v4258_v40 = vrot.slane %v8979_v56, 2  ;;  %v3458_v0 = vadd.f32 %v8852_v47, %v3304_v46  ;;  %v4473_v54 = vrot.slane %v8904_v39, 4  ;;  %vm9855_vm4 = vcmp.eq.s32.totalorder %v9854_v17, 1 }
 0x602   : > { %v3675_v51 = vadd.f32 %v3648_v52, %v3457_v5  ;;  %v8982_v43 = vmax.f32 %v4035_v7, 0.0  ;;  %v4040_v33 = vadd.f32 %v6167_v13, %v3677_v55  ;;  %v4296_v20 = vsel %vm9855_vm4, %v4255_v60, 0.0  ;;  %v9023_v3 = vpop.permute.xlu0 %4623  ;;  %v9860_v55 = vld [vmem:[#allocation27_spill] sm:$0xff] }
 0x603   : > { %v6150_v23 = vpop.f32.mrf.mxu0  ;;  %vm4646_vm9 = vcmp.eq.s32.totalorder %v9856_v32, 1  ;;  %vm4647_vm0 = vcmp.eq.s32.totalorder %v9857_v45, 1  ;;  %v4309_v15 = vpack.c.bf16 %v4296_v20, %v4295_v1  ;;  %6232 = vmatpush3.bf16.msra.mxu1 %v6443_v44  ;;  %v4470_v18 = vrot.slane %v8907_v6, 4 }
 0x604   : > { %v4038_v4 = vadd.f32 %v4011_v48, %v3675_v51  ;;  %v3678_v25 = vadd.f32 %v6150_v23, %v3460_v63  ;;  %v4260_v30 = vrot.slane %v8982_v43, 2  ;;  %v4063_v47 = vpack.c.bf16 %v8982_v43, %v8979_v56  ;;  %v9025_v14 = vpop.permute.xlu1 %4626  ;;  %v9858_v48 = vld [vmem:[#allocation26_spill] sm:$0xff]  ;;  %v9862_v63 = vld [vmem:[#allocation29_spill] sm:$0xff] }
 0x605   : > { %v3651_v34 = vpop.f32.mrf.mxu0  ;;  %v4262_v19 = vrot.slane %v8996_v42, 2  ;;  %v4064_v13 = vpack.c.bf16 %v8998_v10, %v8996_v42  ;;  %v4257_v52 = vsel %vm3679_vm11, %v4254_v12, %v4256_v11  ;;  %v4475_v8 = vrot.slane %v8891_v57, 4  ;;  %6197 = vmatprep.mubr.msk.bf16.mxu1 %vm4083_vm5, %v4309_v15 }
 0x606   : > { %v9010_v38 = vmax.f32 %v4038_v4, 0.0  ;;  %v3676_v50 = vadd.f32 %v3651_v34, %v3458_v0  ;;  %v4041_v46 = vadd.f32 %v6168_v58, %v3678_v25  ;;  %6181 = vmatprep.mubr.msk.bf16.mxu0 %vm4083_vm5, %v4063_v47  ;;  %v4259_v5 = vsel %vm3679_vm11, %v4256_v11, %v4258_v40  ;;  %v9864_v58 = vld [vmem:[#allocation28_spill] sm:$0xff]  ;;  %v9866_v34 = vld [vmem:[#allocation38_spill] sm:$0xff] }
 0x607   : > { %v4264_v7 = vrot.slane %v8998_v10, 2  ;;  %vm9859_vm3 = vcmp.eq.s32.totalorder %v9858_v48, 1  ;;  %v4261_v23 = vsel %vm3679_vm11, %v4258_v40, %v4260_v30  ;;  %v4263_v44 = vsel %vm3679_vm11, %v4260_v30, %v4262_v19 }
 0x608   : > { %v4039_v35 = vadd.f32 %v4014_v59, %v3676_v50  ;;  %v4298_v31 = vsel %vm9859_vm3, %v4259_v5, 0.0  ;;  %v4471_v12 = vrot.slane %v8899_v61, 4  ;;  %v9033_v21 = vmax.f32 %v4040_v33, 0.0  ;;  %6182 = vmatmul.mubr.msk.bf16.gmra.mxu0 %vm4083_vm5, %v4064_v13  ;;  %v9867_v50 = vld [vmem:[#allocation39_spill] sm:$0xff] }
 0x609   : > { %v4266_v51 = vrot.slane %v9010_v38, 2  ;;  %vm9861_vm1 = vcmp.eq.s32.totalorder %v9860_v55, 1  ;;  %vm9863_vm12 = vcmp.eq.s32.totalorder %v9862_v63, 1  ;;  %vm9865_vm13 = vcmp.eq.s32.totalorder %v9864_v58, 1  ;;  %v9875_v58 = vld [vmem:[#allocation40_spill] sm:$0xff] }
 0x60a   : > { %v4297_v9 = vsel %vm9861_vm1, %v4257_v52, 0.0  ;;  %v9039_v4 = vmax.f32 %v4039_v35, 0.0  ;;  %v4299_v11 = vsel %vm9863_vm12, %v4261_v23, 0.0  ;;  %v4300_v1 = vsel %vm9865_vm13, %v4263_v44, 0.0  ;;  %v9066_v35 = vpop.permute.xlu1 %4632  ;;  %v9876_v44 = vld [vmem:[#allocation35_spill] sm:$0xff] }
 0x60b   : > { %v4310_v60 = vpack.c.bf16 %v4298_v31, %v4297_v9  ;;  %vm4649_vm7 = vcmp.eq.s32.totalorder %v9866_v34, 1  ;;  %v4481_v40 = vrot.slane %v8949_v28, 4  ;;  %v4477_v25 = vrot.slane %v8916_v62, 4  ;;  %v9869_v31 = vld [vmem:[#allocation41_spill] sm:$0xff] }
 0x60c   : > { %v9048_v0 = vmax.f32 %v4041_v46, 0.0  ;;  %v4311_v30 = vpack.c.bf16 %v4300_v1, %v4299_v11  ;;  %v4479_v33 = vrot.slane %v8955_v49, 4  ;;  %v4268_v17 = vrot.slane %v9039_v4, 2  ;;  %v9064_v46 = vpop.permute.xlu0 %4629  ;;  %v9871_v9 = vld [vmem:[#allocation33_spill] sm:$0xff]  ;;  %v9873_v11 = vld [vmem:[#allocation32_spill] sm:$0xff] }
 0x60d   : > { %6198 = vmatmul.mubr.msk.bf16.gmra.mxu1 %vm4083_vm5, %v4310_v60  ;;  %v4065_v20 = vpack.c.bf16 %v9039_v4, %v9010_v38  ;;  %v4265_v15 = vsel %vm3679_vm11, %v4262_v19, %v4264_v7  ;;  %vm4648_vm14 = vcmp.eq.s32.totalorder %v9867_v50, 1  ;;  %v4270_v47 = vrot.slane %v9033_v21, 2 }
 0x60e   : > { %6201 = vmatprep.mubr.msk.bf16.mxu1 %vm4083_vm5, %v4311_v30  ;;  %v4267_v13 = vsel %vm3679_vm11, %v4264_v7, %v4266_v51  ;;  %v4472_v59 = vsel %vm4469_vm6, %v4470_v18, %v4471_v12  ;;  %v4474_v52 = vsel %vm4469_vm6, %v4471_v12, %v4473_v54  ;;  %v4269_v18 = vsel %vm3679_vm11, %v4266_v51, %v4268_v17  ;;  %v9109_v19 = vpop.permute.xlu1 %4997 }
 0x60f   : > { %6185 = vmatprep.mubr.msk.bf16.mxu0 %vm4083_vm5, %v4065_v20  ;;  %v4302_v5 = vsel %vm3867_vm8, %v4267_v13, 0.0  ;;  %v4662_v48 = vsel %vm4646_vm9, %v4472_v59, 0.0  ;;  %v4663_v7 = vsel %vm4647_vm0, %v4474_v52, 0.0  ;;  %vm5017_vm10 = vcmp.eq.s32.totalorder %v9869_v31, 1 }
 0x610   : > { %v4066_v23 = vpack.c.bf16 %v9048_v0, %v9033_v21  ;;  %v4301_v12 = vsel %vm3866_vm2, %v4265_v15, 0.0  ;;  %v4271_v55 = vsel %vm3679_vm11, %v4268_v17, %v4270_v47  ;;  %vm9872_vm8 = vcmp.eq.s32.totalorder %v9871_v9, 1  ;;  %v9107_v52 = vpop.permute.xlu0 %4994 }
 0x611   : > { %v4303_v60 = vsel %vm9872_vm8, %v4269_v18, 0.0  ;;  %v4272_v32 = vrot.slane %v9048_v0, 2  ;;  %v4312_v63 = vpack.c.bf16 %v4302_v5, %v4301_v12  ;;  %v4678_v45 = vpack.c.bf16 %v4663_v7, %v4662_v48  ;;  %v9878_v12 = vld [vmem:[#allocation34_spill] sm:$0xff] }
 0x612   : > { %vm9874_vm15 = vcmp.eq.s32.totalorder %v9873_v11, 1  ;;  %vm5018_vm4 = vcmp.eq.s32.totalorder %v9875_v58, 1  ;;  %v4842_v1 = vrot.slane %v8899_v61, 6  ;;  %v4478_v30 = vsel %vm4469_vm6, %v4475_v8, %v4477_v25  ;;  %6186 = vmatmul.mubr.msk.bf16.gmra.mxu0 %vm4083_vm5, %v4066_v23 }
 0x613   : > { %v4304_v51 = vsel %vm9874_vm15, %v4271_v55, 0.0  ;;  %vm4650_vm2 = vcmp.eq.s32.totalorder %v8895_v53, 1  ;;  %vm4651_vm9 = vcmp.eq.s32.totalorder %v8897_v16, 1  ;;  %6213 = vmatprep.mubr.msk.bf16.mxu0 %vm4083_vm5, %v4678_v45  ;;  %v4480_v20 = vsel %vm4469_vm6, %v4477_v25, %v4479_v33  ;;  %v9149_v45 = vpop.permute.xlu1 %5003 }
 0x614   : > { %v4313_v17 = vpack.c.bf16 %v4304_v51, %v4303_v60  ;;  %v4482_v15 = vsel %vm4469_vm6, %v4479_v33, %v4481_v40  ;;  %v4844_v61 = vrot.slane %v8904_v39, 6  ;;  %v4841_v13 = vrot.slane %v8907_v6, 6 }
 0x615   : > { %v4476_v59 = vsel %vm4469_vm6, %v4473_v54, %v4475_v8  ;;  %vm4840_vm0 = vcmask 1041408   ;;  %v4665_v25 = vsel %vm4649_vm7, %v4478_v30, 0.0  ;;  %v4485_v33 = vrot.slane %v8979_v56, 4  ;;  %6202 = vmatmul.mubr.msk.bf16.gmra.mxu1 %vm4083_vm5, %v4312_v63  ;;  %v9147_v63 = vpop.permute.xlu0 %5000 }
 0x616   : > { %v4290_v5 = vsel %vm3679_vm11, %v4272_v32, 0.0  ;;  %v4273_v6 = vsel %vm3679_vm11, %v4270_v47, %v4272_v32  ;;  %vm4652_vm3 = vcmp.eq.s32.totalorder %v8924_v24, 1  ;;  %6205 = vmatprep.mubr.msk.bf16.mxu1 %vm4083_vm5, %v4313_v17  ;;  %v4843_v39 = vsel %vm4840_vm0, %v4841_v13, %v4842_v1 }
 0x617   : > { %v4845_v54 = vsel %vm4840_vm0, %v4842_v1, %v4844_v61  ;;  %v4666_v8 = vsel %vm4650_vm2, %v4480_v20, 0.0  ;;  %v4667_v34 = vsel %vm4651_vm9, %v4482_v15, 0.0  ;;  %vm5020_vm1 = vcmp.eq.s32.totalorder %v8884_v29, 1 }
 0x618   : > { %vm4653_vm12 = vcmp.eq.s32.totalorder %v8926_v41, 1  ;;  %v4664_v47 = vsel %vm4648_vm14, %v4476_v59, 0.0  ;;  %v4848_v48 = vrot.slane %v8916_v62, 6  ;;  %v4487_v7 = vrot.slane %v8982_v43, 4 }
 0x619   : > { %v4679_v18 = vpack.c.bf16 %v4665_v25, %v4664_v47  ;;  %v4483_v23 = vrot.slane %v8953_v36, 4  ;;  %vm9877_vm11 = vcmp.eq.s32.totalorder %v9876_v44, 1  ;;  %vm9879_vm13 = vcmp.eq.s32.totalorder %v9878_v12, 1 }
 0x61a   : > { %v4305_v53 = vsel %vm9877_vm11, %v4273_v6, 0.0  ;;  %v4306_v16 = vsel %vm9879_vm13, %v4290_v5, 0.0  ;;  %vm5019_vm7 = vcmp.eq.s32.totalorder %v8882_v22, 1  ;;  %v4489_v55 = vrot.slane %v8996_v42, 4  ;;  %v4636_v6 = vpop.permute.xlu0 %4635 }
 0x61b   : > { %v5033_v50 = vsel %vm5017_vm10, %v4843_v39, 0.0  ;;  %v5034_v62 = vsel %vm5018_vm4, %v4845_v54, 0.0  ;;  %v4680_v9 = vpack.c.bf16 %v4667_v34, %v4666_v8  ;;  %vm5021_vm14 = vcmp.eq.s32.totalorder %v8959_v27, 1  ;;  %6214 = vmatmul.mubr.msk.bf16.vlgmr.msra.gmra.mxu0 %vm4083_vm5, %v4679_v18  ;;  %v4639_v39 = vpop.permute.xlu1 %4638 }
 0x61c   : > { %vm5022_vm8 = vcmp.eq.s32.totalorder %v8961_v26, 1  ;;  %v4850_v60 = vrot.slane %v8955_v49, 6  ;;  %v4486_v32 = vsel %vm4469_vm6, %v4483_v23, %v4485_v33  ;;  %v4846_v31 = vrot.slane %v8891_v57, 6 }
 0x61d   : > { %v4314_v11 = vpack.c.bf16 %v4306_v16, %v4305_v53  ;;  %6217 = vmatprep.mubr.msk.bf16.mxu0 %vm4083_vm5, %v4680_v9  ;;  %v4488_v51 = vsel %vm4469_vm6, %v4485_v33, %v4487_v7  ;;  %v4490_v58 = vsel %vm4469_vm6, %v4487_v7, %v4489_v55  ;;  %vm4654_vm10 = vcmp.eq.s32.totalorder %v9023_v3, 1 }
 0x61e   : > { %v4852_v49 = vrot.slane %v8949_v28, 6  ;;  %v5049_v1 = vpack.c.bf16 %v5034_v62, %v5033_v50  ;;  %v4484_v30 = vsel %vm4469_vm6, %v4481_v40, %v4483_v23  ;;  %vm4655_vm15 = vcmp.eq.s32.totalorder %v9025_v14, 1  ;;  %v4642_v16 = vpop.permute.xlu0 %4641 }
 0x61f   : > { %v4849_v57 = vsel %vm4840_vm0, %v4846_v31, %v4848_v48  ;;  %v4493_v17 = vrot.slane %v9010_v38, 4  ;;  %6206 = vmatmul.mubr.msk.bf16.gmra.mxu1 %vm4083_vm5, %v4314_v11  ;;  %v4669_v20 = vsel %vm4653_vm12, %v4486_v32, 0.0  ;;  %v4851_v3 = vsel %vm4840_vm0, %v4848_v48, %v4850_v60 }
 0x620   : > { %6233 = vmatprep.mubr.msk.bf16.mxu1 %vm4083_vm5, %v5049_v1  ;;  %v4853_v15 = vsel %vm4840_vm0, %v4850_v60, %v4852_v49  ;;  %v4670_v28 = vsel %vm4654_vm10, %v4488_v51, 0.0  ;;  %v4671_v13 = vsel %vm4655_vm15, %v4490_v58, 0.0  ;;  %vm4656_vm4 = vcmp.eq.s32.totalorder %v9064_v46, 1 }
 0x621   : > { %v4847_v14 = vsel %vm4840_vm0, %v4844_v61, %v4846_v31  ;;  %v4495_v40 = vrot.slane %v9039_v4, 4  ;;  %v4668_v59 = vsel %vm4652_vm3, %v4484_v30, 0.0  ;;  %v5036_v41 = vsel %vm5020_vm1, %v4849_v57, 0.0 }
 0x622   : > { %v4856_v25 = vrot.slane %v8979_v56, 6  ;;  %v4491_v33 = vrot.slane %v8998_v10, 4  ;;  %v4681_v5 = vpack.c.bf16 %v4669_v20, %v4668_v59  ;;  %v4497_v54 = vrot.slane %v9033_v21, 4  ;;  %v5007_v1 = vpop.permute.xlu0 %5006 }
 0x623   : > { %v5037_v61 = vsel %vm5021_vm14, %v4851_v3, 0.0  ;;  %v5038_v8 = vsel %vm5022_vm8, %v4853_v15, 0.0  ;;  %v4682_v24 = vpack.c.bf16 %v4671_v13, %v4670_v28  ;;  %vm4657_vm2 = vcmp.eq.s32.totalorder %v9066_v35, 1 }
 0x624   : > { %v5035_v29 = vsel %vm5019_vm7, %v4847_v14, 0.0  ;;  %v4858_v56 = vrot.slane %v8982_v43, 6  ;;  %6218 = vmatmul.mubr.msk.bf16.gmra.mxu0 %vm4083_vm5, %v4681_v5  ;;  %v4494_v34 = vsel %vm4469_vm6, %v4491_v33, %v4493_v17  ;;  %v4854_v48 = vrot.slane %v8953_v36, 6 }
 0x625   : > { %v5050_v47 = vpack.c.bf16 %v5036_v41, %v5035_v29  ;;  %6221 = vmatprep.mubr.msk.bf16.mxu0 %vm4083_vm5, %v4682_v24  ;;  %v4496_v27 = vsel %vm4469_vm6, %v4493_v17, %v4495_v40  ;;  %v4498_v26 = vsel %vm4469_vm6, %v4495_v40, %v4497_v54  ;;  %vm4658_vm9 = vcmp.eq.s32.totalorder %v4636_v6, 1 }
 0x626   : > { %v4860_v7 = vrot.slane %v8996_v42, 6  ;;  %v5051_v22 = vpack.c.bf16 %v5038_v8, %v5037_v61  ;;  %v4492_v18 = vsel %vm4469_vm6, %v4489_v55, %v4491_v33  ;;  %vm4659_vm3 = vcmp.eq.s32.totalorder %v4639_v39, 1  ;;  %v4645_v55 = vpop.permute.xlu1 %4644  ;;  %v5013_v59 = vpop.permute.xlu0 %5012 }
 0x627   : > { %v4499_v43 = vrot.slane %v9048_v0, 4  ;;  %6234 = vmatmul.mubr.msk.bf16.vlgmr.msra.gmra.mxu1 %vm4083_vm5, %v5050_v47  ;;  %v4857_v23 = vsel %vm4840_vm0, %v4854_v48, %v4856_v25  ;;  %v4673_v36 = vsel %vm4657_vm2, %v4494_v34, 0.0  ;;  %v4859_v44 = vsel %vm4840_vm0, %v4856_v25, %v4858_v56 }
 0x628   : > { %6237 = vmatprep.mubr.msk.bf16.mxu1 %vm4083_vm5, %v5051_v22  ;;  %v4861_v53 = vsel %vm4840_vm0, %v4858_v56, %v4860_v7  ;;  %v4674_v42 = vsel %vm4658_vm9, %v4496_v27, 0.0  ;;  %v4675_v12 = vsel %vm4659_vm3, %v4498_v26, 0.0  ;;  %vm5023_vm1 = vcmp.eq.s32.totalorder %v8987_v37, 1 }
 0x629   : > { %vm5024_vm12 = vcmp.eq.s32.totalorder %v8989_v2, 1  ;;  %v4855_v50 = vsel %vm4840_vm0, %v4852_v49, %v4854_v48  ;;  %v4672_v35 = vsel %vm4656_vm4, %v4492_v18, 0.0  ;;  %vm5025_vm11 = vcmp.eq.s32.totalorder %v9107_v52, 1 }
 0x62a   : > { %vm5026_vm13 = vcmp.eq.s32.totalorder %v9109_v19, 1  ;;  %v5040_v62 = vsel %vm5024_vm12, %v4857_v23, 0.0  ;;  %v4683_v9 = vpack.c.bf16 %v4673_v36, %v4672_v35  ;;  %v4864_v60 = vrot.slane %v9010_v38, 6  ;;  %v5010_v30 = vpop.permute.xlu1 %5009 }
 0x62b   : > { %v5041_v32 = vsel %vm5025_vm11, %v4859_v44, 0.0  ;;  %v5042_v31 = vsel %vm5026_vm13, %v4861_v53, 0.0  ;;  %v4684_v11 = vpack.c.bf16 %v4675_v12, %v4674_v42  ;;  %v4517_v2 = vsel %vm4469_vm6, %v4499_v43, 0.0 }
 0x62c   : > { %v4866_v51 = vrot.slane %v9039_v4, 6  ;;  %v5039_v58 = vsel %vm5023_vm1, %v4855_v50, 0.0  ;;  %6222 = vmatmul.mubr.msk.bf16.gmra.mxu0 %vm4083_vm5, %v4683_v9  ;;  %v4500_v46 = vsel %vm4469_vm6, %v4497_v54, %v4499_v43  ;;  %v4862_v52 = vrot.slane %v8998_v10, 6 }
 0x62d   : > { %v5052_v19 = vpack.c.bf16 %v5040_v62, %v5039_v58  ;;  %6225 = vmatprep.mubr.msk.bf16.mxu0 %vm4083_vm5, %v4684_v11  ;;  %vm4660_vm7 = vcmp.eq.s32.totalorder %v4642_v16, 1  ;;  %vm4661_vm14 = vcmp.eq.s32.totalorder %v4645_v55, 1  ;;  %v4868_v38 = vrot.slane %v9033_v21, 6 }
 0x62e   : > { %v5053_v49 = vpack.c.bf16 %v5042_v31, %v5041_v32  ;;  %v4865_v37 = vsel %vm4840_vm0, %v4862_v52, %v4864_v60  ;;  %v4676_v4 = vsel %vm4660_vm7, %v4500_v46, 0.0  ;;  %v4677_v57 = vsel %vm4661_vm14, %v4517_v2, 0.0  ;;  %v5016_v41 = vpop.permute.xlu1 %5015  ;;  %v9266_v32 = vld [vmem:[%s9397_s15] ss:$0 sm:$0xff] }
 0x62f   : > { %6238 = vmatmul.mubr.msk.bf16.gmra.mxu1 %vm4083_vm5, %v5052_v19  ;;  %v4867_v10 = vsel %vm4840_vm0, %v4864_v60, %v4866_v51  ;;  %v4869_v17 = vsel %vm4840_vm0, %v4866_v51, %v4868_v38  ;;  %vm5028_vm6 = vcmp.eq.s32.totalorder %v9149_v45, 1  ;;  %v4863_v20 = vsel %vm4840_vm0, %v4860_v7, %v4862_v52 }
 0x630   : > { %6241 = vmatprep.mubr.msk.bf16.mxu1 %vm4083_vm5, %v5053_v49  ;;  %vm5029_vm8 = vcmp.eq.s32.totalorder %v5007_v1, 1  ;;  %vm5030_vm10 = vcmp.eq.s32.totalorder %v5010_v30, 1  ;;  %v5044_v21 = vsel %vm5028_vm6, %v4865_v37, 0.0  ;;  %v4685_v3 = vpack.c.bf16 %v4677_v57, %v4676_v4 }
 0x631   : > { %vm5027_vm15 = vcmp.eq.s32.totalorder %v9147_v63, 1  ;;  %v4870_v15 = vrot.slane %v9048_v0, 6  ;;  %v5045_v28 = vsel %vm5029_vm8, %v4867_v10, 0.0  ;;  %v5046_v13 = vsel %vm5030_vm10, %v4869_v17, 0.0 }
 0x632   : > { %v5043_v14 = vsel %vm5027_vm15, %v4863_v20, 0.0  ;;  %v5055_v25 = vpack.c.bf16 %v5046_v13, %v5045_v28  ;;  %vm5031_vm4 = vcmp.eq.s32.totalorder %v5013_v59, 1  ;;  %vm5032_vm2 = vcmp.eq.s32.totalorder %v5016_v41, 1 }
 0x633   : > { %v5054_v40 = vpack.c.bf16 %v5044_v21, %v5043_v14  ;;  %v4888_v45 = vsel %vm4840_vm0, %v4870_v15, 0.0  ;;  %v4871_v33 = vsel %vm4840_vm0, %v4868_v38, %v4870_v15 }
 0x634   : > { %6226 = vmatmul.mubr.msk.bf16.gmra.mxu0 %vm4083_vm5, %v4685_v3  ;;  %v5047_v0 = vsel %vm5031_vm4, %v4871_v33, 0.0  ;;  %v5048_v63 = vsel %vm5032_vm2, %v4888_v45, 0.0 }
 0x635   : > { %v5056_v5 = vpack.c.bf16 %v5048_v63, %v5047_v0 }
 0x637   : > { %6242 = vmatmul.mubr.msk.bf16.gmra.mxu1 %vm4083_vm5, %v5054_v40 }
 0x638   : > { %6245 = vmatprep.mubr.msk.bf16.mxu1 %vm4083_vm5, %v5055_v25 }
 0x63f   : > { %6246 = vmatmul.mubr.msk.bf16.gmra.mxu1 %vm4083_vm5, %v5056_v5 }
 0x6b5   : > { %v6175_v6 = vpop.f32.mrf.mxu0 }
 0x6b6   : > { %v4213_v51 = vadd.f32 %v6175_v6, %v9266_v32 }
 0x6b7   : > { %v4142_v39 = vpop.f32.mrf.mxu0 }
 0x6b8   : > { %v4211_v52 = vadd.f32 %v9266_v32, %v4142_v39 }
 0x6b9   : > { %v6176_v54 = vpop.f32.mrf.mxu0 }
 0x6ba   : > { %v4214_v1 = vadd.f32 %v6176_v54, %v9266_v32 }
 0x6bb   : > { %v4145_v61 = vpop.f32.mrf.mxu0 }
 0x6bc   : > { %v4212_v10 = vadd.f32 %v9266_v32, %v4145_v61 }
 0x6be   : > { %v6195_v8 = vpop.f32.mrf.mxu1 }
 0x6bf   : > { %v4455_v19 = vadd.f32 %v6195_v8, %v4213_v51 }
 0x6c0   : > { %v6179_v24 = vpop.f32.mrf.mxu0  ;;  %v4390_v29 = vpop.f32.mrf.mxu1 }
 0x6c1   : > { %v4453_v30 = vadd.f32 %v4390_v29, %v4211_v52  ;;  %v4217_v15 = vadd.f32 %v6179_v24, %v9266_v32 }
 0x6c2   : > { %v4158_v56 = vpop.f32.mrf.mxu0  ;;  %v6196_v34 = vpop.f32.mrf.mxu1 }
 0x6c3   : > { %v4456_v17 = vadd.f32 %v6196_v34, %v4214_v1  ;;  %v4215_v25 = vadd.f32 %v9266_v32, %v4158_v56 }
 0x6c4   : > { %v6180_v47 = vpop.f32.mrf.mxu0  ;;  %v4393_v27 = vpop.f32.mrf.mxu1 }
 0x6c5   : > { %v4454_v13 = vadd.f32 %v4393_v27, %v4212_v10  ;;  %v4218_v39 = vadd.f32 %v6180_v47, %v9266_v32 }
 0x6c6   : > { %v9235_v48 = vpop.f32.mrf.mxu0 }
 0x6c7   : > { %v4216_v34 = vadd.f32 %v9266_v32, %v9235_v48 }
 0x6c8   : > { %v9237_v26 = vpop.f32.mrf.mxu0 }
 0x6c9   : > { %v4221_v47 = vadd.f32 %v9237_v26, %v9266_v32 }
 0x6ca   : > { %v9239_v7 = vpop.f32.mrf.mxu0 }
 0x6cc   : > { %v9241_v18 = vpop.f32.mrf.mxu0 }
 0x6cd   : > { %v6199_v22 = vpop.f32.mrf.mxu1 }
 0x6ce   : > { %v9243_v23 = vpop.f32.mrf.mxu0  ;;  %v4459_v33 = vadd.f32 %v6199_v22, %v4217_v15 }
 0x6cf   : > { %v4406_v43 = vpop.f32.mrf.mxu1 }
 0x6d0   : > { %v4457_v61 = vadd.f32 %v4406_v43, %v4215_v25 }
 0x6d1   : > { %v6200_v36 = vpop.f32.mrf.mxu1 }
 0x6d2   : > { %v9245_v44 = vpop.f32.mrf.mxu0  ;;  %v4460_v22 = vadd.f32 %v6200_v36, %v4218_v39  ;;  %v4219_v36 = vadd.f32 %v9266_v32, %v9239_v7 }
 0x6d3   : > { %v9247_v53 = vpop.f32.mrf.mxu1 }
 0x6d4   : > { %v9249_v42 = vpop.f32.mrf.mxu0 }
 0x6d5   : > { %v9251_v12 = vpop.f32.mrf.mxu1 }
 0x6d6   : > { %v9253_v16 = vpop.f32.mrf.mxu0 }
 0x6d7   : > { %v9255_v55 = vpop.f32.mrf.mxu1 }
 0x6d8   : > { %v9257_v50 = vpop.f32.mrf.mxu0 }
 0x6d9   : > { %v9259_v35 = vpop.f32.mrf.mxu1 }
 0x6db   : > { %v6215_v62 = vpop.f32.mrf.mxu0  ;;  %v9261_v9 = vpop.f32.mrf.mxu1 }
 0x6dc   : > { %v4826_v37 = vadd.f32 %v6215_v62, %v4455_v19 }
 0x6dd   : > { %v4761_v60 = vpop.f32.mrf.mxu0 }
 0x6de   : > { %v4824_v20 = vadd.f32 %v4761_v60, %v4453_v30  ;;  %v4463_v30 = vadd.f32 %v9251_v12, %v4221_v47  ;;  %v4220_v12 = vadd.f32 %v9266_v32, %v9243_v23 }
 0x6df   : > { %v9268_v31 = vpop.f32.mrf.mxu1  ;;  %v6216_v11 = vpop.f32.mrf.mxu0 }
 0x6e0   : > { %v4827_v14 = vadd.f32 %v6216_v11, %v4456_v17  ;;  %v4461_v17 = vadd.f32 %v9255_v55, %v4219_v36 }
 0x6e1   : > { %v9270_v2 = vpop.f32.mrf.mxu1  ;;  %v4764_v58 = vpop.f32.mrf.mxu0 }
 0x6e2   : > { %v4825_v0 = vadd.f32 %v4764_v58, %v4454_v13  ;;  %v4458_v58 = vadd.f32 %v9247_v53, %v4216_v34  ;;  %v4222_v53 = vadd.f32 %v9241_v18, %v9266_v32 }
 0x6e3   : > { %v9273_v46 = vpop.f32.mrf.mxu1 }
 0x6e4   : > { %v6219_v38 = vpop.f32.mrf.mxu0  ;;  %v4464_v15 = vadd.f32 %v9259_v35, %v4222_v53  ;;  %v4223_v35 = vadd.f32 %v9266_v32, %v9249_v42 }
 0x6e5   : > { %v9277_v49 = vpop.f32.mrf.mxu1  ;;  %v4830_v8 = vadd.f32 %v6219_v38, %v4459_v33 }
 0x6e6   : > { %v4777_v4 = vpop.f32.mrf.mxu0  ;;  %v4465_v39 = vadd.f32 %v9270_v2, %v4223_v35 }
 0x6e7   : > { %v6235_v57 = vpop.f32.mrf.mxu1  ;;  %v4828_v62 = vadd.f32 %v4777_v4, %v4457_v61 }
 0x6e8   : > { %v5197_v21 = vadd.f32 %v6235_v57, %v4826_v37  ;;  %v6220_v3 = vpop.f32.mrf.mxu0 }
 0x6e9   : > { %v5132_v28 = vpop.f32.mrf.mxu1  ;;  %v4831_v52 = vadd.f32 %v6220_v3, %v4460_v22 }
 0x6ea   : > { %v5213_v40 = vmax.f32 %v5197_v21, 0.0  ;;  %v5195_v59 = vadd.f32 %v5132_v28, %v4824_v20  ;;  %v4780_v41 = vpop.f32.mrf.mxu0 }
 0x6eb   : > { %v6236_v45 = vpop.f32.mrf.mxu1  ;;  %v4829_v37 = vadd.f32 %v4780_v41, %v4458_v58 }
 0x6ec   : > { %5229 = vst [vmem:[%s9285_s29 + $0x10] sm:$0xff] %v5213_v40  ;;  %v5211_v63 = vmax.f32 %v5195_v59, 0.0  ;;  %v5198_v5 = vadd.f32 %v6236_v45, %v4827_v14  ;;  %v6223_v6 = vpop.f32.mrf.mxu0  ;;  %v4225_v14 = vadd.f32 %v9245_v44, %v9266_v32  ;;  %v4462_v59 = vadd.f32 %v9261_v9, %v4220_v12 }
 0x6ed   : > { %v5135_v54 = vpop.f32.mrf.mxu1  ;;  %v4834_v20 = vadd.f32 %v6223_v6, %v4463_v30 }
 0x6ee   : > { %5227 = vst [vmem:[%s9285_s29] sm:$0xff] %v5211_v63  ;;  %v5214_v24 = vmax.f32 %v5198_v5, 0.0  ;;  %v5196_v29 = vadd.f32 %v5135_v54, %v4825_v0  ;;  %v4793_v56 = vpop.f32.mrf.mxu0  ;;  %v4467_v33 = vadd.f32 %v9268_v31, %v4225_v14  ;;  %v4226_v5 = vadd.f32 %v9253_v16, %v9266_v32 }
 0x6ef   : > { %v6239_v27 = vpop.f32.mrf.mxu1  ;;  %v4832_v28 = vadd.f32 %v4793_v56, %v4461_v17  ;;  %v4224_v31 = vadd.f32 %v9266_v32, %v9257_v50 }
 0x6f0   : > { %5230 = vst [vmem:[%s9285_s29 + $0x18] sm:$0xff] %v5214_v24  ;;  %v5212_v60 = vmax.f32 %v5196_v29, 0.0  ;;  %v5201_v11 = vadd.f32 %v6239_v27, %v4830_v8  ;;  %v6224_v51 = vpop.f32.mrf.mxu0  ;;  %v4468_v24 = vadd.f32 %v9273_v46, %v4226_v5 }
 0x6f1   : > { %v5148_v43 = vpop.f32.mrf.mxu1  ;;  %v4835_v41 = vadd.f32 %v6224_v51, %v4464_v15  ;;  %v4466_v27 = vadd.f32 %v9277_v49, %v4224_v31 }
 0x6f2   : > { %5228 = vst [vmem:[%s9285_s29 + $0x8] sm:$0xff] %v5212_v60  ;;  %v5217_v19 = vmax.f32 %v5201_v11, 0.0  ;;  %v5199_v38 = vadd.f32 %v5148_v43, %v4828_v62  ;;  %v4796_v48 = vpop.f32.mrf.mxu0 }
 0x6f3   : > { %v6240_v1 = vpop.f32.mrf.mxu1  ;;  %v4833_v0 = vadd.f32 %v4796_v48, %v4462_v59 }
 0x6f4   : > { %5233 = vst [vmem:[%s9285_s29 + $0x30] sm:$0xff] %v5217_v19  ;;  %v5215_v4 = vmax.f32 %v5199_v38, 0.0  ;;  %v5202_v26 = vadd.f32 %v6240_v1, %v4831_v52  ;;  %v6227_v10 = vpop.f32.mrf.mxu0 }
 0x6f5   : > { %v5151_v57 = vpop.f32.mrf.mxu1  ;;  %v4838_v54 = vadd.f32 %v6227_v10, %v4467_v33 }
 0x6f6   : > { %5231 = vst [vmem:[%s9285_s29 + $0x20] sm:$0xff] %v5215_v4  ;;  %v5218_v21 = vmax.f32 %v5202_v26, 0.0  ;;  %v5200_v7 = vadd.f32 %v5151_v57, %v4829_v37  ;;  %v4809_v40 = vpop.f32.mrf.mxu0 }
 0x6f7   : > { %v6243_v3 = vpop.f32.mrf.mxu1  ;;  %v4836_v29 = vadd.f32 %v4809_v40, %v4465_v39 }
 0x6f8   : > { %5234 = vst [vmem:[%s9285_s29 + $0x38] sm:$0xff] %v5218_v21  ;;  %v5216_v13 = vmax.f32 %v5200_v7, 0.0  ;;  %v5205_v18 = vadd.f32 %v6243_v3, %v4834_v20  ;;  %v6228_v9 = vpop.f32.mrf.mxu0 }
 0x6f9   : > { %v5164_v55 = vpop.f32.mrf.mxu1  ;;  %v4839_v22 = vadd.f32 %v6228_v9, %v4468_v24 }
 0x6fa   : > { %5232 = vst [vmem:[%s9285_s29 + $0x28] sm:$0xff] %v5216_v13  ;;  %v5221_v25 = vmax.f32 %v5205_v18, 0.0  ;;  %v5203_v23 = vadd.f32 %v5164_v55, %v4832_v28  ;;  %v4812_v2 = vpop.f32.mrf.mxu0 }
 0x6fb   : > { %v6244_v45 = vpop.f32.mrf.mxu1  ;;  %v4837_v46 = vadd.f32 %v4812_v2, %v4466_v27 }
 0x6fc   : > { %5237 = vst [vmem:[%s9285_s29 + $0x50] sm:$0xff] %v5221_v25  ;;  %v5219_v63 = vmax.f32 %v5203_v23, 0.0  ;;  %v5206_v44 = vadd.f32 %v6244_v45, %v4835_v41 }
 0x6fd   : > { %v5167_v6 = vpop.f32.mrf.mxu1 }
 0x6fe   : > { %5235 = vst [vmem:[%s9285_s29 + $0x40] sm:$0xff] %v5219_v63  ;;  %v5222_v61 = vmax.f32 %v5206_v44, 0.0  ;;  %v5204_v42 = vadd.f32 %v5167_v6, %v4833_v0 }
 0x6ff   : > { %v6247_v8 = vpop.f32.mrf.mxu1 }
 0x700   : > { %5238 = vst [vmem:[%s9285_s29 + $0x58] sm:$0xff] %v5222_v61  ;;  %v5220_v16 = vmax.f32 %v5204_v42, 0.0  ;;  %v5209_v56 = vadd.f32 %v6247_v8, %v4838_v54 }
 0x701   : > { %v5180_v34 = vpop.f32.mrf.mxu1 }
 0x702   : > { %5236 = vst [vmem:[%s9285_s29 + $0x48] sm:$0xff] %v5220_v16  ;;  %v5225_v62 = vmax.f32 %v5209_v56, 0.0  ;;  %v5207_v50 = vadd.f32 %v5180_v34, %v4836_v29 }
 0x703   : > { %v6248_v32 = vpop.f32.mrf.mxu1 }
 0x704   : > { %5241 = vst [vmem:[%s9285_s29 + $0x70] sm:$0xff] %v5225_v62  ;;  %v5223_v60 = vmax.f32 %v5207_v50, 0.0  ;;  %v5210_v11 = vadd.f32 %v6248_v32, %v4839_v22 }
 0x705   : > { %v5183_v51 = vpop.f32.mrf.mxu1 }
 0x706   : > { %5239 = vst [vmem:[%s9285_s29 + $0x60] sm:$0xff] %v5223_v60  ;;  %v5226_v47 = vmax.f32 %v5210_v11, 0.0  ;;  %v5208_v43 = vadd.f32 %v5183_v51, %v4837_v46 }
 0x708   : > { %5242 = vst [vmem:[%s9285_s29 + $0x78] sm:$0xff] %v5226_v47  ;;  %v5224_v49 = vmax.f32 %v5208_v43, 0.0 }
 0x70a   : > { %5240 = vst [vmem:[%s9285_s29 + $0x68] sm:$0xff] %v5224_v49 }
 0x70b   : > { %6655 = shalt.err (!%p6652_p3)
}
 0x70c   : > { %s6656_s27 = scalar_lea.hbm %s9334_s30, 2048  ;;  %s6660_s29 = scalar_lea.hbm %s9398_s16, 4096 }
 0x70d   : > { %p6657_p4 = scmp.ne.s32.totalorder %s9334_s30, %s6656_s27  ;;  %p6661_p9 = scmp.lt.s32.totalorder %s9334_s30, %s9398_s16 }
 0x70e   : > { %p6662_p8 = scmp.lt.s32.totalorder %s6660_s29, %s6656_s27 }
 0x70f   : > { %p6658_p7 = pnand %p6657_p4, %p9880_p6 }
 0x710   : > { %p6663_p11 = por %p6662_p8, %p6661_p9 }
 0x711   : > { %p6659_p12 = pneg %p6658_p7 }
 0x713   : > { %p6664_p5 = pnand %p6663_p11, %p6659_p12 }
 0x715   : > { %6667 = shalt.err (!%p6664_p5)
}
 0x716   : > { %s6732_s17 = smov 128   ;;  %s6733_s20 = smov 8  }
 0x717   : > { %6277 = dma.vmem_to_hbm [thread:$0]  (%p9880_p6), %s9336_s23, 2048, %s9334_s30, %s9342_s25, %s6732_s17, %s6732_s17, %s6733_s20  }
 0x718 PF: > { %s9881_s19 = sld [smem:[#allocation20_spill]]  ;;  %p6319_p10 = scmp.ge.s32.totalorder %s6718_s24, 2 }
 0x719   : > { %s9882_s26 = sld [smem:[#allocation24_spill]] }
 0x71e   : > { %s5272_s28 = sand.u32 1, %s9881_s19  }
 0x71f   : > { %p9883_p0 = scmp.ne.s32.totalorder %s9882_s26, 0  ;;  %s5273_s27 = scalar_lea.sflag [#allocation4], %s5272_s28 }
 0x721   : > { %p6302_p1 = pnand %p6319_p10, %p9883_p0 }
 0x723   : > { %p6303_p13 = pneg %p6302_p1 }
 0x725   : > { %6701 = dma.done.wait (%p6303_p13), %s5273_s27, 2048  }
 0x726   : > { %6703 = vsyncadd (%p6303_p13), %s5273_s27, 4294965248  ;;  %s9884_s24 = sld [smem:[#allocation22_spill]]  ;;  %s9887_s21 = smov %s6710_s22 }
 0x727   : > { %s9885_s3 = sld [smem:[#allocation21_spill]] }
 0x728   : > { %s9886_s23 = sld [smem:[#allocation23_spill]] }
 0x72c   : > { %p30_p2 = scmp.ge.s32.totalorder %s9884_s24, 4  }
 0x72d   : > { %s9888_s22 = smov %s9885_s3 }
 0x72e   :  { %32 = sbr.rel (!%p30_p2) target bundleno = 11 (0xb), region = 158 }
 0x733   :  { %5278 = vsyncpa [#allocation3], 1 }
 0x734   :  { %5280 = vsyncpa [#allocation3 + $0x1], 1 }
 0x735   :  { %5281 = vsyncpa [#allocation6], 1 }
 0x736   :  { %5282 = vsyncpa [#allocation9], 1 }
 0x737   :  { %5283 = vsyncpa [#allocation12], 1 }
 0x738   :  { %5284 = vsyncpa [#allocation4], 1 }
 0x739   :  { %5286 = vsyncpa [#allocation4 + $0x1], 1 }

</bundles_post_ra>
